<compile_context>
chip_gen: v6e
topology: v6e:2x2x1
jax: 0.10.0
libtpu: 0.0.40
codegen_flags: <defaults>
</compile_context>

<pallas_src>
import math
import jax
import jax.numpy as jnp
from jax.experimental import pallas as pl
from jax.experimental.pallas import tpu as pltpu

# ---- synthetic hyper-params (small, consistent with the module's __init__) ----
B = 2            # batch
S = 8            # args.window_size
M = 16           # modality embedding size (e.g. TEXT_EMBEDDING_SIZES[...])
D = 32           # final_encoder_args['embedding_size']
H = 4            # final_encoder_args['n_heads']
DH = D // H
FF = 4 * D       # dim_feedforward = 4 * embedding_size
N_LAYERS = 2     # final_encoder_args['n_layers']
N = B * S        # flattened token count
LN_EPS = 1e-5

# TODO(synk): the 'time2vec' position-embedding branch (Time2Vec module) is not defined in
# the provided snippet; only the 'learned' branch is implemented here.
# Dropout layers are identity (eval-mode semantics).


# ------------------------- shared math helpers -----------------------------------------------
def _layernorm(x, g, b):
    mu = jnp.mean(x, axis=-1, keepdims=True)
    d = x - mu
    var = jnp.mean(d * d, axis=-1, keepdims=True)
    return d * jax.lax.rsqrt(var + LN_EPS) * g + b


def _gelu_tanh(x):
    # tanh-form GELU: one EUP tanh + a handful of VPU ops (vs the 10-op erf polynomial).
    c = 0.7978845608028654  # sqrt(2/pi)
    return 0.5 * x * (1.0 + jnp.tanh(c * (x + 0.044715 * x * x * x)))


# ----------------------------------- fused Pallas kernel ------------------------------------
def fused_transformer_kernel(mod_ref, wp_ref, posb_ref,
                             ln1g_ref, ln1b_ref,
                             wq_ref, bq_ref, wk_ref, bk_ref, wv_ref, bv_ref,
                             wo_ref, bo_ref,
                             ln2g_ref, ln2b_ref, w1_ref, b1_ref, w2_ref, b2_ref,
                             pool_ref, wc_ref, bc_ref,
                             logits_ref, probas_ref):
    # --- modality projection + (learned pos + proj bias), x stays (B*S, D) throughout -------
    x = jnp.dot(mod_ref[...], wp_ref[...],
                preferred_element_type=jnp.float32) + posb_ref[...]          # (N, D)

    # --- N_LAYERS pre-norm encoder layers, statically unrolled -------------------------------
    for l in range(N_LAYERS):
        # self-attention block: x = x + out_proj(MHA(LN1(x)))
        xn = _layernorm(x, ln1g_ref[l], ln1b_ref[l])                         # (N, D)
        attn = jnp.zeros((N, D), jnp.float32)
        for h in range(H):                       # static head loop, everything lane-0 aligned
            i = l * H + h
            # per-head projections (weights pre-sliced, softmax scale folded into wq/bq)
            qh = jnp.dot(xn, wq_ref[i], preferred_element_type=jnp.float32) + bq_ref[i]
            kh = jnp.dot(xn, wk_ref[i], preferred_element_type=jnp.float32) + bk_ref[i]
            vh = jnp.dot(xn, wv_ref[i], preferred_element_type=jnp.float32) + bv_ref[i]
            sc = jnp.einsum('bqd,bkd->bqk',
                            qh.reshape(B, S, DH), kh.reshape(B, S, DH),
                            preferred_element_type=jnp.float32)              # (B, S, S)
            sc = sc - jnp.max(sc, axis=-1, keepdims=True)
            p = jnp.exp(sc)
            p = p * pl.reciprocal(jnp.sum(p, axis=-1, keepdims=True), approx=True)
            oh = jnp.einsum('bqk,bkd->bqd', p, vh.reshape(B, S, DH),
                            preferred_element_type=jnp.float32)              # (B, S, DH)
            # per-head slice of the output projection -> no concat / lane-masked merge
            attn = attn + jnp.dot(oh.reshape(N, DH), wo_ref[i],
                                  preferred_element_type=jnp.float32)
        x = x + attn + bo_ref[l]                 # dropout1 -> identity (eval)

        # feed-forward block: x = x + W2 @ gelu(W1 @ LN2(x))
        xn2 = _layernorm(x, ln2g_ref[l], ln2b_ref[l])
        hdn = _gelu_tanh(jnp.dot(xn2, w1_ref[l],
                                 preferred_element_type=jnp.float32) + b1_ref[l])
        x = x + jnp.dot(hdn, w2_ref[l], preferred_element_type=jnp.float32) + b2_ref[l]

    # --- mean pool (as a matmul, no reshape of x) + classification head + sigmoid -----------
    pooled = jnp.dot(pool_ref[...], x, preferred_element_type=jnp.float32)   # (B, D)
    logits = jnp.dot(pooled, wc_ref[...],
                     preferred_element_type=jnp.float32) + bc_ref[...]       # (B, 1)
    logits_ref[...] = logits
    probas_ref[...] = 1.0 / (1.0 + jnp.exp(-logits))                         # exact sigmoid


# ----------------------------------- wrapper --------------------------------------------------
def pack_params(params):
    """Pre-split weights per head / per layer so the fused kernel needs no lane-offset
    slices or concats, fold the softmax scale into wq/bq and the projection bias into the
    tiled positional embedding, and build the (B, B*S) mean-pool matrix."""
    layers = params['layers']
    scale = 1.0 / math.sqrt(DH)

    # learned pos tiled over batch + modality-projection bias folded in -> one (N, D) add
    posb = jnp.broadcast_to(params['pos'], (B, S, D)).reshape(N, D) + params['bp']
    # block-diagonal averaging matrix: pooled = pool @ x
    pool = jnp.kron(jnp.eye(B, dtype=jnp.float32),
                    jnp.ones((1, S), jnp.float32)) * (1.0 / S)               # (B, N)

    def qkv_split(col0, scl):
        w = jnp.stack([lp['wqkv'][:, col0 + h * DH: col0 + (h + 1) * DH] * scl
                       for lp in layers for h in range(H)], axis=0)          # (L*H, D, DH)
        b = jnp.stack([lp['bqkv'][:, col0 + h * DH: col0 + (h + 1) * DH] * scl
                       for lp in layers for h in range(H)], axis=0)          # (L*H, 1, DH)
        return w, b

    wq, bq = qkv_split(0, scale)          # softmax scale folded into q projection
    wk, bk = qkv_split(D, 1.0)
    wv, bv = qkv_split(2 * D, 1.0)
    wo = jnp.stack([lp['wo'][h * DH:(h + 1) * DH, :]
                    for lp in layers for h in range(H)], axis=0)             # (L*H, DH, D)
    bo = jnp.stack([lp['bo'] for lp in layers], axis=0)                      # (L, 1, D)

    st = lambda k: jnp.stack([lp[k] for lp in layers], axis=0)
    return (params['wp'], posb,
            st('ln1g'), st('ln1b'),
            wq, bq, wk, bk, wv, bv,
            wo, bo,
            st('ln2g'), st('ln2b'), st('w1'), st('b1'), st('w2'), st('b2'),
            pool, params['wc'], params['bc'])


@jax.jit
def forward(modality, packed):
    # Single pallas_call, no grid: every operand is DMA'd whole into VMEM exactly once
    # (weights + activations ~150 KB, far under every generation's VMEM limit).
    mod2d = modality.reshape(N, M)
    vmem_spec = pl.BlockSpec(memory_space=pltpu.MemorySpace.VMEM)
    n_in = 1 + len(packed)
    logits, probas = pl.pallas_call(
        fused_transformer_kernel,
        out_shape=(jax.ShapeDtypeStruct((B, 1), jnp.float32),
                   jax.ShapeDtypeStruct((B, 1), jnp.float32)),
        in_specs=[vmem_spec] * n_in,
        out_specs=(vmem_spec, vmem_spec),
    )(mod2d, *packed)
    return {'logits': logits, 'probas': probas}


# ----------------------------------- pure-JAX reference --------------------------------------
def ref_forward(modality, params):
    """Torch-faithful reference (exact-erf GELU, exact softmax/sigmoid)."""
    x = modality @ params['wp'] + params['bp'] + params['pos']
    for lp in params['layers']:
        xn = _layernorm(x, lp['ln1g'], lp['ln1b'])
        qkv = xn @ lp['wqkv'] + lp['bqkv']
        q = qkv[..., :D].reshape(B, S, H, DH)
        k = qkv[..., D:2 * D].reshape(B, S, H, DH)
        v = qkv[..., 2 * D:].reshape(B, S, H, DH)
        s = jnp.einsum('bqhd,bkhd->bhqk', q, k) / math.sqrt(DH)
        p = jax.nn.softmax(s, axis=-1)
        o = jnp.einsum('bhqk,bkhd->bqhd', p, v).reshape(B, S, D)
        x = x + o @ lp['wo'] + lp['bo']
        xn2 = _layernorm(x, lp['ln2g'], lp['ln2b'])
        x = x + jax.nn.gelu(xn2 @ lp['w1'] + lp['b1'], approximate=False) @ lp['w2'] + lp['b2']
    pooled = x.mean(axis=1)
    logits = pooled @ params['wc'] + params['bc']
    return logits, jax.nn.sigmoid(logits)


# ----------------------------------- deterministic init --------------------------------------
def init_params(key):
    keys = iter(jax.random.split(key, 64))

    def rnd(shape, scale=0.08):
        return (scale * jax.random.normal(next(keys), shape)).astype(jnp.float32)

    params = {
        'wp': rnd((M, D)), 'bp': rnd((1, D)),
        'pos': rnd((1, S, D)),                       # nn.Parameter(randn(1, window, D))
        'wc': rnd((D, 1)), 'bc': rnd((1, 1)),
        'layers': [],
    }
    for _ in range(N_LAYERS):
        params['layers'].append({
            'ln1g': jnp.ones((1, D), jnp.float32), 'ln1b': jnp.zeros((1, D), jnp.float32),
            'wqkv': rnd((D, 3 * D)), 'bqkv': rnd((1, 3 * D)),
            'wo': rnd((D, D)), 'bo': rnd((1, D)),
            'ln2g': jnp.ones((1, D), jnp.float32), 'ln2b': jnp.zeros((1, D), jnp.float32),
            'w1': rnd((D, FF)), 'b1': rnd((1, FF)),
            'w2': rnd((FF, D)), 'b2': rnd((1, D)),
        })
    return params


if __name__ == "__main__":
    root = jax.random.PRNGKey(0)
    k_in, k_par = jax.random.split(root)
    params = init_params(k_par)
    modality = jax.random.normal(k_in, (B, S, M), dtype=jnp.float32)

    packed = pack_params(params)
    out = forward(modality, packed)
    jax.block_until_ready(out)

    ref_logits, ref_probas = ref_forward(modality, params)
    assert out['logits'].shape == (B, 1) and out['probas'].shape == (B, 1)
    assert jnp.allclose(out['logits'], ref_logits, atol=5e-3, rtol=5e-2)
    assert jnp.allclose(out['probas'], ref_probas, atol=5e-3, rtol=5e-2)

    print("KERNEL_OK")
</pallas_src>

<mosaic_0001>
module attributes {stable_mosaic.version = 11 : i64} {
  func.func @fused_transformer_kernel(%arg0: memref<16x16xf32, #tpu.memory_space<vmem>>, %arg1: memref<16x32xf32, #tpu.memory_space<vmem>>, %arg2: memref<16x32xf32, #tpu.memory_space<vmem>>, %arg3: memref<2x1x32xf32, #tpu.memory_space<vmem>>, %arg4: memref<2x1x32xf32, #tpu.memory_space<vmem>>, %arg5: memref<8x32x8xf32, #tpu.memory_space<vmem>>, %arg6: memref<8x1x8xf32, #tpu.memory_space<vmem>>, %arg7: memref<8x32x8xf32, #tpu.memory_space<vmem>>, %arg8: memref<8x1x8xf32, #tpu.memory_space<vmem>>, %arg9: memref<8x32x8xf32, #tpu.memory_space<vmem>>, %arg10: memref<8x1x8xf32, #tpu.memory_space<vmem>>, %arg11: memref<8x8x32xf32, #tpu.memory_space<vmem>>, %arg12: memref<2x1x32xf32, #tpu.memory_space<vmem>>, %arg13: memref<2x1x32xf32, #tpu.memory_space<vmem>>, %arg14: memref<2x1x32xf32, #tpu.memory_space<vmem>>, %arg15: memref<2x32x128xf32, #tpu.memory_space<vmem>>, %arg16: memref<2x1x128xf32, #tpu.memory_space<vmem>>, %arg17: memref<2x128x32xf32, #tpu.memory_space<vmem>>, %arg18: memref<2x1x32xf32, #tpu.memory_space<vmem>>, %arg19: memref<2x16xf32, #tpu.memory_space<vmem>>, %arg20: memref<32x1xf32, #tpu.memory_space<vmem>>, %arg21: memref<1x1xf32, #tpu.memory_space<vmem>>, %arg22: memref<2x1xf32, #tpu.memory_space<vmem>>, %arg23: memref<2x1xf32, #tpu.memory_space<vmem>>) attributes {dimension_semantics = [], scalar_prefetch = 0 : i64, scratch_operands = 0 : i64, tpu.core_type = #tpu.core_type<tc>} {
    %c0 = arith.constant 0 : index
    %c0_0 = arith.constant 0 : index
    %0 = vector.load %arg0[%c0, %c0_0] : memref<16x16xf32, #tpu.memory_space<vmem>>, vector<16x16xf32>
    %c0_1 = arith.constant 0 : index
    %c0_2 = arith.constant 0 : index
    %1 = vector.load %arg1[%c0_1, %c0_2] : memref<16x32xf32, #tpu.memory_space<vmem>>, vector<16x32xf32>
    %cst = arith.constant dense<0.000000e+00> : vector<16x32xf32>
    %2 = tpu.matmul %0, %1, %cst {dimension_numbers = #tpu.dot_dimension_numbers<[1], [0], [0], [1], [0, 0, 1, 1], [], []>} : vector<16x16xf32>, vector<16x32xf32>, vector<16x32xf32> -> vector<16x32xf32>
    %c0_3 = arith.constant 0 : index
    %c0_4 = arith.constant 0 : index
    %3 = vector.load %arg2[%c0_3, %c0_4] : memref<16x32xf32, #tpu.memory_space<vmem>>, vector<16x32xf32>
    %4 = arith.addf %2, %3 : vector<16x32xf32>
    %c0_5 = arith.constant 0 : index
    %c0_6 = arith.constant 0 : index
    %c0_7 = arith.constant 0 : index
    %5 = vector.load %arg3[%c0_5, %c0_6, %c0_7] : memref<2x1x32xf32, #tpu.memory_space<vmem>>, vector<1x1x32xf32>
    %6 = vector.shape_cast %5 : vector<1x1x32xf32> to vector<1x32xf32>
    %c0_8 = arith.constant 0 : index
    %c0_9 = arith.constant 0 : index
    %c0_10 = arith.constant 0 : index
    %7 = vector.load %arg4[%c0_8, %c0_9, %c0_10] : memref<2x1x32xf32, #tpu.memory_space<vmem>>, vector<1x1x32xf32>
    %8 = vector.shape_cast %7 : vector<1x1x32xf32> to vector<1x32xf32>
    %cst_11 = arith.constant dense<0.000000e+00> : vector<16xf32>
    %9 = vector.multi_reduction <add>, %4, %cst_11 [1] : vector<16x32xf32> to vector<16xf32>
    %10 = vector.shape_cast %9 : vector<16xf32> to vector<16x1xf32>
    %cst_12 = arith.constant 3.200000e+01 : f32
    %11 = vector.broadcast %cst_12 : f32 to vector<16x1xf32>
    %12 = arith.divf %10, %11 : vector<16x1xf32>
    %13 = vector.broadcast %12 : vector<16x1xf32> to vector<16x32xf32>
    %14 = arith.subf %4, %13 : vector<16x32xf32>
    %15 = arith.mulf %14, %14 : vector<16x32xf32>
    %cst_13 = arith.constant dense<0.000000e+00> : vector<16xf32>
    %16 = vector.multi_reduction <add>, %15, %cst_13 [1] : vector<16x32xf32> to vector<16xf32>
    %17 = vector.shape_cast %16 : vector<16xf32> to vector<16x1xf32>
    %cst_14 = arith.constant 3.200000e+01 : f32
    %18 = vector.broadcast %cst_14 : f32 to vector<16x1xf32>
    %19 = arith.divf %17, %18 : vector<16x1xf32>
    %cst_15 = arith.constant 9.99999974E-6 : f32
    %20 = vector.broadcast %cst_15 : f32 to vector<16x1xf32>
    %21 = arith.addf %19, %20 : vector<16x1xf32>
    %22 = math.rsqrt %21 : vector<16x1xf32>
    %23 = vector.broadcast %22 : vector<16x1xf32> to vector<16x32xf32>
    %24 = arith.mulf %14, %23 : vector<16x32xf32>
    %25 = vector.broadcast %6 : vector<1x32xf32> to vector<16x32xf32>
    %26 = arith.mulf %24, %25 : vector<16x32xf32>
    %27 = vector.broadcast %8 : vector<1x32xf32> to vector<16x32xf32>
    %28 = arith.addf %26, %27 : vector<16x32xf32>
    %cst_16 = arith.constant 0.000000e+00 : f32
    %29 = vector.broadcast %cst_16 : f32 to vector<16x32xf32>
    %c0_17 = arith.constant 0 : index
    %c0_18 = arith.constant 0 : index
    %c0_19 = arith.constant 0 : index
    %30 = vector.load %arg5[%c0_17, %c0_18, %c0_19] : memref<8x32x8xf32, #tpu.memory_space<vmem>>, vector<1x32x8xf32>
    %31 = vector.shape_cast %30 : vector<1x32x8xf32> to vector<32x8xf32>
    %cst_20 = arith.constant dense<0.000000e+00> : vector<16x8xf32>
    %32 = tpu.matmul %28, %31, %cst_20 {dimension_numbers = #tpu.dot_dimension_numbers<[1], [0], [0], [1], [0, 0, 1, 1], [], []>} : vector<16x32xf32>, vector<32x8xf32>, vector<16x8xf32> -> vector<16x8xf32>
    %c0_21 = arith.constant 0 : index
    %c0_22 = arith.constant 0 : index
    %c0_23 = arith.constant 0 : index
    %33 = vector.load %arg6[%c0_21, %c0_22, %c0_23] : memref<8x1x8xf32, #tpu.memory_space<vmem>>, vector<1x1x8xf32>
    %34 = vector.shape_cast %33 : vector<1x1x8xf32> to vector<1x8xf32>
    %35 = vector.broadcast %34 : vector<1x8xf32> to vector<16x8xf32>
    %36 = arith.addf %32, %35 : vector<16x8xf32>
    %c0_24 = arith.constant 0 : index
    %c0_25 = arith.constant 0 : index
    %c0_26 = arith.constant 0 : index
    %37 = vector.load %arg7[%c0_24, %c0_25, %c0_26] : memref<8x32x8xf32, #tpu.memory_space<vmem>>, vector<1x32x8xf32>
    %38 = vector.shape_cast %37 : vector<1x32x8xf32> to vector<32x8xf32>
    %cst_27 = arith.constant dense<0.000000e+00> : vector<16x8xf32>
    %39 = tpu.matmul %28, %38, %cst_27 {dimension_numbers = #tpu.dot_dimension_numbers<[1], [0], [0], [1], [0, 0, 1, 1], [], []>} : vector<16x32xf32>, vector<32x8xf32>, vector<16x8xf32> -> vector<16x8xf32>
    %c0_28 = arith.constant 0 : index
    %c0_29 = arith.constant 0 : index
    %c0_30 = arith.constant 0 : index
    %40 = vector.load %arg8[%c0_28, %c0_29, %c0_30] : memref<8x1x8xf32, #tpu.memory_space<vmem>>, vector<1x1x8xf32>
    %41 = vector.shape_cast %40 : vector<1x1x8xf32> to vector<1x8xf32>
    %42 = vector.broadcast %41 : vector<1x8xf32> to vector<16x8xf32>
    %43 = arith.addf %39, %42 : vector<16x8xf32>
    %c0_31 = arith.constant 0 : index
    %c0_32 = arith.constant 0 : index
    %c0_33 = arith.constant 0 : index
    %44 = vector.load %arg9[%c0_31, %c0_32, %c0_33] : memref<8x32x8xf32, #tpu.memory_space<vmem>>, vector<1x32x8xf32>
    %45 = vector.shape_cast %44 : vector<1x32x8xf32> to vector<32x8xf32>
    %cst_34 = arith.constant dense<0.000000e+00> : vector<16x8xf32>
    %46 = tpu.matmul %28, %45, %cst_34 {dimension_numbers = #tpu.dot_dimension_numbers<[1], [0], [0], [1], [0, 0, 1, 1], [], []>} : vector<16x32xf32>, vector<32x8xf32>, vector<16x8xf32> -> vector<16x8xf32>
    %c0_35 = arith.constant 0 : index
    %c0_36 = arith.constant 0 : index
    %c0_37 = arith.constant 0 : index
    %47 = vector.load %arg10[%c0_35, %c0_36, %c0_37] : memref<8x1x8xf32, #tpu.memory_space<vmem>>, vector<1x1x8xf32>
    %48 = vector.shape_cast %47 : vector<1x1x8xf32> to vector<1x8xf32>
    %49 = vector.broadcast %48 : vector<1x8xf32> to vector<16x8xf32>
    %50 = arith.addf %46, %49 : vector<16x8xf32>
    %51 = vector.shape_cast %36 : vector<16x8xf32> to vector<2x8x8xf32>
    %52 = vector.shape_cast %43 : vector<16x8xf32> to vector<2x8x8xf32>
    "tpu.trace_start"() <{level = 10 : i32, message = "bqd,bkd->bqk"}> : () -> ()
    %cst_38 = arith.constant dense<0.000000e+00> : vector<2x8x8xf32>
    %53 = tpu.matmul %51, %52, %cst_38 {dimension_numbers = #tpu.dot_dimension_numbers<[2], [2], [1], [1], [0, 0, 0, 1, 1, 1], [0], [0]>} : vector<2x8x8xf32>, vector<2x8x8xf32>, vector<2x8x8xf32> -> vector<2x8x8xf32>
    "tpu.trace_stop"() : () -> ()
    %cst_39 = arith.constant dense<0xFF800000> : vector<2x8xf32>
    %54 = vector.multi_reduction <maximumf>, %53, %cst_39 [2] : vector<2x8x8xf32> to vector<2x8xf32>
    %55 = vector.shape_cast %54 : vector<2x8xf32> to vector<2x8x1xf32>
    %56 = vector.broadcast %55 : vector<2x8x1xf32> to vector<2x8x8xf32>
    %57 = arith.subf %53, %56 : vector<2x8x8xf32>
    %58 = math.exp %57 : vector<2x8x8xf32>
    %cst_40 = arith.constant dense<0.000000e+00> : vector<2x8xf32>
    %59 = vector.multi_reduction <add>, %58, %cst_40 [2] : vector<2x8x8xf32> to vector<2x8xf32>
    %60 = vector.shape_cast %59 : vector<2x8xf32> to vector<2x8x1xf32>
    %61 = tpu.reciprocal %60 {approx = true} : vector<2x8x1xf32> -> vector<2x8x1xf32>
    %62 = vector.broadcast %61 : vector<2x8x1xf32> to vector<2x8x8xf32>
    %63 = arith.mulf %58, %62 : vector<2x8x8xf32>
    %64 = vector.shape_cast %50 : vector<16x8xf32> to vector<2x8x8xf32>
    "tpu.trace_start"() <{level = 10 : i32, message = "bqk,bkd->bqd"}> : () -> ()
    %cst_41 = arith.constant dense<0.000000e+00> : vector<2x8x8xf32>
    %65 = tpu.matmul %63, %64, %cst_41 {dimension_numbers = #tpu.dot_dimension_numbers<[2], [1], [1], [2], [0, 0, 0, 1, 1, 2], [0], [0]>} : vector<2x8x8xf32>, vector<2x8x8xf32>, vector<2x8x8xf32> -> vector<2x8x8xf32>
    "tpu.trace_stop"() : () -> ()
    %66 = vector.shape_cast %65 : vector<2x8x8xf32> to vector<16x8xf32>
    %c0_42 = arith.constant 0 : index
    %c0_43 = arith.constant 0 : index
    %c0_44 = arith.constant 0 : index
    %67 = vector.load %arg11[%c0_42, %c0_43, %c0_44] : memref<8x8x32xf32, #tpu.memory_space<vmem>>, vector<1x8x32xf32>
    %68 = vector.shape_cast %67 : vector<1x8x32xf32> to vector<8x32xf32>
    %cst_45 = arith.constant dense<0.000000e+00> : vector<16x32xf32>
    %69 = tpu.matmul %66, %68, %cst_45 {dimension_numbers = #tpu.dot_dimension_numbers<[1], [0], [0], [1], [0, 0, 1, 1], [], []>} : vector<16x8xf32>, vector<8x32xf32>, vector<16x32xf32> -> vector<16x32xf32>
    %70 = arith.addf %29, %69 : vector<16x32xf32>
    %c1 = arith.constant 1 : index
    %c0_46 = arith.constant 0 : index
    %c0_47 = arith.constant 0 : index
    %71 = vector.load %arg5[%c1, %c0_46, %c0_47] : memref<8x32x8xf32, #tpu.memory_space<vmem>>, vector<1x32x8xf32>
    %72 = vector.shape_cast %71 : vector<1x32x8xf32> to vector<32x8xf32>
    %cst_48 = arith.constant dense<0.000000e+00> : vector<16x8xf32>
    %73 = tpu.matmul %28, %72, %cst_48 {dimension_numbers = #tpu.dot_dimension_numbers<[1], [0], [0], [1], [0, 0, 1, 1], [], []>} : vector<16x32xf32>, vector<32x8xf32>, vector<16x8xf32> -> vector<16x8xf32>
    %c1_49 = arith.constant 1 : index
    %c0_50 = arith.constant 0 : index
    %c0_51 = arith.constant 0 : index
    %74 = vector.load %arg6[%c1_49, %c0_50, %c0_51] : memref<8x1x8xf32, #tpu.memory_space<vmem>>, vector<1x1x8xf32>
    %75 = vector.shape_cast %74 : vector<1x1x8xf32> to vector<1x8xf32>
    %76 = vector.broadcast %75 : vector<1x8xf32> to vector<16x8xf32>
    %77 = arith.addf %73, %76 : vector<16x8xf32>
    %c1_52 = arith.constant 1 : index
    %c0_53 = arith.constant 0 : index
    %c0_54 = arith.constant 0 : index
    %78 = vector.load %arg7[%c1_52, %c0_53, %c0_54] : memref<8x32x8xf32, #tpu.memory_space<vmem>>, vector<1x32x8xf32>
    %79 = vector.shape_cast %78 : vector<1x32x8xf32> to vector<32x8xf32>
    %cst_55 = arith.constant dense<0.000000e+00> : vector<16x8xf32>
    %80 = tpu.matmul %28, %79, %cst_55 {dimension_numbers = #tpu.dot_dimension_numbers<[1], [0], [0], [1], [0, 0, 1, 1], [], []>} : vector<16x32xf32>, vector<32x8xf32>, vector<16x8xf32> -> vector<16x8xf32>
    %c1_56 = arith.constant 1 : index
    %c0_57 = arith.constant 0 : index
    %c0_58 = arith.constant 0 : index
    %81 = vector.load %arg8[%c1_56, %c0_57, %c0_58] : memref<8x1x8xf32, #tpu.memory_space<vmem>>, vector<1x1x8xf32>
    %82 = vector.shape_cast %81 : vector<1x1x8xf32> to vector<1x8xf32>
    %83 = vector.broadcast %82 : vector<1x8xf32> to vector<16x8xf32>
    %84 = arith.addf %80, %83 : vector<16x8xf32>
    %c1_59 = arith.constant 1 : index
    %c0_60 = arith.constant 0 : index
    %c0_61 = arith.constant 0 : index
    %85 = vector.load %arg9[%c1_59, %c0_60, %c0_61] : memref<8x32x8xf32, #tpu.memory_space<vmem>>, vector<1x32x8xf32>
    %86 = vector.shape_cast %85 : vector<1x32x8xf32> to vector<32x8xf32>
    %cst_62 = arith.constant dense<0.000000e+00> : vector<16x8xf32>
    %87 = tpu.matmul %28, %86, %cst_62 {dimension_numbers = #tpu.dot_dimension_numbers<[1], [0], [0], [1], [0, 0, 1, 1], [], []>} : vector<16x32xf32>, vector<32x8xf32>, vector<16x8xf32> -> vector<16x8xf32>
    %c1_63 = arith.constant 1 : index
    %c0_64 = arith.constant 0 : index
    %c0_65 = arith.constant 0 : index
    %88 = vector.load %arg10[%c1_63, %c0_64, %c0_65] : memref<8x1x8xf32, #tpu.memory_space<vmem>>, vector<1x1x8xf32>
    %89 = vector.shape_cast %88 : vector<1x1x8xf32> to vector<1x8xf32>
    %90 = vector.broadcast %89 : vector<1x8xf32> to vector<16x8xf32>
    %91 = arith.addf %87, %90 : vector<16x8xf32>
    %92 = vector.shape_cast %77 : vector<16x8xf32> to vector<2x8x8xf32>
    %93 = vector.shape_cast %84 : vector<16x8xf32> to vector<2x8x8xf32>
    "tpu.trace_start"() <{level = 10 : i32, message = "bqd,bkd->bqk"}> : () -> ()
    %cst_66 = arith.constant dense<0.000000e+00> : vector<2x8x8xf32>
    %94 = tpu.matmul %92, %93, %cst_66 {dimension_numbers = #tpu.dot_dimension_numbers<[2], [2], [1], [1], [0, 0, 0, 1, 1, 1], [0], [0]>} : vector<2x8x8xf32>, vector<2x8x8xf32>, vector<2x8x8xf32> -> vector<2x8x8xf32>
    "tpu.trace_stop"() : () -> ()
    %cst_67 = arith.constant dense<0xFF800000> : vector<2x8xf32>
    %95 = vector.multi_reduction <maximumf>, %94, %cst_67 [2] : vector<2x8x8xf32> to vector<2x8xf32>
    %96 = vector.shape_cast %95 : vector<2x8xf32> to vector<2x8x1xf32>
    %97 = vector.broadcast %96 : vector<2x8x1xf32> to vector<2x8x8xf32>
    %98 = arith.subf %94, %97 : vector<2x8x8xf32>
    %99 = math.exp %98 : vector<2x8x8xf32>
    %cst_68 = arith.constant dense<0.000000e+00> : vector<2x8xf32>
    %100 = vector.multi_reduction <add>, %99, %cst_68 [2] : vector<2x8x8xf32> to vector<2x8xf32>
    %101 = vector.shape_cast %100 : vector<2x8xf32> to vector<2x8x1xf32>
    %102 = tpu.reciprocal %101 {approx = true} : vector<2x8x1xf32> -> vector<2x8x1xf32>
    %103 = vector.broadcast %102 : vector<2x8x1xf32> to vector<2x8x8xf32>
    %104 = arith.mulf %99, %103 : vector<2x8x8xf32>
    %105 = vector.shape_cast %91 : vector<16x8xf32> to vector<2x8x8xf32>
    "tpu.trace_start"() <{level = 10 : i32, message = "bqk,bkd->bqd"}> : () -> ()
    %cst_69 = arith.constant dense<0.000000e+00> : vector<2x8x8xf32>
    %106 = tpu.matmul %104, %105, %cst_69 {dimension_numbers = #tpu.dot_dimension_numbers<[2], [1], [1], [2], [0, 0, 0, 1, 1, 2], [0], [0]>} : vector<2x8x8xf32>, vector<2x8x8xf32>, vector<2x8x8xf32> -> vector<2x8x8xf32>
    "tpu.trace_stop"() : () -> ()
    %107 = vector.shape_cast %106 : vector<2x8x8xf32> to vector<16x8xf32>
    %c1_70 = arith.constant 1 : index
    %c0_71 = arith.constant 0 : index
    %c0_72 = arith.constant 0 : index
    %108 = vector.load %arg11[%c1_70, %c0_71, %c0_72] : memref<8x8x32xf32, #tpu.memory_space<vmem>>, vector<1x8x32xf32>
    %109 = vector.shape_cast %108 : vector<1x8x32xf32> to vector<8x32xf32>
    %cst_73 = arith.constant dense<0.000000e+00> : vector<16x32xf32>
    %110 = tpu.matmul %107, %109, %cst_73 {dimension_numbers = #tpu.dot_dimension_numbers<[1], [0], [0], [1], [0, 0, 1, 1], [], []>} : vector<16x8xf32>, vector<8x32xf32>, vector<16x32xf32> -> vector<16x32xf32>
    %111 = arith.addf %70, %110 : vector<16x32xf32>
    %c2 = arith.constant 2 : index
    %c0_74 = arith.constant 0 : index
    %c0_75 = arith.constant 0 : index
    %112 = vector.load %arg5[%c2, %c0_74, %c0_75] : memref<8x32x8xf32, #tpu.memory_space<vmem>>, vector<1x32x8xf32>
    %113 = vector.shape_cast %112 : vector<1x32x8xf32> to vector<32x8xf32>
    %cst_76 = arith.constant dense<0.000000e+00> : vector<16x8xf32>
    %114 = tpu.matmul %28, %113, %cst_76 {dimension_numbers = #tpu.dot_dimension_numbers<[1], [0], [0], [1], [0, 0, 1, 1], [], []>} : vector<16x32xf32>, vector<32x8xf32>, vector<16x8xf32> -> vector<16x8xf32>
    %c2_77 = arith.constant 2 : index
    %c0_78 = arith.constant 0 : index
    %c0_79 = arith.constant 0 : index
    %115 = vector.load %arg6[%c2_77, %c0_78, %c0_79] : memref<8x1x8xf32, #tpu.memory_space<vmem>>, vector<1x1x8xf32>
    %116 = vector.shape_cast %115 : vector<1x1x8xf32> to vector<1x8xf32>
    %117 = vector.broadcast %116 : vector<1x8xf32> to vector<16x8xf32>
    %118 = arith.addf %114, %117 : vector<16x8xf32>
    %c2_80 = arith.constant 2 : index
    %c0_81 = arith.constant 0 : index
    %c0_82 = arith.constant 0 : index
    %119 = vector.load %arg7[%c2_80, %c0_81, %c0_82] : memref<8x32x8xf32, #tpu.memory_space<vmem>>, vector<1x32x8xf32>
    %120 = vector.shape_cast %119 : vector<1x32x8xf32> to vector<32x8xf32>
    %cst_83 = arith.constant dense<0.000000e+00> : vector<16x8xf32>
    %121 = tpu.matmul %28, %120, %cst_83 {dimension_numbers = #tpu.dot_dimension_numbers<[1], [0], [0], [1], [0, 0, 1, 1], [], []>} : vector<16x32xf32>, vector<32x8xf32>, vector<16x8xf32> -> vector<16x8xf32>
    %c2_84 = arith.constant 2 : index
    %c0_85 = arith.constant 0 : index
    %c0_86 = arith.constant 0 : index
    %122 = vector.load %arg8[%c2_84, %c0_85, %c0_86] : memref<8x1x8xf32, #tpu.memory_space<vmem>>, vector<1x1x8xf32>
    %123 = vector.shape_cast %122 : vector<1x1x8xf32> to vector<1x8xf32>
    %124 = vector.broadcast %123 : vector<1x8xf32> to vector<16x8xf32>
    %125 = arith.addf %121, %124 : vector<16x8xf32>
    %c2_87 = arith.constant 2 : index
    %c0_88 = arith.constant 0 : index
    %c0_89 = arith.constant 0 : index
    %126 = vector.load %arg9[%c2_87, %c0_88, %c0_89] : memref<8x32x8xf32, #tpu.memory_space<vmem>>, vector<1x32x8xf32>
    %127 = vector.shape_cast %126 : vector<1x32x8xf32> to vector<32x8xf32>
    %cst_90 = arith.constant dense<0.000000e+00> : vector<16x8xf32>
    %128 = tpu.matmul %28, %127, %cst_90 {dimension_numbers = #tpu.dot_dimension_numbers<[1], [0], [0], [1], [0, 0, 1, 1], [], []>} : vector<16x32xf32>, vector<32x8xf32>, vector<16x8xf32> -> vector<16x8xf32>
    %c2_91 = arith.constant 2 : index
    %c0_92 = arith.constant 0 : index
    %c0_93 = arith.constant 0 : index
    %129 = vector.load %arg10[%c2_91, %c0_92, %c0_93] : memref<8x1x8xf32, #tpu.memory_space<vmem>>, vector<1x1x8xf32>
    %130 = vector.shape_cast %129 : vector<1x1x8xf32> to vector<1x8xf32>
    %131 = vector.broadcast %130 : vector<1x8xf32> to vector<16x8xf32>
    %132 = arith.addf %128, %131 : vector<16x8xf32>
    %133 = vector.shape_cast %118 : vector<16x8xf32> to vector<2x8x8xf32>
    %134 = vector.shape_cast %125 : vector<16x8xf32> to vector<2x8x8xf32>
    "tpu.trace_start"() <{level = 10 : i32, message = "bqd,bkd->bqk"}> : () -> ()
    %cst_94 = arith.constant dense<0.000000e+00> : vector<2x8x8xf32>
    %135 = tpu.matmul %133, %134, %cst_94 {dimension_numbers = #tpu.dot_dimension_numbers<[2], [2], [1], [1], [0, 0, 0, 1, 1, 1], [0], [0]>} : vector<2x8x8xf32>, vector<2x8x8xf32>, vector<2x8x8xf32> -> vector<2x8x8xf32>
    "tpu.trace_stop"() : () -> ()
    %cst_95 = arith.constant dense<0xFF800000> : vector<2x8xf32>
    %136 = vector.multi_reduction <maximumf>, %135, %cst_95 [2] : vector<2x8x8xf32> to vector<2x8xf32>
    %137 = vector.shape_cast %136 : vector<2x8xf32> to vector<2x8x1xf32>
    %138 = vector.broadcast %137 : vector<2x8x1xf32> to vector<2x8x8xf32>
    %139 = arith.subf %135, %138 : vector<2x8x8xf32>
    %140 = math.exp %139 : vector<2x8x8xf32>
    %cst_96 = arith.constant dense<0.000000e+00> : vector<2x8xf32>
    %141 = vector.multi_reduction <add>, %140, %cst_96 [2] : vector<2x8x8xf32> to vector<2x8xf32>
    %142 = vector.shape_cast %141 : vector<2x8xf32> to vector<2x8x1xf32>
    %143 = tpu.reciprocal %142 {approx = true} : vector<2x8x1xf32> -> vector<2x8x1xf32>
    %144 = vector.broadcast %143 : vector<2x8x1xf32> to vector<2x8x8xf32>
    %145 = arith.mulf %140, %144 : vector<2x8x8xf32>
    %146 = vector.shape_cast %132 : vector<16x8xf32> to vector<2x8x8xf32>
    "tpu.trace_start"() <{level = 10 : i32, message = "bqk,bkd->bqd"}> : () -> ()
    %cst_97 = arith.constant dense<0.000000e+00> : vector<2x8x8xf32>
    %147 = tpu.matmul %145, %146, %cst_97 {dimension_numbers = #tpu.dot_dimension_numbers<[2], [1], [1], [2], [0, 0, 0, 1, 1, 2], [0], [0]>} : vector<2x8x8xf32>, vector<2x8x8xf32>, vector<2x8x8xf32> -> vector<2x8x8xf32>
    "tpu.trace_stop"() : () -> ()
    %148 = vector.shape_cast %147 : vector<2x8x8xf32> to vector<16x8xf32>
    %c2_98 = arith.constant 2 : index
    %c0_99 = arith.constant 0 : index
    %c0_100 = arith.constant 0 : index
    %149 = vector.load %arg11[%c2_98, %c0_99, %c0_100] : memref<8x8x32xf32, #tpu.memory_space<vmem>>, vector<1x8x32xf32>
    %150 = vector.shape_cast %149 : vector<1x8x32xf32> to vector<8x32xf32>
    %cst_101 = arith.constant dense<0.000000e+00> : vector<16x32xf32>
    %151 = tpu.matmul %148, %150, %cst_101 {dimension_numbers = #tpu.dot_dimension_numbers<[1], [0], [0], [1], [0, 0, 1, 1], [], []>} : vector<16x8xf32>, vector<8x32xf32>, vector<16x32xf32> -> vector<16x32xf32>
    %152 = arith.addf %111, %151 : vector<16x32xf32>
    %c3 = arith.constant 3 : index
    %c0_102 = arith.constant 0 : index
    %c0_103 = arith.constant 0 : index
    %153 = vector.load %arg5[%c3, %c0_102, %c0_103] : memref<8x32x8xf32, #tpu.memory_space<vmem>>, vector<1x32x8xf32>
    %154 = vector.shape_cast %153 : vector<1x32x8xf32> to vector<32x8xf32>
    %cst_104 = arith.constant dense<0.000000e+00> : vector<16x8xf32>
    %155 = tpu.matmul %28, %154, %cst_104 {dimension_numbers = #tpu.dot_dimension_numbers<[1], [0], [0], [1], [0, 0, 1, 1], [], []>} : vector<16x32xf32>, vector<32x8xf32>, vector<16x8xf32> -> vector<16x8xf32>
    %c3_105 = arith.constant 3 : index
    %c0_106 = arith.constant 0 : index
    %c0_107 = arith.constant 0 : index
    %156 = vector.load %arg6[%c3_105, %c0_106, %c0_107] : memref<8x1x8xf32, #tpu.memory_space<vmem>>, vector<1x1x8xf32>
    %157 = vector.shape_cast %156 : vector<1x1x8xf32> to vector<1x8xf32>
    %158 = vector.broadcast %157 : vector<1x8xf32> to vector<16x8xf32>
    %159 = arith.addf %155, %158 : vector<16x8xf32>
    %c3_108 = arith.constant 3 : index
    %c0_109 = arith.constant 0 : index
    %c0_110 = arith.constant 0 : index
    %160 = vector.load %arg7[%c3_108, %c0_109, %c0_110] : memref<8x32x8xf32, #tpu.memory_space<vmem>>, vector<1x32x8xf32>
    %161 = vector.shape_cast %160 : vector<1x32x8xf32> to vector<32x8xf32>
    %cst_111 = arith.constant dense<0.000000e+00> : vector<16x8xf32>
    %162 = tpu.matmul %28, %161, %cst_111 {dimension_numbers = #tpu.dot_dimension_numbers<[1], [0], [0], [1], [0, 0, 1, 1], [], []>} : vector<16x32xf32>, vector<32x8xf32>, vector<16x8xf32> -> vector<16x8xf32>
    %c3_112 = arith.constant 3 : index
    %c0_113 = arith.constant 0 : index
    %c0_114 = arith.constant 0 : index
    %163 = vector.load %arg8[%c3_112, %c0_113, %c0_114] : memref<8x1x8xf32, #tpu.memory_space<vmem>>, vector<1x1x8xf32>
    %164 = vector.shape_cast %163 : vector<1x1x8xf32> to vector<1x8xf32>
    %165 = vector.broadcast %164 : vector<1x8xf32> to vector<16x8xf32>
    %166 = arith.addf %162, %165 : vector<16x8xf32>
    %c3_115 = arith.constant 3 : index
    %c0_116 = arith.constant 0 : index
    %c0_117 = arith.constant 0 : index
    %167 = vector.load %arg9[%c3_115, %c0_116, %c0_117] : memref<8x32x8xf32, #tpu.memory_space<vmem>>, vector<1x32x8xf32>
    %168 = vector.shape_cast %167 : vector<1x32x8xf32> to vector<32x8xf32>
    %cst_118 = arith.constant dense<0.000000e+00> : vector<16x8xf32>
    %169 = tpu.matmul %28, %168, %cst_118 {dimension_numbers = #tpu.dot_dimension_numbers<[1], [0], [0], [1], [0, 0, 1, 1], [], []>} : vector<16x32xf32>, vector<32x8xf32>, vector<16x8xf32> -> vector<16x8xf32>
    %c3_119 = arith.constant 3 : index
    %c0_120 = arith.constant 0 : index
    %c0_121 = arith.constant 0 : index
    %170 = vector.load %arg10[%c3_119, %c0_120, %c0_121] : memref<8x1x8xf32, #tpu.memory_space<vmem>>, vector<1x1x8xf32>
    %171 = vector.shape_cast %170 : vector<1x1x8xf32> to vector<1x8xf32>
    %172 = vector.broadcast %171 : vector<1x8xf32> to vector<16x8xf32>
    %173 = arith.addf %169, %172 : vector<16x8xf32>
    %174 = vector.shape_cast %159 : vector<16x8xf32> to vector<2x8x8xf32>
    %175 = vector.shape_cast %166 : vector<16x8xf32> to vector<2x8x8xf32>
    "tpu.trace_start"() <{level = 10 : i32, message = "bqd,bkd->bqk"}> : () -> ()
    %cst_122 = arith.constant dense<0.000000e+00> : vector<2x8x8xf32>
    %176 = tpu.matmul %174, %175, %cst_122 {dimension_numbers = #tpu.dot_dimension_numbers<[2], [2], [1], [1], [0, 0, 0, 1, 1, 1], [0], [0]>} : vector<2x8x8xf32>, vector<2x8x8xf32>, vector<2x8x8xf32> -> vector<2x8x8xf32>
    "tpu.trace_stop"() : () -> ()
    %cst_123 = arith.constant dense<0xFF800000> : vector<2x8xf32>
    %177 = vector.multi_reduction <maximumf>, %176, %cst_123 [2] : vector<2x8x8xf32> to vector<2x8xf32>
    %178 = vector.shape_cast %177 : vector<2x8xf32> to vector<2x8x1xf32>
    %179 = vector.broadcast %178 : vector<2x8x1xf32> to vector<2x8x8xf32>
    %180 = arith.subf %176, %179 : vector<2x8x8xf32>
    %181 = math.exp %180 : vector<2x8x8xf32>
    %cst_124 = arith.constant dense<0.000000e+00> : vector<2x8xf32>
    %182 = vector.multi_reduction <add>, %181, %cst_124 [2] : vector<2x8x8xf32> to vector<2x8xf32>
    %183 = vector.shape_cast %182 : vector<2x8xf32> to vector<2x8x1xf32>
    %184 = tpu.reciprocal %183 {approx = true} : vector<2x8x1xf32> -> vector<2x8x1xf32>
    %185 = vector.broadcast %184 : vector<2x8x1xf32> to vector<2x8x8xf32>
    %186 = arith.mulf %181, %185 : vector<2x8x8xf32>
    %187 = vector.shape_cast %173 : vector<16x8xf32> to vector<2x8x8xf32>
    "tpu.trace_start"() <{level = 10 : i32, message = "bqk,bkd->bqd"}> : () -> ()
    %cst_125 = arith.constant dense<0.000000e+00> : vector<2x8x8xf32>
    %188 = tpu.matmul %186, %187, %cst_125 {dimension_numbers = #tpu.dot_dimension_numbers<[2], [1], [1], [2], [0, 0, 0, 1, 1, 2], [0], [0]>} : vector<2x8x8xf32>, vector<2x8x8xf32>, vector<2x8x8xf32> -> vector<2x8x8xf32>
    "tpu.trace_stop"() : () -> ()
    %189 = vector.shape_cast %188 : vector<2x8x8xf32> to vector<16x8xf32>
    %c3_126 = arith.constant 3 : index
    %c0_127 = arith.constant 0 : index
    %c0_128 = arith.constant 0 : index
    %190 = vector.load %arg11[%c3_126, %c0_127, %c0_128] : memref<8x8x32xf32, #tpu.memory_space<vmem>>, vector<1x8x32xf32>
    %191 = vector.shape_cast %190 : vector<1x8x32xf32> to vector<8x32xf32>
    %cst_129 = arith.constant dense<0.000000e+00> : vector<16x32xf32>
    %192 = tpu.matmul %189, %191, %cst_129 {dimension_numbers = #tpu.dot_dimension_numbers<[1], [0], [0], [1], [0, 0, 1, 1], [], []>} : vector<16x8xf32>, vector<8x32xf32>, vector<16x32xf32> -> vector<16x32xf32>
    %193 = arith.addf %152, %192 : vector<16x32xf32>
    %194 = arith.addf %4, %193 : vector<16x32xf32>
    %c0_130 = arith.constant 0 : index
    %c0_131 = arith.constant 0 : index
    %c0_132 = arith.constant 0 : index
    %195 = vector.load %arg12[%c0_130, %c0_131, %c0_132] : memref<2x1x32xf32, #tpu.memory_space<vmem>>, vector<1x1x32xf32>
    %196 = vector.shape_cast %195 : vector<1x1x32xf32> to vector<1x32xf32>
    %197 = vector.broadcast %196 : vector<1x32xf32> to vector<16x32xf32>
    %198 = arith.addf %194, %197 : vector<16x32xf32>
    %c0_133 = arith.constant 0 : index
    %c0_134 = arith.constant 0 : index
    %c0_135 = arith.constant 0 : index
    %199 = vector.load %arg13[%c0_133, %c0_134, %c0_135] : memref<2x1x32xf32, #tpu.memory_space<vmem>>, vector<1x1x32xf32>
    %200 = vector.shape_cast %199 : vector<1x1x32xf32> to vector<1x32xf32>
    %c0_136 = arith.constant 0 : index
    %c0_137 = arith.constant 0 : index
    %c0_138 = arith.constant 0 : index
    %201 = vector.load %arg14[%c0_136, %c0_137, %c0_138] : memref<2x1x32xf32, #tpu.memory_space<vmem>>, vector<1x1x32xf32>
    %202 = vector.shape_cast %201 : vector<1x1x32xf32> to vector<1x32xf32>
    %cst_139 = arith.constant dense<0.000000e+00> : vector<16xf32>
    %203 = vector.multi_reduction <add>, %198, %cst_139 [1] : vector<16x32xf32> to vector<16xf32>
    %204 = vector.shape_cast %203 : vector<16xf32> to vector<16x1xf32>
    %cst_140 = arith.constant 3.200000e+01 : f32
    %205 = vector.broadcast %cst_140 : f32 to vector<16x1xf32>
    %206 = arith.divf %204, %205 : vector<16x1xf32>
    %207 = vector.broadcast %206 : vector<16x1xf32> to vector<16x32xf32>
    %208 = arith.subf %198, %207 : vector<16x32xf32>
    %209 = arith.mulf %208, %208 : vector<16x32xf32>
    %cst_141 = arith.constant dense<0.000000e+00> : vector<16xf32>
    %210 = vector.multi_reduction <add>, %209, %cst_141 [1] : vector<16x32xf32> to vector<16xf32>
    %211 = vector.shape_cast %210 : vector<16xf32> to vector<16x1xf32>
    %cst_142 = arith.constant 3.200000e+01 : f32
    %212 = vector.broadcast %cst_142 : f32 to vector<16x1xf32>
    %213 = arith.divf %211, %212 : vector<16x1xf32>
    %cst_143 = arith.constant 9.99999974E-6 : f32
    %214 = vector.broadcast %cst_143 : f32 to vector<16x1xf32>
    %215 = arith.addf %213, %214 : vector<16x1xf32>
    %216 = math.rsqrt %215 : vector<16x1xf32>
    %217 = vector.broadcast %216 : vector<16x1xf32> to vector<16x32xf32>
    %218 = arith.mulf %208, %217 : vector<16x32xf32>
    %219 = vector.broadcast %200 : vector<1x32xf32> to vector<16x32xf32>
    %220 = arith.mulf %218, %219 : vector<16x32xf32>
    %221 = vector.broadcast %202 : vector<1x32xf32> to vector<16x32xf32>
    %222 = arith.addf %220, %221 : vector<16x32xf32>
    %c0_144 = arith.constant 0 : index
    %c0_145 = arith.constant 0 : index
    %c0_146 = arith.constant 0 : index
    %223 = vector.load %arg15[%c0_144, %c0_145, %c0_146] : memref<2x32x128xf32, #tpu.memory_space<vmem>>, vector<1x32x128xf32>
    %224 = vector.shape_cast %223 : vector<1x32x128xf32> to vector<32x128xf32>
    %cst_147 = arith.constant dense<0.000000e+00> : vector<16x128xf32>
    %225 = tpu.matmul %222, %224, %cst_147 {dimension_numbers = #tpu.dot_dimension_numbers<[1], [0], [0], [1], [0, 0, 1, 1], [], []>} : vector<16x32xf32>, vector<32x128xf32>, vector<16x128xf32> -> vector<16x128xf32>
    %c0_148 = arith.constant 0 : index
    %c0_149 = arith.constant 0 : index
    %c0_150 = arith.constant 0 : index
    %226 = vector.load %arg16[%c0_148, %c0_149, %c0_150] : memref<2x1x128xf32, #tpu.memory_space<vmem>>, vector<1x1x128xf32>
    %227 = vector.shape_cast %226 : vector<1x1x128xf32> to vector<1x128xf32>
    %228 = vector.broadcast %227 : vector<1x128xf32> to vector<16x128xf32>
    %229 = arith.addf %225, %228 : vector<16x128xf32>
    %cst_151 = arith.constant 5.000000e-01 : f32
    %230 = vector.broadcast %cst_151 : f32 to vector<16x128xf32>
    %231 = arith.mulf %230, %229 : vector<16x128xf32>
    %cst_152 = arith.constant 4.471500e-02 : f32
    %232 = vector.broadcast %cst_152 : f32 to vector<16x128xf32>
    %233 = arith.mulf %232, %229 : vector<16x128xf32>
    %234 = arith.mulf %233, %229 : vector<16x128xf32>
    %235 = arith.mulf %234, %229 : vector<16x128xf32>
    %236 = arith.addf %229, %235 : vector<16x128xf32>
    %cst_153 = arith.constant 0.797884583 : f32
    %237 = vector.broadcast %cst_153 : f32 to vector<16x128xf32>
    %238 = arith.mulf %237, %236 : vector<16x128xf32>
    %239 = math.tanh %238 : vector<16x128xf32>
    %cst_154 = arith.constant 1.000000e+00 : f32
    %240 = vector.broadcast %cst_154 : f32 to vector<16x128xf32>
    %241 = arith.addf %240, %239 : vector<16x128xf32>
    %242 = arith.mulf %231, %241 : vector<16x128xf32>
    %c0_155 = arith.constant 0 : index
    %c0_156 = arith.constant 0 : index
    %c0_157 = arith.constant 0 : index
    %243 = vector.load %arg17[%c0_155, %c0_156, %c0_157] : memref<2x128x32xf32, #tpu.memory_space<vmem>>, vector<1x128x32xf32>
    %244 = vector.shape_cast %243 : vector<1x128x32xf32> to vector<128x32xf32>
    %cst_158 = arith.constant dense<0.000000e+00> : vector<16x32xf32>
    %245 = tpu.matmul %242, %244, %cst_158 {dimension_numbers = #tpu.dot_dimension_numbers<[1], [0], [0], [1], [0, 0, 1, 1], [], []>} : vector<16x128xf32>, vector<128x32xf32>, vector<16x32xf32> -> vector<16x32xf32>
    %246 = arith.addf %198, %245 : vector<16x32xf32>
    %c0_159 = arith.constant 0 : index
    %c0_160 = arith.constant 0 : index
    %c0_161 = arith.constant 0 : index
    %247 = vector.load %arg18[%c0_159, %c0_160, %c0_161] : memref<2x1x32xf32, #tpu.memory_space<vmem>>, vector<1x1x32xf32>
    %248 = vector.shape_cast %247 : vector<1x1x32xf32> to vector<1x32xf32>
    %249 = vector.broadcast %248 : vector<1x32xf32> to vector<16x32xf32>
    %250 = arith.addf %246, %249 : vector<16x32xf32>
    %c1_162 = arith.constant 1 : index
    %c0_163 = arith.constant 0 : index
    %c0_164 = arith.constant 0 : index
    %251 = vector.load %arg3[%c1_162, %c0_163, %c0_164] : memref<2x1x32xf32, #tpu.memory_space<vmem>>, vector<1x1x32xf32>
    %252 = vector.shape_cast %251 : vector<1x1x32xf32> to vector<1x32xf32>
    %c1_165 = arith.constant 1 : index
    %c0_166 = arith.constant 0 : index
    %c0_167 = arith.constant 0 : index
    %253 = vector.load %arg4[%c1_165, %c0_166, %c0_167] : memref<2x1x32xf32, #tpu.memory_space<vmem>>, vector<1x1x32xf32>
    %254 = vector.shape_cast %253 : vector<1x1x32xf32> to vector<1x32xf32>
    %cst_168 = arith.constant dense<0.000000e+00> : vector<16xf32>
    %255 = vector.multi_reduction <add>, %250, %cst_168 [1] : vector<16x32xf32> to vector<16xf32>
    %256 = vector.shape_cast %255 : vector<16xf32> to vector<16x1xf32>
    %cst_169 = arith.constant 3.200000e+01 : f32
    %257 = vector.broadcast %cst_169 : f32 to vector<16x1xf32>
    %258 = arith.divf %256, %257 : vector<16x1xf32>
    %259 = vector.broadcast %258 : vector<16x1xf32> to vector<16x32xf32>
    %260 = arith.subf %250, %259 : vector<16x32xf32>
    %261 = arith.mulf %260, %260 : vector<16x32xf32>
    %cst_170 = arith.constant dense<0.000000e+00> : vector<16xf32>
    %262 = vector.multi_reduction <add>, %261, %cst_170 [1] : vector<16x32xf32> to vector<16xf32>
    %263 = vector.shape_cast %262 : vector<16xf32> to vector<16x1xf32>
    %cst_171 = arith.constant 3.200000e+01 : f32
    %264 = vector.broadcast %cst_171 : f32 to vector<16x1xf32>
    %265 = arith.divf %263, %264 : vector<16x1xf32>
    %cst_172 = arith.constant 9.99999974E-6 : f32
    %266 = vector.broadcast %cst_172 : f32 to vector<16x1xf32>
    %267 = arith.addf %265, %266 : vector<16x1xf32>
    %268 = math.rsqrt %267 : vector<16x1xf32>
    %269 = vector.broadcast %268 : vector<16x1xf32> to vector<16x32xf32>
    %270 = arith.mulf %260, %269 : vector<16x32xf32>
    %271 = vector.broadcast %252 : vector<1x32xf32> to vector<16x32xf32>
    %272 = arith.mulf %270, %271 : vector<16x32xf32>
    %273 = vector.broadcast %254 : vector<1x32xf32> to vector<16x32xf32>
    %274 = arith.addf %272, %273 : vector<16x32xf32>
    %cst_173 = arith.constant 0.000000e+00 : f32
    %275 = vector.broadcast %cst_173 : f32 to vector<16x32xf32>
    %c4 = arith.constant 4 : index
    %c0_174 = arith.constant 0 : index
    %c0_175 = arith.constant 0 : index
    %276 = vector.load %arg5[%c4, %c0_174, %c0_175] : memref<8x32x8xf32, #tpu.memory_space<vmem>>, vector<1x32x8xf32>
    %277 = vector.shape_cast %276 : vector<1x32x8xf32> to vector<32x8xf32>
    %cst_176 = arith.constant dense<0.000000e+00> : vector<16x8xf32>
    %278 = tpu.matmul %274, %277, %cst_176 {dimension_numbers = #tpu.dot_dimension_numbers<[1], [0], [0], [1], [0, 0, 1, 1], [], []>} : vector<16x32xf32>, vector<32x8xf32>, vector<16x8xf32> -> vector<16x8xf32>
    %c4_177 = arith.constant 4 : index
    %c0_178 = arith.constant 0 : index
    %c0_179 = arith.constant 0 : index
    %279 = vector.load %arg6[%c4_177, %c0_178, %c0_179] : memref<8x1x8xf32, #tpu.memory_space<vmem>>, vector<1x1x8xf32>
    %280 = vector.shape_cast %279 : vector<1x1x8xf32> to vector<1x8xf32>
    %281 = vector.broadcast %280 : vector<1x8xf32> to vector<16x8xf32>
    %282 = arith.addf %278, %281 : vector<16x8xf32>
    %c4_180 = arith.constant 4 : index
    %c0_181 = arith.constant 0 : index
    %c0_182 = arith.constant 0 : index
    %283 = vector.load %arg7[%c4_180, %c0_181, %c0_182] : memref<8x32x8xf32, #tpu.memory_space<vmem>>, vector<1x32x8xf32>
    %284 = vector.shape_cast %283 : vector<1x32x8xf32> to vector<32x8xf32>
    %cst_183 = arith.constant dense<0.000000e+00> : vector<16x8xf32>
    %285 = tpu.matmul %274, %284, %cst_183 {dimension_numbers = #tpu.dot_dimension_numbers<[1], [0], [0], [1], [0, 0, 1, 1], [], []>} : vector<16x32xf32>, vector<32x8xf32>, vector<16x8xf32> -> vector<16x8xf32>
    %c4_184 = arith.constant 4 : index
    %c0_185 = arith.constant 0 : index
    %c0_186 = arith.constant 0 : index
    %286 = vector.load %arg8[%c4_184, %c0_185, %c0_186] : memref<8x1x8xf32, #tpu.memory_space<vmem>>, vector<1x1x8xf32>
    %287 = vector.shape_cast %286 : vector<1x1x8xf32> to vector<1x8xf32>
    %288 = vector.broadcast %287 : vector<1x8xf32> to vector<16x8xf32>
    %289 = arith.addf %285, %288 : vector<16x8xf32>
    %c4_187 = arith.constant 4 : index
    %c0_188 = arith.constant 0 : index
    %c0_189 = arith.constant 0 : index
    %290 = vector.load %arg9[%c4_187, %c0_188, %c0_189] : memref<8x32x8xf32, #tpu.memory_space<vmem>>, vector<1x32x8xf32>
    %291 = vector.shape_cast %290 : vector<1x32x8xf32> to vector<32x8xf32>
    %cst_190 = arith.constant dense<0.000000e+00> : vector<16x8xf32>
    %292 = tpu.matmul %274, %291, %cst_190 {dimension_numbers = #tpu.dot_dimension_numbers<[1], [0], [0], [1], [0, 0, 1, 1], [], []>} : vector<16x32xf32>, vector<32x8xf32>, vector<16x8xf32> -> vector<16x8xf32>
    %c4_191 = arith.constant 4 : index
    %c0_192 = arith.constant 0 : index
    %c0_193 = arith.constant 0 : index
    %293 = vector.load %arg10[%c4_191, %c0_192, %c0_193] : memref<8x1x8xf32, #tpu.memory_space<vmem>>, vector<1x1x8xf32>
    %294 = vector.shape_cast %293 : vector<1x1x8xf32> to vector<1x8xf32>
    %295 = vector.broadcast %294 : vector<1x8xf32> to vector<16x8xf32>
    %296 = arith.addf %292, %295 : vector<16x8xf32>
    %297 = vector.shape_cast %282 : vector<16x8xf32> to vector<2x8x8xf32>
    %298 = vector.shape_cast %289 : vector<16x8xf32> to vector<2x8x8xf32>
    "tpu.trace_start"() <{level = 10 : i32, message = "bqd,bkd->bqk"}> : () -> ()
    %cst_194 = arith.constant dense<0.000000e+00> : vector<2x8x8xf32>
    %299 = tpu.matmul %297, %298, %cst_194 {dimension_numbers = #tpu.dot_dimension_numbers<[2], [2], [1], [1], [0, 0, 0, 1, 1, 1], [0], [0]>} : vector<2x8x8xf32>, vector<2x8x8xf32>, vector<2x8x8xf32> -> vector<2x8x8xf32>
    "tpu.trace_stop"() : () -> ()
    %cst_195 = arith.constant dense<0xFF800000> : vector<2x8xf32>
    %300 = vector.multi_reduction <maximumf>, %299, %cst_195 [2] : vector<2x8x8xf32> to vector<2x8xf32>
    %301 = vector.shape_cast %300 : vector<2x8xf32> to vector<2x8x1xf32>
    %302 = vector.broadcast %301 : vector<2x8x1xf32> to vector<2x8x8xf32>
    %303 = arith.subf %299, %302 : vector<2x8x8xf32>
    %304 = math.exp %303 : vector<2x8x8xf32>
    %cst_196 = arith.constant dense<0.000000e+00> : vector<2x8xf32>
    %305 = vector.multi_reduction <add>, %304, %cst_196 [2] : vector<2x8x8xf32> to vector<2x8xf32>
    %306 = vector.shape_cast %305 : vector<2x8xf32> to vector<2x8x1xf32>
    %307 = tpu.reciprocal %306 {approx = true} : vector<2x8x1xf32> -> vector<2x8x1xf32>
    %308 = vector.broadcast %307 : vector<2x8x1xf32> to vector<2x8x8xf32>
    %309 = arith.mulf %304, %308 : vector<2x8x8xf32>
    %310 = vector.shape_cast %296 : vector<16x8xf32> to vector<2x8x8xf32>
    "tpu.trace_start"() <{level = 10 : i32, message = "bqk,bkd->bqd"}> : () -> ()
    %cst_197 = arith.constant dense<0.000000e+00> : vector<2x8x8xf32>
    %311 = tpu.matmul %309, %310, %cst_197 {dimension_numbers = #tpu.dot_dimension_numbers<[2], [1], [1], [2], [0, 0, 0, 1, 1, 2], [0], [0]>} : vector<2x8x8xf32>, vector<2x8x8xf32>, vector<2x8x8xf32> -> vector<2x8x8xf32>
    "tpu.trace_stop"() : () -> ()
    %312 = vector.shape_cast %311 : vector<2x8x8xf32> to vector<16x8xf32>
    %c4_198 = arith.constant 4 : index
    %c0_199 = arith.constant 0 : index
    %c0_200 = arith.constant 0 : index
    %313 = vector.load %arg11[%c4_198, %c0_199, %c0_200] : memref<8x8x32xf32, #tpu.memory_space<vmem>>, vector<1x8x32xf32>
    %314 = vector.shape_cast %313 : vector<1x8x32xf32> to vector<8x32xf32>
    %cst_201 = arith.constant dense<0.000000e+00> : vector<16x32xf32>
    %315 = tpu.matmul %312, %314, %cst_201 {dimension_numbers = #tpu.dot_dimension_numbers<[1], [0], [0], [1], [0, 0, 1, 1], [], []>} : vector<16x8xf32>, vector<8x32xf32>, vector<16x32xf32> -> vector<16x32xf32>
    %316 = arith.addf %275, %315 : vector<16x32xf32>
    %c5 = arith.constant 5 : index
    %c0_202 = arith.constant 0 : index
    %c0_203 = arith.constant 0 : index
    %317 = vector.load %arg5[%c5, %c0_202, %c0_203] : memref<8x32x8xf32, #tpu.memory_space<vmem>>, vector<1x32x8xf32>
    %318 = vector.shape_cast %317 : vector<1x32x8xf32> to vector<32x8xf32>
    %cst_204 = arith.constant dense<0.000000e+00> : vector<16x8xf32>
    %319 = tpu.matmul %274, %318, %cst_204 {dimension_numbers = #tpu.dot_dimension_numbers<[1], [0], [0], [1], [0, 0, 1, 1], [], []>} : vector<16x32xf32>, vector<32x8xf32>, vector<16x8xf32> -> vector<16x8xf32>
    %c5_205 = arith.constant 5 : index
    %c0_206 = arith.constant 0 : index
    %c0_207 = arith.constant 0 : index
    %320 = vector.load %arg6[%c5_205, %c0_206, %c0_207] : memref<8x1x8xf32, #tpu.memory_space<vmem>>, vector<1x1x8xf32>
    %321 = vector.shape_cast %320 : vector<1x1x8xf32> to vector<1x8xf32>
    %322 = vector.broadcast %321 : vector<1x8xf32> to vector<16x8xf32>
    %323 = arith.addf %319, %322 : vector<16x8xf32>
    %c5_208 = arith.constant 5 : index
    %c0_209 = arith.constant 0 : index
    %c0_210 = arith.constant 0 : index
    %324 = vector.load %arg7[%c5_208, %c0_209, %c0_210] : memref<8x32x8xf32, #tpu.memory_space<vmem>>, vector<1x32x8xf32>
    %325 = vector.shape_cast %324 : vector<1x32x8xf32> to vector<32x8xf32>
    %cst_211 = arith.constant dense<0.000000e+00> : vector<16x8xf32>
    %326 = tpu.matmul %274, %325, %cst_211 {dimension_numbers = #tpu.dot_dimension_numbers<[1], [0], [0], [1], [0, 0, 1, 1], [], []>} : vector<16x32xf32>, vector<32x8xf32>, vector<16x8xf32> -> vector<16x8xf32>
    %c5_212 = arith.constant 5 : index
    %c0_213 = arith.constant 0 : index
    %c0_214 = arith.constant 0 : index
    %327 = vector.load %arg8[%c5_212, %c0_213, %c0_214] : memref<8x1x8xf32, #tpu.memory_space<vmem>>, vector<1x1x8xf32>
    %328 = vector.shape_cast %327 : vector<1x1x8xf32> to vector<1x8xf32>
    %329 = vector.broadcast %328 : vector<1x8xf32> to vector<16x8xf32>
    %330 = arith.addf %326, %329 : vector<16x8xf32>
    %c5_215 = arith.constant 5 : index
    %c0_216 = arith.constant 0 : index
    %c0_217 = arith.constant 0 : index
    %331 = vector.load %arg9[%c5_215, %c0_216, %c0_217] : memref<8x32x8xf32, #tpu.memory_space<vmem>>, vector<1x32x8xf32>
    %332 = vector.shape_cast %331 : vector<1x32x8xf32> to vector<32x8xf32>
    %cst_218 = arith.constant dense<0.000000e+00> : vector<16x8xf32>
    %333 = tpu.matmul %274, %332, %cst_218 {dimension_numbers = #tpu.dot_dimension_numbers<[1], [0], [0], [1], [0, 0, 1, 1], [], []>} : vector<16x32xf32>, vector<32x8xf32>, vector<16x8xf32> -> vector<16x8xf32>
    %c5_219 = arith.constant 5 : index
    %c0_220 = arith.constant 0 : index
    %c0_221 = arith.constant 0 : index
    %334 = vector.load %arg10[%c5_219, %c0_220, %c0_221] : memref<8x1x8xf32, #tpu.memory_space<vmem>>, vector<1x1x8xf32>
    %335 = vector.shape_cast %334 : vector<1x1x8xf32> to vector<1x8xf32>
    %336 = vector.broadcast %335 : vector<1x8xf32> to vector<16x8xf32>
    %337 = arith.addf %333, %336 : vector<16x8xf32>
    %338 = vector.shape_cast %323 : vector<16x8xf32> to vector<2x8x8xf32>
    %339 = vector.shape_cast %330 : vector<16x8xf32> to vector<2x8x8xf32>
    "tpu.trace_start"() <{level = 10 : i32, message = "bqd,bkd->bqk"}> : () -> ()
    %cst_222 = arith.constant dense<0.000000e+00> : vector<2x8x8xf32>
    %340 = tpu.matmul %338, %339, %cst_222 {dimension_numbers = #tpu.dot_dimension_numbers<[2], [2], [1], [1], [0, 0, 0, 1, 1, 1], [0], [0]>} : vector<2x8x8xf32>, vector<2x8x8xf32>, vector<2x8x8xf32> -> vector<2x8x8xf32>
    "tpu.trace_stop"() : () -> ()
    %cst_223 = arith.constant dense<0xFF800000> : vector<2x8xf32>
    %341 = vector.multi_reduction <maximumf>, %340, %cst_223 [2] : vector<2x8x8xf32> to vector<2x8xf32>
    %342 = vector.shape_cast %341 : vector<2x8xf32> to vector<2x8x1xf32>
    %343 = vector.broadcast %342 : vector<2x8x1xf32> to vector<2x8x8xf32>
    %344 = arith.subf %340, %343 : vector<2x8x8xf32>
    %345 = math.exp %344 : vector<2x8x8xf32>
    %cst_224 = arith.constant dense<0.000000e+00> : vector<2x8xf32>
    %346 = vector.multi_reduction <add>, %345, %cst_224 [2] : vector<2x8x8xf32> to vector<2x8xf32>
    %347 = vector.shape_cast %346 : vector<2x8xf32> to vector<2x8x1xf32>
    %348 = tpu.reciprocal %347 {approx = true} : vector<2x8x1xf32> -> vector<2x8x1xf32>
    %349 = vector.broadcast %348 : vector<2x8x1xf32> to vector<2x8x8xf32>
    %350 = arith.mulf %345, %349 : vector<2x8x8xf32>
    %351 = vector.shape_cast %337 : vector<16x8xf32> to vector<2x8x8xf32>
    "tpu.trace_start"() <{level = 10 : i32, message = "bqk,bkd->bqd"}> : () -> ()
    %cst_225 = arith.constant dense<0.000000e+00> : vector<2x8x8xf32>
    %352 = tpu.matmul %350, %351, %cst_225 {dimension_numbers = #tpu.dot_dimension_numbers<[2], [1], [1], [2], [0, 0, 0, 1, 1, 2], [0], [0]>} : vector<2x8x8xf32>, vector<2x8x8xf32>, vector<2x8x8xf32> -> vector<2x8x8xf32>
    "tpu.trace_stop"() : () -> ()
    %353 = vector.shape_cast %352 : vector<2x8x8xf32> to vector<16x8xf32>
    %c5_226 = arith.constant 5 : index
    %c0_227 = arith.constant 0 : index
    %c0_228 = arith.constant 0 : index
    %354 = vector.load %arg11[%c5_226, %c0_227, %c0_228] : memref<8x8x32xf32, #tpu.memory_space<vmem>>, vector<1x8x32xf32>
    %355 = vector.shape_cast %354 : vector<1x8x32xf32> to vector<8x32xf32>
    %cst_229 = arith.constant dense<0.000000e+00> : vector<16x32xf32>
    %356 = tpu.matmul %353, %355, %cst_229 {dimension_numbers = #tpu.dot_dimension_numbers<[1], [0], [0], [1], [0, 0, 1, 1], [], []>} : vector<16x8xf32>, vector<8x32xf32>, vector<16x32xf32> -> vector<16x32xf32>
    %357 = arith.addf %316, %356 : vector<16x32xf32>
    %c6 = arith.constant 6 : index
    %c0_230 = arith.constant 0 : index
    %c0_231 = arith.constant 0 : index
    %358 = vector.load %arg5[%c6, %c0_230, %c0_231] : memref<8x32x8xf32, #tpu.memory_space<vmem>>, vector<1x32x8xf32>
    %359 = vector.shape_cast %358 : vector<1x32x8xf32> to vector<32x8xf32>
    %cst_232 = arith.constant dense<0.000000e+00> : vector<16x8xf32>
    %360 = tpu.matmul %274, %359, %cst_232 {dimension_numbers = #tpu.dot_dimension_numbers<[1], [0], [0], [1], [0, 0, 1, 1], [], []>} : vector<16x32xf32>, vector<32x8xf32>, vector<16x8xf32> -> vector<16x8xf32>
    %c6_233 = arith.constant 6 : index
    %c0_234 = arith.constant 0 : index
    %c0_235 = arith.constant 0 : index
    %361 = vector.load %arg6[%c6_233, %c0_234, %c0_235] : memref<8x1x8xf32, #tpu.memory_space<vmem>>, vector<1x1x8xf32>
    %362 = vector.shape_cast %361 : vector<1x1x8xf32> to vector<1x8xf32>
    %363 = vector.broadcast %362 : vector<1x8xf32> to vector<16x8xf32>
    %364 = arith.addf %360, %363 : vector<16x8xf32>
    %c6_236 = arith.constant 6 : index
    %c0_237 = arith.constant 0 : index
    %c0_238 = arith.constant 0 : index
    %365 = vector.load %arg7[%c6_236, %c0_237, %c0_238] : memref<8x32x8xf32, #tpu.memory_space<vmem>>, vector<1x32x8xf32>
    %366 = vector.shape_cast %365 : vector<1x32x8xf32> to vector<32x8xf32>
    %cst_239 = arith.constant dense<0.000000e+00> : vector<16x8xf32>
    %367 = tpu.matmul %274, %366, %cst_239 {dimension_numbers = #tpu.dot_dimension_numbers<[1], [0], [0], [1], [0, 0, 1, 1], [], []>} : vector<16x32xf32>, vector<32x8xf32>, vector<16x8xf32> -> vector<16x8xf32>
    %c6_240 = arith.constant 6 : index
    %c0_241 = arith.constant 0 : index
    %c0_242 = arith.constant 0 : index
    %368 = vector.load %arg8[%c6_240, %c0_241, %c0_242] : memref<8x1x8xf32, #tpu.memory_space<vmem>>, vector<1x1x8xf32>
    %369 = vector.shape_cast %368 : vector<1x1x8xf32> to vector<1x8xf32>
    %370 = vector.broadcast %369 : vector<1x8xf32> to vector<16x8xf32>
    %371 = arith.addf %367, %370 : vector<16x8xf32>
    %c6_243 = arith.constant 6 : index
    %c0_244 = arith.constant 0 : index
    %c0_245 = arith.constant 0 : index
    %372 = vector.load %arg9[%c6_243, %c0_244, %c0_245] : memref<8x32x8xf32, #tpu.memory_space<vmem>>, vector<1x32x8xf32>
    %373 = vector.shape_cast %372 : vector<1x32x8xf32> to vector<32x8xf32>
    %cst_246 = arith.constant dense<0.000000e+00> : vector<16x8xf32>
    %374 = tpu.matmul %274, %373, %cst_246 {dimension_numbers = #tpu.dot_dimension_numbers<[1], [0], [0], [1], [0, 0, 1, 1], [], []>} : vector<16x32xf32>, vector<32x8xf32>, vector<16x8xf32> -> vector<16x8xf32>
    %c6_247 = arith.constant 6 : index
    %c0_248 = arith.constant 0 : index
    %c0_249 = arith.constant 0 : index
    %375 = vector.load %arg10[%c6_247, %c0_248, %c0_249] : memref<8x1x8xf32, #tpu.memory_space<vmem>>, vector<1x1x8xf32>
    %376 = vector.shape_cast %375 : vector<1x1x8xf32> to vector<1x8xf32>
    %377 = vector.broadcast %376 : vector<1x8xf32> to vector<16x8xf32>
    %378 = arith.addf %374, %377 : vector<16x8xf32>
    %379 = vector.shape_cast %364 : vector<16x8xf32> to vector<2x8x8xf32>
    %380 = vector.shape_cast %371 : vector<16x8xf32> to vector<2x8x8xf32>
    "tpu.trace_start"() <{level = 10 : i32, message = "bqd,bkd->bqk"}> : () -> ()
    %cst_250 = arith.constant dense<0.000000e+00> : vector<2x8x8xf32>
    %381 = tpu.matmul %379, %380, %cst_250 {dimension_numbers = #tpu.dot_dimension_numbers<[2], [2], [1], [1], [0, 0, 0, 1, 1, 1], [0], [0]>} : vector<2x8x8xf32>, vector<2x8x8xf32>, vector<2x8x8xf32> -> vector<2x8x8xf32>
    "tpu.trace_stop"() : () -> ()
    %cst_251 = arith.constant dense<0xFF800000> : vector<2x8xf32>
    %382 = vector.multi_reduction <maximumf>, %381, %cst_251 [2] : vector<2x8x8xf32> to vector<2x8xf32>
    %383 = vector.shape_cast %382 : vector<2x8xf32> to vector<2x8x1xf32>
    %384 = vector.broadcast %383 : vector<2x8x1xf32> to vector<2x8x8xf32>
    %385 = arith.subf %381, %384 : vector<2x8x8xf32>
    %386 = math.exp %385 : vector<2x8x8xf32>
    %cst_252 = arith.constant dense<0.000000e+00> : vector<2x8xf32>
    %387 = vector.multi_reduction <add>, %386, %cst_252 [2] : vector<2x8x8xf32> to vector<2x8xf32>
    %388 = vector.shape_cast %387 : vector<2x8xf32> to vector<2x8x1xf32>
    %389 = tpu.reciprocal %388 {approx = true} : vector<2x8x1xf32> -> vector<2x8x1xf32>
    %390 = vector.broadcast %389 : vector<2x8x1xf32> to vector<2x8x8xf32>
    %391 = arith.mulf %386, %390 : vector<2x8x8xf32>
    %392 = vector.shape_cast %378 : vector<16x8xf32> to vector<2x8x8xf32>
    "tpu.trace_start"() <{level = 10 : i32, message = "bqk,bkd->bqd"}> : () -> ()
    %cst_253 = arith.constant dense<0.000000e+00> : vector<2x8x8xf32>
    %393 = tpu.matmul %391, %392, %cst_253 {dimension_numbers = #tpu.dot_dimension_numbers<[2], [1], [1], [2], [0, 0, 0, 1, 1, 2], [0], [0]>} : vector<2x8x8xf32>, vector<2x8x8xf32>, vector<2x8x8xf32> -> vector<2x8x8xf32>
    "tpu.trace_stop"() : () -> ()
    %394 = vector.shape_cast %393 : vector<2x8x8xf32> to vector<16x8xf32>
    %c6_254 = arith.constant 6 : index
    %c0_255 = arith.constant 0 : index
    %c0_256 = arith.constant 0 : index
    %395 = vector.load %arg11[%c6_254, %c0_255, %c0_256] : memref<8x8x32xf32, #tpu.memory_space<vmem>>, vector<1x8x32xf32>
    %396 = vector.shape_cast %395 : vector<1x8x32xf32> to vector<8x32xf32>
    %cst_257 = arith.constant dense<0.000000e+00> : vector<16x32xf32>
    %397 = tpu.matmul %394, %396, %cst_257 {dimension_numbers = #tpu.dot_dimension_numbers<[1], [0], [0], [1], [0, 0, 1, 1], [], []>} : vector<16x8xf32>, vector<8x32xf32>, vector<16x32xf32> -> vector<16x32xf32>
    %398 = arith.addf %357, %397 : vector<16x32xf32>
    %c7 = arith.constant 7 : index
    %c0_258 = arith.constant 0 : index
    %c0_259 = arith.constant 0 : index
    %399 = vector.load %arg5[%c7, %c0_258, %c0_259] : memref<8x32x8xf32, #tpu.memory_space<vmem>>, vector<1x32x8xf32>
    %400 = vector.shape_cast %399 : vector<1x32x8xf32> to vector<32x8xf32>
    %cst_260 = arith.constant dense<0.000000e+00> : vector<16x8xf32>
    %401 = tpu.matmul %274, %400, %cst_260 {dimension_numbers = #tpu.dot_dimension_numbers<[1], [0], [0], [1], [0, 0, 1, 1], [], []>} : vector<16x32xf32>, vector<32x8xf32>, vector<16x8xf32> -> vector<16x8xf32>
    %c7_261 = arith.constant 7 : index
    %c0_262 = arith.constant 0 : index
    %c0_263 = arith.constant 0 : index
    %402 = vector.load %arg6[%c7_261, %c0_262, %c0_263] : memref<8x1x8xf32, #tpu.memory_space<vmem>>, vector<1x1x8xf32>
    %403 = vector.shape_cast %402 : vector<1x1x8xf32> to vector<1x8xf32>
    %404 = vector.broadcast %403 : vector<1x8xf32> to vector<16x8xf32>
    %405 = arith.addf %401, %404 : vector<16x8xf32>
    %c7_264 = arith.constant 7 : index
    %c0_265 = arith.constant 0 : index
    %c0_266 = arith.constant 0 : index
    %406 = vector.load %arg7[%c7_264, %c0_265, %c0_266] : memref<8x32x8xf32, #tpu.memory_space<vmem>>, vector<1x32x8xf32>
    %407 = vector.shape_cast %406 : vector<1x32x8xf32> to vector<32x8xf32>
    %cst_267 = arith.constant dense<0.000000e+00> : vector<16x8xf32>
    %408 = tpu.matmul %274, %407, %cst_267 {dimension_numbers = #tpu.dot_dimension_numbers<[1], [0], [0], [1], [0, 0, 1, 1], [], []>} : vector<16x32xf32>, vector<32x8xf32>, vector<16x8xf32> -> vector<16x8xf32>
    %c7_268 = arith.constant 7 : index
    %c0_269 = arith.constant 0 : index
    %c0_270 = arith.constant 0 : index
    %409 = vector.load %arg8[%c7_268, %c0_269, %c0_270] : memref<8x1x8xf32, #tpu.memory_space<vmem>>, vector<1x1x8xf32>
    %410 = vector.shape_cast %409 : vector<1x1x8xf32> to vector<1x8xf32>
    %411 = vector.broadcast %410 : vector<1x8xf32> to vector<16x8xf32>
    %412 = arith.addf %408, %411 : vector<16x8xf32>
    %c7_271 = arith.constant 7 : index
    %c0_272 = arith.constant 0 : index
    %c0_273 = arith.constant 0 : index
    %413 = vector.load %arg9[%c7_271, %c0_272, %c0_273] : memref<8x32x8xf32, #tpu.memory_space<vmem>>, vector<1x32x8xf32>
    %414 = vector.shape_cast %413 : vector<1x32x8xf32> to vector<32x8xf32>
    %cst_274 = arith.constant dense<0.000000e+00> : vector<16x8xf32>
    %415 = tpu.matmul %274, %414, %cst_274 {dimension_numbers = #tpu.dot_dimension_numbers<[1], [0], [0], [1], [0, 0, 1, 1], [], []>} : vector<16x32xf32>, vector<32x8xf32>, vector<16x8xf32> -> vector<16x8xf32>
    %c7_275 = arith.constant 7 : index
    %c0_276 = arith.constant 0 : index
    %c0_277 = arith.constant 0 : index
    %416 = vector.load %arg10[%c7_275, %c0_276, %c0_277] : memref<8x1x8xf32, #tpu.memory_space<vmem>>, vector<1x1x8xf32>
    %417 = vector.shape_cast %416 : vector<1x1x8xf32> to vector<1x8xf32>
    %418 = vector.broadcast %417 : vector<1x8xf32> to vector<16x8xf32>
    %419 = arith.addf %415, %418 : vector<16x8xf32>
    %420 = vector.shape_cast %405 : vector<16x8xf32> to vector<2x8x8xf32>
    %421 = vector.shape_cast %412 : vector<16x8xf32> to vector<2x8x8xf32>
    "tpu.trace_start"() <{level = 10 : i32, message = "bqd,bkd->bqk"}> : () -> ()
    %cst_278 = arith.constant dense<0.000000e+00> : vector<2x8x8xf32>
    %422 = tpu.matmul %420, %421, %cst_278 {dimension_numbers = #tpu.dot_dimension_numbers<[2], [2], [1], [1], [0, 0, 0, 1, 1, 1], [0], [0]>} : vector<2x8x8xf32>, vector<2x8x8xf32>, vector<2x8x8xf32> -> vector<2x8x8xf32>
    "tpu.trace_stop"() : () -> ()
    %cst_279 = arith.constant dense<0xFF800000> : vector<2x8xf32>
    %423 = vector.multi_reduction <maximumf>, %422, %cst_279 [2] : vector<2x8x8xf32> to vector<2x8xf32>
    %424 = vector.shape_cast %423 : vector<2x8xf32> to vector<2x8x1xf32>
    %425 = vector.broadcast %424 : vector<2x8x1xf32> to vector<2x8x8xf32>
    %426 = arith.subf %422, %425 : vector<2x8x8xf32>
    %427 = math.exp %426 : vector<2x8x8xf32>
    %cst_280 = arith.constant dense<0.000000e+00> : vector<2x8xf32>
    %428 = vector.multi_reduction <add>, %427, %cst_280 [2] : vector<2x8x8xf32> to vector<2x8xf32>
    %429 = vector.shape_cast %428 : vector<2x8xf32> to vector<2x8x1xf32>
    %430 = tpu.reciprocal %429 {approx = true} : vector<2x8x1xf32> -> vector<2x8x1xf32>
    %431 = vector.broadcast %430 : vector<2x8x1xf32> to vector<2x8x8xf32>
    %432 = arith.mulf %427, %431 : vector<2x8x8xf32>
    %433 = vector.shape_cast %419 : vector<16x8xf32> to vector<2x8x8xf32>
    "tpu.trace_start"() <{level = 10 : i32, message = "bqk,bkd->bqd"}> : () -> ()
    %cst_281 = arith.constant dense<0.000000e+00> : vector<2x8x8xf32>
    %434 = tpu.matmul %432, %433, %cst_281 {dimension_numbers = #tpu.dot_dimension_numbers<[2], [1], [1], [2], [0, 0, 0, 1, 1, 2], [0], [0]>} : vector<2x8x8xf32>, vector<2x8x8xf32>, vector<2x8x8xf32> -> vector<2x8x8xf32>
    "tpu.trace_stop"() : () -> ()
    %435 = vector.shape_cast %434 : vector<2x8x8xf32> to vector<16x8xf32>
    %c7_282 = arith.constant 7 : index
    %c0_283 = arith.constant 0 : index
    %c0_284 = arith.constant 0 : index
    %436 = vector.load %arg11[%c7_282, %c0_283, %c0_284] : memref<8x8x32xf32, #tpu.memory_space<vmem>>, vector<1x8x32xf32>
    %437 = vector.shape_cast %436 : vector<1x8x32xf32> to vector<8x32xf32>
    %cst_285 = arith.constant dense<0.000000e+00> : vector<16x32xf32>
    %438 = tpu.matmul %435, %437, %cst_285 {dimension_numbers = #tpu.dot_dimension_numbers<[1], [0], [0], [1], [0, 0, 1, 1], [], []>} : vector<16x8xf32>, vector<8x32xf32>, vector<16x32xf32> -> vector<16x32xf32>
    %439 = arith.addf %398, %438 : vector<16x32xf32>
    %440 = arith.addf %250, %439 : vector<16x32xf32>
    %c1_286 = arith.constant 1 : index
    %c0_287 = arith.constant 0 : index
    %c0_288 = arith.constant 0 : index
    %441 = vector.load %arg12[%c1_286, %c0_287, %c0_288] : memref<2x1x32xf32, #tpu.memory_space<vmem>>, vector<1x1x32xf32>
    %442 = vector.shape_cast %441 : vector<1x1x32xf32> to vector<1x32xf32>
    %443 = vector.broadcast %442 : vector<1x32xf32> to vector<16x32xf32>
    %444 = arith.addf %440, %443 : vector<16x32xf32>
    %c1_289 = arith.constant 1 : index
    %c0_290 = arith.constant 0 : index
    %c0_291 = arith.constant 0 : index
    %445 = vector.load %arg13[%c1_289, %c0_290, %c0_291] : memref<2x1x32xf32, #tpu.memory_space<vmem>>, vector<1x1x32xf32>
    %446 = vector.shape_cast %445 : vector<1x1x32xf32> to vector<1x32xf32>
    %c1_292 = arith.constant 1 : index
    %c0_293 = arith.constant 0 : index
    %c0_294 = arith.constant 0 : index
    %447 = vector.load %arg14[%c1_292, %c0_293, %c0_294] : memref<2x1x32xf32, #tpu.memory_space<vmem>>, vector<1x1x32xf32>
    %448 = vector.shape_cast %447 : vector<1x1x32xf32> to vector<1x32xf32>
    %cst_295 = arith.constant dense<0.000000e+00> : vector<16xf32>
    %449 = vector.multi_reduction <add>, %444, %cst_295 [1] : vector<16x32xf32> to vector<16xf32>
    %450 = vector.shape_cast %449 : vector<16xf32> to vector<16x1xf32>
    %cst_296 = arith.constant 3.200000e+01 : f32
    %451 = vector.broadcast %cst_296 : f32 to vector<16x1xf32>
    %452 = arith.divf %450, %451 : vector<16x1xf32>
    %453 = vector.broadcast %452 : vector<16x1xf32> to vector<16x32xf32>
    %454 = arith.subf %444, %453 : vector<16x32xf32>
    %455 = arith.mulf %454, %454 : vector<16x32xf32>
    %cst_297 = arith.constant dense<0.000000e+00> : vector<16xf32>
    %456 = vector.multi_reduction <add>, %455, %cst_297 [1] : vector<16x32xf32> to vector<16xf32>
    %457 = vector.shape_cast %456 : vector<16xf32> to vector<16x1xf32>
    %cst_298 = arith.constant 3.200000e+01 : f32
    %458 = vector.broadcast %cst_298 : f32 to vector<16x1xf32>
    %459 = arith.divf %457, %458 : vector<16x1xf32>
    %cst_299 = arith.constant 9.99999974E-6 : f32
    %460 = vector.broadcast %cst_299 : f32 to vector<16x1xf32>
    %461 = arith.addf %459, %460 : vector<16x1xf32>
    %462 = math.rsqrt %461 : vector<16x1xf32>
    %463 = vector.broadcast %462 : vector<16x1xf32> to vector<16x32xf32>
    %464 = arith.mulf %454, %463 : vector<16x32xf32>
    %465 = vector.broadcast %446 : vector<1x32xf32> to vector<16x32xf32>
    %466 = arith.mulf %464, %465 : vector<16x32xf32>
    %467 = vector.broadcast %448 : vector<1x32xf32> to vector<16x32xf32>
    %468 = arith.addf %466, %467 : vector<16x32xf32>
    %c1_300 = arith.constant 1 : index
    %c0_301 = arith.constant 0 : index
    %c0_302 = arith.constant 0 : index
    %469 = vector.load %arg15[%c1_300, %c0_301, %c0_302] : memref<2x32x128xf32, #tpu.memory_space<vmem>>, vector<1x32x128xf32>
    %470 = vector.shape_cast %469 : vector<1x32x128xf32> to vector<32x128xf32>
    %cst_303 = arith.constant dense<0.000000e+00> : vector<16x128xf32>
    %471 = tpu.matmul %468, %470, %cst_303 {dimension_numbers = #tpu.dot_dimension_numbers<[1], [0], [0], [1], [0, 0, 1, 1], [], []>} : vector<16x32xf32>, vector<32x128xf32>, vector<16x128xf32> -> vector<16x128xf32>
    %c1_304 = arith.constant 1 : index
    %c0_305 = arith.constant 0 : index
    %c0_306 = arith.constant 0 : index
    %472 = vector.load %arg16[%c1_304, %c0_305, %c0_306] : memref<2x1x128xf32, #tpu.memory_space<vmem>>, vector<1x1x128xf32>
    %473 = vector.shape_cast %472 : vector<1x1x128xf32> to vector<1x128xf32>
    %474 = vector.broadcast %473 : vector<1x128xf32> to vector<16x128xf32>
    %475 = arith.addf %471, %474 : vector<16x128xf32>
    %cst_307 = arith.constant 5.000000e-01 : f32
    %476 = vector.broadcast %cst_307 : f32 to vector<16x128xf32>
    %477 = arith.mulf %476, %475 : vector<16x128xf32>
    %cst_308 = arith.constant 4.471500e-02 : f32
    %478 = vector.broadcast %cst_308 : f32 to vector<16x128xf32>
    %479 = arith.mulf %478, %475 : vector<16x128xf32>
    %480 = arith.mulf %479, %475 : vector<16x128xf32>
    %481 = arith.mulf %480, %475 : vector<16x128xf32>
    %482 = arith.addf %475, %481 : vector<16x128xf32>
    %cst_309 = arith.constant 0.797884583 : f32
    %483 = vector.broadcast %cst_309 : f32 to vector<16x128xf32>
    %484 = arith.mulf %483, %482 : vector<16x128xf32>
    %485 = math.tanh %484 : vector<16x128xf32>
    %cst_310 = arith.constant 1.000000e+00 : f32
    %486 = vector.broadcast %cst_310 : f32 to vector<16x128xf32>
    %487 = arith.addf %486, %485 : vector<16x128xf32>
    %488 = arith.mulf %477, %487 : vector<16x128xf32>
    %c1_311 = arith.constant 1 : index
    %c0_312 = arith.constant 0 : index
    %c0_313 = arith.constant 0 : index
    %489 = vector.load %arg17[%c1_311, %c0_312, %c0_313] : memref<2x128x32xf32, #tpu.memory_space<vmem>>, vector<1x128x32xf32>
    %490 = vector.shape_cast %489 : vector<1x128x32xf32> to vector<128x32xf32>
    %cst_314 = arith.constant dense<0.000000e+00> : vector<16x32xf32>
    %491 = tpu.matmul %488, %490, %cst_314 {dimension_numbers = #tpu.dot_dimension_numbers<[1], [0], [0], [1], [0, 0, 1, 1], [], []>} : vector<16x128xf32>, vector<128x32xf32>, vector<16x32xf32> -> vector<16x32xf32>
    %492 = arith.addf %444, %491 : vector<16x32xf32>
    %c1_315 = arith.constant 1 : index
    %c0_316 = arith.constant 0 : index
    %c0_317 = arith.constant 0 : index
    %493 = vector.load %arg18[%c1_315, %c0_316, %c0_317] : memref<2x1x32xf32, #tpu.memory_space<vmem>>, vector<1x1x32xf32>
    %494 = vector.shape_cast %493 : vector<1x1x32xf32> to vector<1x32xf32>
    %495 = vector.broadcast %494 : vector<1x32xf32> to vector<16x32xf32>
    %496 = arith.addf %492, %495 : vector<16x32xf32>
    %c0_318 = arith.constant 0 : index
    %c0_319 = arith.constant 0 : index
    %497 = vector.load %arg19[%c0_318, %c0_319] : memref<2x16xf32, #tpu.memory_space<vmem>>, vector<2x16xf32>
    %cst_320 = arith.constant dense<0.000000e+00> : vector<2x32xf32>
    %498 = tpu.matmul %497, %496, %cst_320 {dimension_numbers = #tpu.dot_dimension_numbers<[1], [0], [0], [1], [0, 0, 1, 1], [], []>} : vector<2x16xf32>, vector<16x32xf32>, vector<2x32xf32> -> vector<2x32xf32>
    %c0_321 = arith.constant 0 : index
    %c0_322 = arith.constant 0 : index
    %499 = vector.load %arg20[%c0_321, %c0_322] : memref<32x1xf32, #tpu.memory_space<vmem>>, vector<32x1xf32>
    %cst_323 = arith.constant dense<0.000000e+00> : vector<2x1xf32>
    %500 = tpu.matmul %498, %499, %cst_323 {dimension_numbers = #tpu.dot_dimension_numbers<[1], [0], [0], [1], [0, 0, 1, 1], [], []>} : vector<2x32xf32>, vector<32x1xf32>, vector<2x1xf32> -> vector<2x1xf32>
    %c0_324 = arith.constant 0 : index
    %c0_325 = arith.constant 0 : index
    %501 = vector.load %arg21[%c0_324, %c0_325] : memref<1x1xf32, #tpu.memory_space<vmem>>, vector<1x1xf32>
    %502 = vector.broadcast %501 : vector<1x1xf32> to vector<2x1xf32>
    %503 = arith.addf %500, %502 : vector<2x1xf32>
    %c0_326 = arith.constant 0 : index
    %c0_327 = arith.constant 0 : index
    %504 = vector.load %arg22[%c0_326, %c0_327] : memref<2x1xf32, #tpu.memory_space<vmem>>, vector<2x1xf32>
    tpu.vector_store %arg22[%c0_326, %c0_327], %503 {strides = array<i32>} : memref<2x1xf32, #tpu.memory_space<vmem>>, vector<2x1xf32>,
    %cst_328 = arith.constant 0.000000e+00 : f32
    %505 = vector.broadcast %cst_328 : f32 to vector<2x1xf32>
    %506 = arith.subf %505, %503 : vector<2x1xf32>
    %507 = math.exp %506 : vector<2x1xf32>
    %cst_329 = arith.constant 1.000000e+00 : f32
    %508 = vector.broadcast %cst_329 : f32 to vector<2x1xf32>
    %509 = arith.addf %508, %507 : vector<2x1xf32>
    %cst_330 = arith.constant 1.000000e+00 : f32
    %510 = vector.broadcast %cst_330 : f32 to vector<2x1xf32>
    %511 = arith.divf %510, %509 : vector<2x1xf32>
    %c0_331 = arith.constant 0 : index
    %c0_332 = arith.constant 0 : index
    %512 = vector.load %arg23[%c0_331, %c0_332] : memref<2x1xf32, #tpu.memory_space<vmem>>, vector<2x1xf32>
    tpu.vector_store %arg23[%c0_331, %c0_332], %511 {strides = array<i32>} : memref<2x1xf32, #tpu.memory_space<vmem>>, vector<2x1xf32>,
    return
  }
}

</mosaic_0001>

<bundles_post_ra>
// kernel: forward.1
= control target key start
LH: loop header
LB: loop body
LE: loop exit
PB: predicated region body
PF: predicated region fallthrough
CT: control target
= control target key end

     0   :  { %vm81_vm0 = vcmask 130048   ;;  %vm165_vm1 = vcmask 261120   ;;  %v7586_v50 = vmov 0.0   ;;  %vm7587_vm2 = vmmov 0   ;;  %s8711_s1 = inlined_call_operand.vmem [shape: f32[16,32], index: 1, kind: input, shape index: {}]   ;;  %s8712_s0 = inlined_call_operand.vmem [shape: f32[16,16], index: 0, kind: input, shape index: {}]   ;;  %s8713_s2 = inlined_call_operand.vmem [shape: f32[16,32], index: 2, kind: input, shape index: {}]   ;;  %s8714_s5 = inlined_call_operand.vmem [shape: f32[8,32,8], index: 5, kind: input, shape index: {}]   ;;  %s8715_s7 = inlined_call_operand.vmem [shape: f32[8,32,8], index: 7, kind: input, shape index: {}]   ;;  %s8716_s3 = inlined_call_operand.vmem [shape: f32[2,1,32], index: 3, kind: input, shape index: {}]   ;;  %s8717_s4 = inlined_call_operand.vmem [shape: f32[2,1,32], index: 4, kind: input, shape index: {}]   ;;  %s8718_s9 = inlined_call_operand.vmem [shape: f32[8,32,8], index: 9, kind: input, shape index: {}]   ;;  %s8719_s8 = inlined_call_operand.vmem [shape: f32[8,1,8], index: 8, kind: input, shape index: {}]   ;;  %s8720_s6 = inlined_call_operand.vmem [shape: f32[8,1,8], index: 6, kind: input, shape index: {}]   ;;  %s8721_s10 = inlined_call_operand.vmem [shape: f32[8,1,8], index: 10, kind: input, shape index: {}]   ;;  %s8722_s11 = inlined_call_operand.vmem [shape: f32[8,8,32], index: 11, kind: input, shape index: {}]   ;;  %s8723_s12 = inlined_call_operand.vmem [shape: f32[2,1,32], index: 12, kind: input, shape index: {}]   ;;  %s8724_s15 = inlined_call_operand.vmem [shape: f32[2,32,128], index: 15, kind: input, shape index: {}]   ;;  %s8725_s13 = inlined_call_operand.vmem [shape: f32[2,1,32], index: 13, kind: input, shape index: {}]   ;;  %s8726_s14 = inlined_call_operand.vmem [shape: f32[2,1,32], index: 14, kind: input, shape index: {}]   ;;  %s8727_s17 = inlined_call_operand.vmem [shape: f32[2,128,32], index: 17, kind: input, shape index: {}]   ;;  %s8728_s16 = inlined_call_operand.vmem [shape: f32[2,1,128], index: 16, kind: input, shape index: {}]   ;;  %s8729_s18 = inlined_call_operand.vmem [shape: f32[2,1,32], index: 18, kind: input, shape index: {}]   ;;  %s8730_s19 = inlined_call_operand.vmem [shape: f32[2,16], index: 19, kind: input, shape index: {}]   ;;  %s8731_s20 = inlined_call_operand.vmem [shape: f32[32,1], index: 20, kind: input, shape index: {}]   ;;  %s8732_s21 = inlined_call_operand.<no memory space> [shape: f32[1,1], index: 21, kind: input, shape index: {}]   ;;  %s8733_s22 = inlined_call_operand.vmem [shape: f32[2,1], index: 22, kind: output, shape index: {0}]   ;;  %s8734_s23 = inlined_call_operand.vmem [shape: f32[2,1], index: 23, kind: output, shape index: {1}]  }
   0x1   :  { %8743 = sst [smem:[#allocation3_spill]] %s8711_s1  ;;  %v6328_v54 = vld [vmem:[%s8719_s8] ss:$0 sm:$0xff]  ;;  %vm473_vm3 = vcmask 64512   ;;  %vm6304_vm4 = vcmask 1024  }
   0x2   :  { %8744 = sst [smem:[#allocation4_spill]] %s8712_s0  ;;  %v6325_v57 = vld [vmem:[%s8720_s6] ss:$0 sm:$0xff] }
   0x3   :  { %8745 = sst [smem:[#allocation5_spill]] %s8713_s2  ;;  %v6331_v61 = vld [vmem:[%s8721_s10] ss:$0 sm:$0xff] }
   0x4   :  { %8746 = sst [smem:[#allocation6_spill]] %s8714_s5 }
   0x5   :  { %8747 = sst [smem:[#allocation7_spill]] %s8715_s7 }
   0x6   :  { %8748 = sst [smem:[#allocation8_spill]] %s8716_s3 }
   0x7   :  { %8749 = sst [smem:[#allocation9_spill]] %s8717_s4 }
   0x8   :  { %8750 = sst [smem:[#allocation10_spill]] %s8718_s9 }
   0x9   :  { %s8751_s24 = sld [smem:[#allocation3_spill]] }
   0xa   :  { %s8752_s2 = sld [smem:[#allocation4_spill]] }
   0xb   :  { %s8753_s29 = sld [smem:[#allocation5_spill]] }
   0xc   :  { %s8755_s28 = sld [smem:[#allocation7_spill]] }
   0xd   :  { %s8756_s1 = sld [smem:[#allocation8_spill]] }
   0xe   :  { %s8757_s25 = sld [smem:[#allocation9_spill]] }
   0xf   :  { %v78_v0 = vld [vmem:[%s8751_s24 + $0x8] sm:$0xff]  ;;  %v77_v1 = vld [vmem:[%s8751_s24] sm:$0xff]  ;;  %s8754_s24 = sld [smem:[#allocation6_spill]] }
  0x10   :  { %v75_v2 = vld [vmem:[%s8752_s2] sm:$0xff]  ;;  %6911 = vmatprep.subr.mxu0 %v78_v0  ;;  %v76_v3 = vld [vmem:[%s8752_s2 + $0x8] sm:$0xff]  ;;  %s8758_s5 = sld [smem:[#allocation10_spill]] }
  0x11   :  { %6915 = vmatprep.mubr.msk.f32.mxu0 %vm81_vm0, %v75_v2  ;;  %6912 = vmatpush3.msra.mxu0 %v78_v0  ;;  %v79_v5 = vld [vmem:[%s8753_s29] sm:$0xff]  ;;  %v80_v6 = vld [vmem:[%s8753_s29 + $0x8] sm:$0xff] }
  0x12   :  { %6913 = vmatprep.subr.mxu0 %v77_v1  ;;  %v304_v26 = vld [vmem:[%s8755_s28 + $0x18] sm:$0xff]  ;;  %v303_v43 = vld [vmem:[%s8755_s28 + $0x10] sm:$0xff]  ;;  %v302_v44 = vld [vmem:[%s8755_s28 + $0x8] sm:$0xff] }
  0x13   :  { %6914 = vmatpush3.msra.mxu0 %v77_v1  ;;  %v6323_v34 = vld [vmem:[%s8756_s1] ss:$0 sm:$0xff] }
  0x14   :  { %6916 = vmatmul.mubr.msk.f32.vlgmr.msra.gmra.mxu0 %vm81_vm0, %v76_v3  ;;  %v6324_v36 = vld [vmem:[%s8757_s25] ss:$0 sm:$0xff]  ;;  %6951 = vmatprep.subr.mxu0 %v7586_v50 }
  0x15   :  { %v212_v22 = vld [vmem:[%s8754_s24 + $0x18] sm:$0xff]  ;;  %v211_v23 = vld [vmem:[%s8754_s24 + $0x10] sm:$0xff]  ;;  %v210_v24 = vld [vmem:[%s8754_s24 + $0x8] sm:$0xff]  ;;  %6953 = vmatprep.mubr.msk.f32.mxu0 %vm7587_vm2, %v7586_v50 }
  0x16   :  { %6918 = vmatprep.subr.mxu1 %v212_v22  ;;  %v209_v25 = vld [vmem:[%s8754_s24] sm:$0xff]  ;;  %v390_v46 = vld [vmem:[%s8758_s5 + $0x18] sm:$0xff]  ;;  %v389_v47 = vld [vmem:[%s8758_s5 + $0x10] sm:$0xff] }
  0x17   :  { %6919 = vmatpush3.msra.mxu1 %v212_v22  ;;  %v301_v45 = vld [vmem:[%s8755_s28] sm:$0xff]  ;;  %v388_v48 = vld [vmem:[%s8758_s5 + $0x8] sm:$0xff] }
  0x18   :  { %6920 = vmatprep.subr.mxu1 %v211_v23  ;;  %v387_v49 = vld [vmem:[%s8758_s5] sm:$0xff] }
  0x19   :  { %6921 = vmatpush3.msra.mxu1 %v211_v23 }
  0x1a   :  { %6922 = vmatprep.subr.mxu1 %v210_v24 }
  0x1b   :  { %6923 = vmatpush3.msra.mxu1 %v210_v24 }
  0x1c   :  { %6924 = vmatprep.subr.mxu1 %v209_v25 }
  0x1d   :  { %6925 = vmatpush3.msra.mxu1 %v209_v25 }
  0x1e   :  { %6929 = vmatprep.subr.mxu1 %v304_v26 }
  0xd4   :  { %v6917_v4 = vpop.f32.mrf.mxu0 }
  0xd5   :  { %v7730_v9 = vadd.f32 %v6917_v4, %v80_v6 }
  0xd6   :  { %v154_v7 = vpop.f32.mrf.mxu0 }
  0xd7   :  { %v7728_v8 = vadd.f32 %v154_v7, %v79_v5  ;;  %v169_v11 = vsel %vm165_vm1, %v7730_v9, 0.0 }
  0xd9   :  { %v166_v10 = vsel %vm165_vm1, %v7728_v8, 0.0 }
  0xda   :  { %167 = vadd.xlane.f32.xlu0 %v166_v10 }
  0xde   :  { %170 = vadd.xlane.f32.xlu0 %v169_v11 }
 0x163   :  { %v168_v12 = vpop.xlane.xlu0 %167 }
 0x164   :  { %v173_v13 = vmul.f32 0.03125, %v168_v12 }
 0x166   :  { %v175_v14 = vsub.f32 %v7728_v8, %v173_v13 }
 0x167   :  { %v171_v15 = vpop.xlane.xlu0 %170 }
 0x168   :  { %v174_v16 = vmul.f32 0.03125, %v171_v15  ;;  %v177_v17 = vmul.f32 %v175_v14, %v175_v14 }
 0x16a   :  { %v176_v18 = vsub.f32 %v7730_v9, %v174_v16  ;;  %v179_v19 = vsel %vm165_vm1, %v177_v17, 0.0 }
 0x16b   :  { %180 = vadd.xlane.f32.xlu1 %v179_v19 }
 0x16c   :  { %v178_v20 = vmul.f32 %v176_v18, %v176_v18 }
 0x16e   :  { %v182_v21 = vsel %vm165_vm1, %v178_v20, 0.0  ;;  %v6343_v20 = vld [vmem:[%s8754_s24 + $0x38] sm:$0xff] }
 0x16f   :  { %183 = vadd.xlane.f32.xlu1 %v182_v21  ;;  %v6351_v21 = vld [vmem:[%s8755_s28 + $0x38] sm:$0xff] }
 0x1f4   :  { %v181_v27 = vpop.xlane.xlu1 %180 }
 0x1f5   :  { %v185_v28 = vmul.f32 0.03125, %v181_v27 }
 0x1f7   :  { %v187_v29 = vadd.f32 1e-05, %v185_v28  ;;  %v6341_v28 = vld [vmem:[%s8754_s24 + $0x28] sm:$0xff] }
 0x1f8   :  { %v184_v30 = vpop.xlane.xlu1 %183 }
 0x1f9   :  { %7494 = vrsqrt.f32 %v187_v29  ;;  %v186_v31 = vmul.f32 0.03125, %v184_v30  ;;  %v6340_v30 = vld [vmem:[%s8754_s24 + $0x20] sm:$0xff] }
 0x1fb   :  { %v188_v32 = vadd.f32 1e-05, %v186_v31  ;;  %v6350_v31 = vld [vmem:[%s8755_s28 + $0x30] sm:$0xff] }
 0x1fd   :  { %7496 = vrsqrt.f32 %v188_v32  ;;  %v6349_v32 = vld [vmem:[%s8755_s28 + $0x28] sm:$0xff] }
 0x206   :  { %v7495_v33 = vpop.eup %7494 }
 0x207   :  { %v191_v35 = vmul.f32 %v7495_v33, %v175_v14  ;;  %v6359_v33 = vld [vmem:[%s8758_s5 + $0x38] sm:$0xff] }
 0x209   :  { %v199_v37 = vmul.f32 %v6323_v34, %v191_v35  ;;  %v6358_v35 = vld [vmem:[%s8758_s5 + $0x30] sm:$0xff] }
 0x20a   :  { %v7497_v38 = vpop.eup %7496 }
 0x20b   :  { %v7761_v39 = vadd.f32 %v6324_v36, %v199_v37  ;;  %v192_v40 = vmul.f32 %v7497_v38, %v176_v18  ;;  %v6356_v37 = vld [vmem:[%s8758_s5 + $0x20] sm:$0xff] }
 0x20d   :  { %v200_v41 = vmul.f32 %v6323_v34, %v192_v40  ;;  %6926 = vmatprep.mubr.msk.f32.mxu1 %vm165_vm1, %v7761_v39  ;;  %v6348_v34 = vld [vmem:[%s8755_s28 + $0x20] sm:$0xff] }
 0x20f   :  { %v7765_v42 = vadd.f32 %v6324_v36, %v200_v41  ;;  %v6357_v36 = vld [vmem:[%s8758_s5 + $0x28] sm:$0xff] }
 0x211   :  { %6927 = vmatmul.mubr.msk.f32.vlgmr.msra.gmra.mxu1 %vm165_vm1, %v7765_v42 }
 0x212   :  { %6930 = vmatpush3.msra.mxu1 %v304_v26  ;;  %6937 = vmatprep.mubr.msk.f32.mxu1 %vm165_vm1, %v7761_v39  ;;  %v6342_v26 = vld [vmem:[%s8754_s24 + $0x30] sm:$0xff] }
 0x213   :  { %6931 = vmatprep.subr.mxu1 %v303_v43 }
 0x214   :  { %6932 = vmatpush3.msra.mxu1 %v303_v43 }
 0x215   :  { %6933 = vmatprep.subr.mxu1 %v302_v44 }
 0x216   :  { %6934 = vmatpush3.msra.mxu1 %v302_v44 }
 0x217   :  { %6935 = vmatprep.subr.mxu1 %v301_v45 }
 0x218   :  { %6936 = vmatpush3.msra.mxu1 %v301_v45 }
 0x219   :  { %6938 = vmatmul.mubr.msk.f32.vlgmr.msra.gmra.mxu1 %vm165_vm1, %v7765_v42  ;;  %6940 = vmatprep.subr.mxu1 %v390_v46 }
 0x21a   :  { %6941 = vmatpush3.msra.mxu1 %v390_v46  ;;  %6948 = vmatprep.mubr.msk.f32.mxu1 %vm165_vm1, %v7761_v39  ;;  %v6353_v46 = vld [vmem:[%s8719_s8 + $0x1] ss:$0 sm:$0xff] }
 0x21b   :  { %6942 = vmatprep.subr.mxu1 %v389_v47 }
 0x21c   :  { %6943 = vmatpush3.msra.mxu1 %v389_v47 }
 0x21d   :  { %6944 = vmatprep.subr.mxu1 %v388_v48 }
 0x21e   :  { %6945 = vmatpush3.msra.mxu1 %v388_v48 }
 0x21f   :  { %6946 = vmatprep.subr.mxu1 %v387_v49 }
 0x220   :  { %6947 = vmatpush3.msra.mxu1 %v387_v49 }
 0x221   :  { %6949 = vmatmul.mubr.msk.f32.vlgmr.msra.gmra.mxu1 %vm165_vm1, %v7765_v42  ;;  %6961 = vmatprep.subr.mxu1 %v7586_v50 }
 0x222   :  { %6963 = vmatprep.mubr.msk.f32.mxu1 %vm7587_vm2, %v7586_v50 }
 0x2d1   :  { %v6928_v51 = vpop.f32.mrf.mxu1 }
 0x2d2   :  { %v298_v62 = vadd.f32 %v6928_v51, %v6325_v57  ;;  %v6345_v51 = vld [vmem:[%s8720_s6 + $0x1] ss:$0 sm:$0xff] }
 0x2d3   :  { %v292_v52 = vpop.f32.mrf.mxu1 }
 0x2d4   :  { %v293_v58 = vadd.f32 %v6325_v57, %v292_v52 }
 0x2d9   :  { %v6939_v53 = vpop.f32.mrf.mxu1 }
 0x2da   :  { %v384_v59 = vadd.f32 %v6939_v53, %v6328_v54 }
 0x2db   :  { %v378_v55 = vpop.f32.mrf.mxu1 }
 0x2dc   :  { %v379_v56 = vadd.f32 %v6328_v54, %v378_v55  ;;  %v6361_v55 = vld [vmem:[%s8721_s10 + $0x1] ss:$0 sm:$0xff] }
 0x2de   :  { %6952 = vmatpush3.xpose.msk.msra.mxu0 %vm473_vm3, %v379_v56 }
 0x2df   :  { %6956 = vmatprep.subr.mxu0 %v7586_v50 }
 0x2e1   :  { %v6950_v60 = vpop.f32.mrf.mxu1  ;;  %6954 = vmatmul.mubr.msk.f32.vlgmr.msra.gmra.mxu0 %vm473_vm3, %v293_v58 }
 0x2e2   :  { %6957 = vmatpush3.xpose.msk.msra.mxu0 %vm473_vm3, %v384_v59  ;;  %6958 = vmatprep.mubr.msk.f32.mxu0 %vm7587_vm2, %v7586_v50  ;;  %v470_v0 = vadd.f32 %v6950_v60, %v6331_v61 }
 0x2e3   :  { %v464_v63 = vpop.f32.mrf.mxu1  ;;  %6966 = vmatprep.subr.mxu0 %v7586_v50 }
 0x2e4   :  { %v465_v1 = vadd.f32 %v6331_v61, %v464_v63 }
 0x2e5   :  { %6959 = vmatmul.mubr.msk.f32.vlgmr.msra.gmra.mxu0 %vm473_vm3, %v298_v62 }
 0x2e6   :  { %6962 = vmatpush3.msra.mxu1 %v465_v1  ;;  %6967 = vmatpush3.msra.mxu0 %v470_v0 }
 0x2e7   :  { %6968 = vmatprep.mubr.msk.f32.mxu0 %vm7587_vm2, %v7586_v50  ;;  %6971 = vmatprep.subr.mxu1 %v6343_v20 }
 0x2e8   :  { %6982 = vmatprep.subr.mxu0 %v6351_v21 }
 0x3a1   :  { %v546_v2 = vpop.f32.mrf.mxu0 }
 0x3a2   :  { %v626_v3 = vsel %vm473_vm3, %v546_v2, -inf }
 0x3a3   :  { %627 = vmax.xlane.f32.xlu1 %v626_v3  ;;  %v6955_v4 = vpop.f32.mrf.mxu0 }
 0x3a5   :  { %v622_v5 = vpop.f32.mrf.mxu0 }
 0x3a6   :  { %v629_v6 = vsel %vm473_vm3, %v622_v5, -inf }
 0x3a7   :  { %630 = vmax.xlane.f32.xlu0 %v629_v6  ;;  %v6960_v7 = vpop.f32.mrf.mxu0 }
 0x42c   :  { %v628_v10 = vpop.xlane.xlu1 %627 }
 0x42d   :  { %v632_v11 = vsub.f32 %v546_v2, %v628_v10 }
 0x42f   :  { %v634_v12 = vmul.f32 1.442695, %v632_v11 }
 0x430   :  { %v631_v13 = vpop.xlane.xlu0 %630 }
 0x431   :  { %7498 = vpow2.f32 %v634_v12  ;;  %v633_v14 = vsub.f32 %v622_v5, %v631_v13 }
 0x433   :  { %v636_v15 = vmul.f32 1.442695, %v633_v14  ;;  %v794_v14 = vld [vmem:[%s8722_s11] sm:$0xff] }
 0x435   :  { %7500 = vpow2.f32 %v636_v15 }
 0x43e   :  { %v7499_v16 = vpop.eup %7498 }
 0x43f   :  { %v638_v17 = vsel %vm473_vm3, %v7499_v16, 0.0 }
 0x440   :  { %639 = vadd.xlane.f32.xlu1 %v638_v17 }
 0x442   :  { %v7501_v18 = vpop.eup %7500 }
 0x443   :  { %v641_v19 = vsel %vm473_vm3, %v7501_v18, 0.0 }
 0x444   :  { %642 = vadd.xlane.f32.xlu0 %v641_v19 }
 0x4c9   :  { %v640_v22 = vpop.xlane.xlu1 %639 }
 0x4ca   :  { %7502 = vrcp.f32 %v640_v22  ;;  %v6385_v22 = vld [vmem:[%s8755_s28 + $0x50] sm:$0xff] }
 0x4cd   :  { %v643_v23 = vpop.xlane.xlu0 %642 }
 0x4ce   :  { %7504 = vrcp.f32 %v643_v23  ;;  %v6384_v23 = vld [vmem:[%s8755_s28 + $0x48] sm:$0xff] }
 0x4d7   :  { %v7503_v24 = vpop.eup %7502 }
 0x4d8   :  { %v646_v25 = vmul.f32 %v7503_v24, %v7499_v16  ;;  %v6383_v24 = vld [vmem:[%s8755_s28 + $0x40] sm:$0xff] }
 0x4da   :  { %6964 = vmatmul.mubr.msk.f32.vlgmr.msra.gmra.mxu1 %vm473_vm3, %v646_v25  ;;  %v6370_v25 = vld [vmem:[%s8722_s11 + $0x8] sm:$0xff] }
 0x4db   :  { %v7505_v27 = vpop.eup %7504  ;;  %6972 = vmatpush3.msra.mxu1 %v6343_v20  ;;  %6979 = vmatprep.mubr.msk.f32.mxu1 %vm165_vm1, %v7761_v39 }
 0x4dc   :  { %6973 = vmatprep.subr.mxu1 %v6342_v26  ;;  %v647_v29 = vmul.f32 %v7505_v27, %v7501_v18 }
 0x4dd   :  { %6974 = vmatpush3.msra.mxu1 %v6342_v26  ;;  %v6378_v26 = vld [vmem:[%s8754_s24 + $0x58] sm:$0xff] }
 0x4de   :  { %6975 = vmatprep.subr.mxu1 %v6341_v28  ;;  %6969 = vmatmul.mubr.msk.f32.vlgmr.msra.gmra.mxu0 %vm473_vm3, %v647_v29 }
 0x4df   :  { %6976 = vmatpush3.msra.mxu1 %v6341_v28  ;;  %6983 = vmatpush3.msra.mxu0 %v6351_v21  ;;  %v6386_v21 = vld [vmem:[%s8755_s28 + $0x58] sm:$0xff] }
 0x4e0   :  { %6977 = vmatprep.subr.mxu1 %v6340_v30  ;;  %6984 = vmatprep.subr.mxu0 %v6350_v31 }
 0x4e1   :  { %6990 = vmatprep.mubr.msk.f32.mxu0 %vm165_vm1, %v7761_v39  ;;  %6978 = vmatpush3.msra.mxu1 %v6340_v30  ;;  %v6377_v30 = vld [vmem:[%s8754_s24 + $0x50] sm:$0xff] }
 0x4e2   :  { %6985 = vmatpush3.msra.mxu0 %v6350_v31  ;;  %6980 = vmatmul.mubr.msk.f32.vlgmr.msra.gmra.mxu1 %vm165_vm1, %v7765_v42 }
 0x4e3   :  { %6986 = vmatprep.subr.mxu0 %v6349_v32  ;;  %6993 = vmatprep.subr.mxu1 %v6359_v33 }
 0x4e4   :  { %6987 = vmatpush3.msra.mxu0 %v6349_v32  ;;  %6994 = vmatpush3.msra.mxu1 %v6359_v33  ;;  %v6376_v32 = vld [vmem:[%s8754_s24 + $0x48] sm:$0xff]  ;;  %v6375_v33 = vld [vmem:[%s8754_s24 + $0x40] sm:$0xff] }
 0x4e5   :  { %7001 = vmatprep.mubr.msk.f32.mxu1 %vm165_vm1, %v7761_v39  ;;  %6988 = vmatprep.subr.mxu0 %v6348_v34 }
 0x4e6   :  { %6995 = vmatprep.subr.mxu1 %v6358_v35  ;;  %6989 = vmatpush3.msra.mxu0 %v6348_v34 }
 0x4e7   :  { %6996 = vmatpush3.msra.mxu1 %v6358_v35  ;;  %6991 = vmatmul.mubr.msk.f32.vlgmr.msra.gmra.mxu0 %vm165_vm1, %v7765_v42  ;;  %v6394_v35 = vld [vmem:[%s8758_s5 + $0x58] sm:$0xff] }
 0x4e8   :  { %6997 = vmatprep.subr.mxu1 %v6357_v36  ;;  %7004 = vmatprep.subr.mxu0 %v7586_v50 }
 0x4e9   :  { %6998 = vmatpush3.msra.mxu1 %v6357_v36  ;;  %7006 = vmatprep.mubr.msk.f32.mxu0 %vm7587_vm2, %v7586_v50  ;;  %v6393_v36 = vld [vmem:[%s8758_s5 + $0x50] sm:$0xff] }
 0x4ea   :  { %6999 = vmatprep.subr.mxu1 %v6356_v37 }
 0x4eb   :  { %7000 = vmatpush3.msra.mxu1 %v6356_v37 }
 0x4ec   :  { %7002 = vmatmul.mubr.msk.f32.vlgmr.msra.gmra.mxu1 %vm165_vm1, %v7765_v42  ;;  %7014 = vmatprep.subr.mxu1 %v7586_v50 }
 0x4ed   :  { %7016 = vmatprep.mubr.msk.f32.mxu1 %vm7587_vm2, %v7586_v50 }
 0x59a   :  { %v7883_v38 = vpop.f32.mrf.mxu1 }
 0x59c   :  { %v6965_v40 = vpop.f32.mrf.mxu1 }
 0x59d   :  { %v6392_v40 = vld [vmem:[%s8758_s5 + $0x48] sm:$0xff] }
 0x59e   :  { %v7885_v41 = vpop.f32.mrf.mxu0 }
 0x5a0   :  { %v6970_v43 = vpop.f32.mrf.mxu0 }
 0x5a1   :  { %v6391_v43 = vld [vmem:[%s8758_s5 + $0x40] sm:$0xff] }
 0x5a2   :  { %v6981_v44 = vpop.f32.mrf.mxu1 }
 0x5a3   :  { %v880_v58 = vadd.f32 %v6981_v44, %v6345_v51 }
 0x5a4   :  { %v874_v48 = vpop.f32.mrf.mxu1 }
 0x5a5   :  { %v875_v53 = vadd.f32 %v6345_v51, %v874_v48  ;;  %v6380_v51 = vld [vmem:[%s8720_s6 + $0x2] ss:$0 sm:$0xff] }
 0x5a7   :  { %v6992_v45 = vpop.f32.mrf.mxu0 }
 0x5a8   :  { %v968_v54 = vadd.f32 %v6992_v45, %v6353_v46 }
 0x5a9   :  { %v962_v47 = vpop.f32.mrf.mxu0 }
 0x5aa   :  { %v963_v49 = vadd.f32 %v6353_v46, %v962_v47 }
 0x5ac   :  { %v7003_v52 = vpop.f32.mrf.mxu1  ;;  %7005 = vmatpush3.xpose.msk.msra.mxu0 %vm473_vm3, %v963_v49 }
 0x5ad   :  { %7009 = vmatprep.subr.mxu0 %v7586_v50  ;;  %v1056_v59 = vadd.f32 %v7003_v52, %v6361_v55 }
 0x5ae   :  { %v1050_v56 = vpop.f32.mrf.mxu1 }
 0x5af   :  { %v1051_v57 = vadd.f32 %v6361_v55, %v1050_v56  ;;  %7007 = vmatmul.mubr.msk.f32.vlgmr.msra.gmra.mxu0 %vm473_vm3, %v875_v53 }
 0x5b0   :  { %7010 = vmatpush3.xpose.msk.msra.mxu0 %vm473_vm3, %v968_v54  ;;  %7011 = vmatprep.mubr.msk.f32.mxu0 %vm7587_vm2, %v7586_v50  ;;  %v6396_v54 = vld [vmem:[%s8721_s10 + $0x2] ss:$0 sm:$0xff] }
 0x5b1   :  { %7015 = vmatpush3.msra.mxu1 %v1051_v57  ;;  %7019 = vmatprep.subr.mxu0 %v7586_v50 }
 0x5b2   :  { %7024 = vmatprep.subr.mxu1 %v6370_v25 }
 0x5b3   :  { %7012 = vmatmul.mubr.msk.f32.vlgmr.msra.gmra.mxu0 %vm473_vm3, %v880_v58 }
 0x5b4   :  { %7020 = vmatpush3.msra.mxu0 %v1056_v59  ;;  %7021 = vmatprep.mubr.msk.f32.mxu0 %vm7587_vm2, %v7586_v50 }
 0x5b5   :  { %7029 = vmatprep.subr.mxu0 %v794_v14 }
 0x66f   :  { %v1131_v60 = vpop.f32.mrf.mxu0 }
 0x670   :  { %v1211_v61 = vsel %vm473_vm3, %v1131_v60, -inf }
 0x671   :  { %1212 = vmax.xlane.f32.xlu0 %v1211_v61  ;;  %v7008_v62 = vpop.f32.mrf.mxu0 }
 0x673   :  { %v1207_v63 = vpop.f32.mrf.mxu0 }
 0x674   :  { %v1214_v0 = vsel %vm473_vm3, %v1207_v63, -inf }
 0x675   :  { %1215 = vmax.xlane.f32.xlu1 %v1214_v0  ;;  %v7013_v1 = vpop.f32.mrf.mxu0 }
 0x6fa   :  { %v1213_v2 = vpop.xlane.xlu0 %1212 }
 0x6fb   :  { %v1217_v3 = vsub.f32 %v1131_v60, %v1213_v2 }
 0x6fd   :  { %v1219_v4 = vmul.f32 1.442695, %v1217_v3 }
 0x6fe   :  { %v1216_v5 = vpop.xlane.xlu1 %1215 }
 0x6ff   :  { %7506 = vpow2.f32 %v1219_v4  ;;  %v1218_v6 = vsub.f32 %v1207_v63, %v1216_v5 }
 0x701   :  { %v1221_v7 = vmul.f32 1.442695, %v1218_v6 }
 0x703   :  { %7508 = vpow2.f32 %v1221_v7 }
 0x70c   :  { %v7507_v10 = vpop.eup %7506 }
 0x70d   :  { %v1223_v11 = vsel %vm473_vm3, %v7507_v10, 0.0 }
 0x70e   :  { %1224 = vadd.xlane.f32.xlu0 %v1223_v11 }
 0x710   :  { %v7509_v12 = vpop.eup %7508 }
 0x711   :  { %v1226_v13 = vsel %vm473_vm3, %v7509_v12, 0.0 }
 0x712   :  { %1227 = vadd.xlane.f32.xlu1 %v1226_v13 }
 0x797   :  { %v1225_v15 = vpop.xlane.xlu0 %1224 }
 0x798   :  { %7510 = vrcp.f32 %v1225_v15 }
 0x79b   :  { %v1228_v16 = vpop.xlane.xlu1 %1227 }
 0x79c   :  { %7512 = vrcp.f32 %v1228_v16 }
 0x7a5   :  { %v7511_v17 = vpop.eup %7510 }
 0x7a6   :  { %v1231_v18 = vmul.f32 %v7511_v17, %v7507_v10 }
 0x7a8   :  { %7017 = vmatmul.mubr.msk.f32.vlgmr.msra.gmra.mxu1 %vm473_vm3, %v1231_v18 }
 0x7a9   :  { %v7513_v19 = vpop.eup %7512  ;;  %7025 = vmatpush3.msra.mxu1 %v6370_v25  ;;  %v6426_v25 = vld [vmem:[%s8758_s5 + $0x70] sm:$0xff] }
 0x7aa   :  { %v1232_v20 = vmul.f32 %v7513_v19, %v7509_v12  ;;  %7034 = vmatprep.subr.mxu1 %v6378_v26 }
 0x7ac   :  { %7022 = vmatmul.mubr.msk.f32.vlgmr.msra.gmra.mxu0 %vm473_vm3, %v1232_v20 }
 0x7ad   :  { %7031 = vmatprep.mubr.msk.f32.mxu0 %vm473_vm3, %v7883_v38  ;;  %7030 = vmatpush3.msra.mxu0 %v794_v14  ;;  %v6388_v38 = vld [vmem:[%s8719_s8 + $0x2] ss:$0 sm:$0xff]  ;;  %v6411_v14 = vld [vmem:[%s8754_s24 + $0x78] sm:$0xff] }
 0x7ae   :  { %7045 = vmatprep.subr.mxu0 %v6386_v21 }
 0x7b0   :  { %7032 = vmatmul.mubr.msk.f32.vlgmr.msra.gmra.mxu0 %vm473_vm3, %v7885_v41 }
 0x7b1   :  { %7046 = vmatpush3.msra.mxu0 %v6386_v21  ;;  %7053 = vmatprep.mubr.msk.f32.mxu0 %vm165_vm1, %v7761_v39  ;;  %v6410_v21 = vld [vmem:[%s8754_s24 + $0x70] sm:$0xff] }
 0x7b2   :  { %7047 = vmatprep.subr.mxu0 %v6385_v22 }
 0x7b3   :  { %7048 = vmatpush3.msra.mxu0 %v6385_v22  ;;  %v6409_v22 = vld [vmem:[%s8754_s24 + $0x68] sm:$0xff] }
 0x7b4   :  { %7049 = vmatprep.subr.mxu0 %v6384_v23 }
 0x7b5   :  { %7050 = vmatpush3.msra.mxu0 %v6384_v23  ;;  %v6408_v23 = vld [vmem:[%s8754_s24 + $0x60] sm:$0xff] }
 0x7b6   :  { %7051 = vmatprep.subr.mxu0 %v6383_v24 }
 0x7b7   :  { %7052 = vmatpush3.msra.mxu0 %v6383_v24  ;;  %v6427_v24 = vld [vmem:[%s8758_s5 + $0x78] sm:$0xff] }
 0x7b8   :  { %7054 = vmatmul.mubr.msk.f32.vlgmr.msra.gmra.mxu0 %vm165_vm1, %v7765_v42  ;;  %7067 = vmatprep.subr.mxu0 %v7586_v50 }
 0x7b9   :  { %7069 = vmatprep.mubr.msk.f32.mxu0 %vm7587_vm2, %v7586_v50 }
 0x868   :  { %v1302_v27 = vpop.f32.mrf.mxu1 }
 0x869   :  { %7026 = vmatprep.mubr.msk.f32.mxu1 %vm473_vm3, %v1302_v27  ;;  %v6424_v27 = vld [vmem:[%s8758_s5 + $0x60] sm:$0xff] }
 0x86a   :  { %v7018_v28 = vpop.f32.mrf.mxu1 }
 0x86b   :  { %v6405_v28 = vld [vmem:[%s8722_s11 + $0x10] sm:$0xff] }
 0x86c   :  { %v1375_v29 = vpop.f32.mrf.mxu0 }
 0x86d   :  { %7027 = vmatmul.mubr.msk.f32.vlgmr.msra.gmra.mxu1 %vm473_vm3, %v1375_v29  ;;  %v6419_v29 = vld [vmem:[%s8755_s28 + $0x78] sm:$0xff] }
 0x86e   :  { %7035 = vmatpush3.msra.mxu1 %v6378_v26  ;;  %v7023_v31 = vpop.f32.mrf.mxu0  ;;  %7042 = vmatprep.mubr.msk.f32.mxu1 %vm165_vm1, %v7761_v39  ;;  %v6425_v26 = vld [vmem:[%s8758_s5 + $0x68] sm:$0xff] }
 0x86f   :  { %7036 = vmatprep.subr.mxu1 %v6377_v30 }
 0x870   :  { %7037 = vmatpush3.msra.mxu1 %v6377_v30  ;;  %v7957_v34 = vpop.f32.mrf.mxu0 }
 0x871   :  { %7038 = vmatprep.subr.mxu1 %v6376_v32 }
 0x872   :  { %7039 = vmatpush3.msra.mxu1 %v6376_v32  ;;  %v7967_v37 = vpop.f32.mrf.mxu0 }
 0x873   :  { %7040 = vmatprep.subr.mxu1 %v6375_v33 }
 0x874   :  { %7041 = vmatpush3.msra.mxu1 %v6375_v33  ;;  %v6418_v33 = vld [vmem:[%s8755_s28 + $0x70] sm:$0xff] }
 0x875   :  { %7043 = vmatmul.mubr.msk.f32.vlgmr.msra.gmra.mxu1 %vm165_vm1, %v7765_v42  ;;  %7056 = vmatprep.subr.mxu1 %v6394_v35 }
 0x876   :  { %7057 = vmatpush3.msra.mxu1 %v6394_v35  ;;  %7064 = vmatprep.mubr.msk.f32.mxu1 %vm165_vm1, %v7761_v39 }
 0x877   :  { %7058 = vmatprep.subr.mxu1 %v6393_v36 }
 0x878   :  { %v7055_v41 = vpop.f32.mrf.mxu0  ;;  %7059 = vmatpush3.msra.mxu1 %v6393_v36  ;;  %v6417_v36 = vld [vmem:[%s8755_s28 + $0x68] sm:$0xff] }
 0x879   :  { %v1716_v44 = vadd.f32 %v7055_v41, %v6388_v38  ;;  %7060 = vmatprep.subr.mxu1 %v6392_v40  ;;  %v6429_v41 = vld [vmem:[%s8721_s10 + $0x3] ss:$0 sm:$0xff] }
 0x87a   :  { %v1710_v45 = vpop.f32.mrf.mxu0  ;;  %7061 = vmatpush3.msra.mxu1 %v6392_v40 }
 0x87b   :  { %v1711_v46 = vadd.f32 %v6388_v38, %v1710_v45  ;;  %7062 = vmatprep.subr.mxu1 %v6391_v43  ;;  %v6416_v38 = vld [vmem:[%s8755_s28 + $0x60] sm:$0xff] }
 0x87c   :  { %7063 = vmatpush3.msra.mxu1 %v6391_v43 }
 0x87d   :  { %7065 = vmatmul.mubr.msk.f32.vlgmr.msra.gmra.mxu1 %vm165_vm1, %v7765_v42  ;;  %7068 = vmatpush3.xpose.msk.msra.mxu0 %vm473_vm3, %v1711_v46 }
 0x87e   :  { %7072 = vmatprep.subr.mxu0 %v7586_v50  ;;  %7077 = vmatprep.subr.mxu1 %v7586_v50 }
 0x87f   :  { %7079 = vmatprep.mubr.msk.f32.mxu1 %vm7587_vm2, %v7586_v50 }
 0x92d   :  { %v7987_v47 = vpop.f32.mrf.mxu1 }
 0x92f   :  { %v7989_v48 = vpop.f32.mrf.mxu1 }
 0x935   :  { %v7044_v49 = vpop.f32.mrf.mxu1 }
 0x936   :  { %v1628_v55 = vadd.f32 %v7044_v49, %v6380_v51  ;;  %v1540_v49 = vadd.f32 %v7957_v34, %v7987_v47  ;;  %v6413_v34 = vld [vmem:[%s8720_s6 + $0x3] ss:$0 sm:$0xff] }
 0x937   :  { %v1622_v52 = vpop.f32.mrf.mxu1 }
 0x938   :  { %v1623_v53 = vadd.f32 %v6380_v51, %v1622_v52  ;;  %v1535_v51 = vadd.f32 %v7967_v37, %v7989_v48 }
 0x93a   :  { %7070 = vmatmul.mubr.msk.f32.vlgmr.msra.gmra.mxu0 %vm473_vm3, %v1623_v53 }
 0x93b   :  { %7073 = vmatpush3.xpose.msk.msra.mxu0 %vm473_vm3, %v1716_v44  ;;  %7074 = vmatprep.mubr.msk.f32.mxu0 %vm7587_vm2, %v7586_v50 }
 0x93c   :  { %7082 = vmatprep.subr.mxu0 %v7586_v50 }
 0x93d   :  { %v7066_v56 = vpop.f32.mrf.mxu1 }
 0x93e   :  { %v1804_v57 = vadd.f32 %v7066_v56, %v6396_v54  ;;  %7075 = vmatmul.mubr.msk.f32.vlgmr.msra.gmra.mxu0 %vm473_vm3, %v1628_v55  ;;  %v6421_v56 = vld [vmem:[%s8719_s8 + $0x3] ss:$0 sm:$0xff] }
 0x93f   :  { %v1798_v58 = vpop.f32.mrf.mxu1  ;;  %7084 = vmatprep.mubr.msk.f32.mxu0 %vm7587_vm2, %v7586_v50 }
 0x940   :  { %v1799_v59 = vadd.f32 %v6396_v54, %v1798_v58  ;;  %7083 = vmatpush3.msra.mxu0 %v1804_v57 }
 0x941   :  { %7092 = vmatprep.subr.mxu0 %v6411_v14 }
 0x942   :  { %7078 = vmatpush3.msra.mxu1 %v1799_v59 }
 0x943   :  { %7087 = vmatprep.subr.mxu1 %v6405_v28 }
 0x9fa   :  { %v1879_v60 = vpop.f32.mrf.mxu0 }
 0x9fb   :  { %v1959_v61 = vsel %vm473_vm3, %v1879_v60, -inf }
 0x9fc   :  { %1960 = vmax.xlane.f32.xlu0 %v1959_v61  ;;  %v7071_v62 = vpop.f32.mrf.mxu0 }
 0x9fe   :  { %v1955_v63 = vpop.f32.mrf.mxu0 }
 0x9ff   :  { %v1962_v0 = vsel %vm473_vm3, %v1955_v63, -inf }
 0xa00   :  { %1963 = vmax.xlane.f32.xlu1 %v1962_v0  ;;  %v7076_v1 = vpop.f32.mrf.mxu0 }
 0xa85   :  { %v1961_v2 = vpop.xlane.xlu0 %1960 }
 0xa86   :  { %v1965_v3 = vsub.f32 %v1879_v60, %v1961_v2 }
 0xa88   :  { %v1967_v4 = vmul.f32 1.442695, %v1965_v3 }
 0xa89   :  { %v1964_v5 = vpop.xlane.xlu1 %1963 }
 0xa8a   :  { %7514 = vpow2.f32 %v1967_v4  ;;  %v1966_v6 = vsub.f32 %v1955_v63, %v1964_v5 }
 0xa8c   :  { %v1969_v7 = vmul.f32 1.442695, %v1966_v6 }
 0xa8e   :  { %7516 = vpow2.f32 %v1969_v7 }
 0xa97   :  { %v7515_v10 = vpop.eup %7514 }
 0xa98   :  { %v1971_v11 = vsel %vm473_vm3, %v7515_v10, 0.0 }
 0xa99   :  { %1972 = vadd.xlane.f32.xlu0 %v1971_v11 }
 0xa9b   :  { %v7517_v12 = vpop.eup %7516 }
 0xa9c   :  { %v1974_v13 = vsel %vm473_vm3, %v7517_v12, 0.0 }
 0xa9d   :  { %1975 = vadd.xlane.f32.xlu1 %v1974_v13 }
 0xb22   :  { %v1973_v15 = vpop.xlane.xlu0 %1972 }
 0xb23   :  { %7518 = vrcp.f32 %v1973_v15 }
 0xb26   :  { %v1976_v16 = vpop.xlane.xlu1 %1975 }
 0xb27   :  { %7520 = vrcp.f32 %v1976_v16 }
 0xb30   :  { %v7519_v17 = vpop.eup %7518 }
 0xb31   :  { %v1979_v18 = vmul.f32 %v7519_v17, %v7515_v10 }
 0xb33   :  { %7080 = vmatmul.mubr.msk.f32.vlgmr.msra.gmra.mxu1 %vm473_vm3, %v1979_v18 }
 0xb34   :  { %v7521_v19 = vpop.eup %7520  ;;  %7088 = vmatpush3.msra.mxu1 %v6405_v28 }
 0xb35   :  { %v1980_v20 = vmul.f32 %v7521_v19, %v7517_v12  ;;  %7103 = vmatprep.subr.mxu1 %v6419_v29  ;;  %v6438_v19 = vld [vmem:[%s8722_s11 + $0x18] sm:$0xff] }
 0xb37   :  { %7085 = vmatmul.mubr.msk.f32.vlgmr.msra.gmra.mxu0 %vm473_vm3, %v1980_v20 }
 0xb38   :  { %7093 = vmatpush3.msra.mxu0 %v6411_v14  ;;  %7100 = vmatprep.mubr.msk.f32.mxu0 %vm165_vm1, %v7761_v39 }
 0xb39   :  { %7094 = vmatprep.subr.mxu0 %v6410_v21 }
 0xb3a   :  { %7095 = vmatpush3.msra.mxu0 %v6410_v21 }
 0xb3b   :  { %7096 = vmatprep.subr.mxu0 %v6409_v22 }
 0xb3c   :  { %7097 = vmatpush3.msra.mxu0 %v6409_v22 }
 0xb3d   :  { %7098 = vmatprep.subr.mxu0 %v6408_v23 }
 0xb3e   :  { %7099 = vmatpush3.msra.mxu0 %v6408_v23 }
 0xb3f   :  { %7101 = vmatmul.mubr.msk.f32.vlgmr.msra.gmra.mxu0 %vm165_vm1, %v7765_v42  ;;  %7114 = vmatprep.subr.mxu0 %v6427_v24 }
 0xb40   :  { %7115 = vmatpush3.msra.mxu0 %v6427_v24  ;;  %7122 = vmatprep.mubr.msk.f32.mxu0 %vm165_vm1, %v7761_v39 }
 0xb41   :  { %7116 = vmatprep.subr.mxu0 %v6426_v25 }
 0xb42   :  { %7117 = vmatpush3.msra.mxu0 %v6426_v25 }
 0xb43   :  { %7118 = vmatprep.subr.mxu0 %v6425_v26 }
 0xb44   :  { %7119 = vmatpush3.msra.mxu0 %v6425_v26  ;;  %v6441_v26 = vld [vmem:[%s8723_s12] ss:$0 sm:$0xff] }
 0xb45   :  { %7120 = vmatprep.subr.mxu0 %v6424_v27 }
 0xb46   :  { %7121 = vmatpush3.msra.mxu0 %v6424_v27 }
 0xb47   :  { %7123 = vmatmul.mubr.msk.f32.vlgmr.msra.gmra.mxu0 %vm165_vm1, %v7765_v42  ;;  %7135 = vmatprep.subr.mxu0 %v7586_v50 }
 0xb48   :  { %7137 = vmatprep.mubr.msk.f32.mxu0 %vm7587_vm2, %v7586_v50 }
 0xbf3   :  { %v2050_v30 = vpop.f32.mrf.mxu1 }
 0xbf4   :  { %7089 = vmatprep.mubr.msk.f32.mxu1 %vm473_vm3, %v2050_v30 }
 0xbf5   :  { %v7081_v31 = vpop.f32.mrf.mxu1 }
 0xbf7   :  { %v2123_v32 = vpop.f32.mrf.mxu0 }
 0xbf8   :  { %7090 = vmatmul.mubr.msk.f32.vlgmr.msra.gmra.mxu1 %vm473_vm3, %v2123_v32 }
 0xbf9   :  { %7104 = vmatpush3.msra.mxu1 %v6419_v29  ;;  %v7086_v35 = vpop.f32.mrf.mxu0  ;;  %7111 = vmatprep.mubr.msk.f32.mxu1 %vm165_vm1, %v7761_v39 }
 0xbfa   :  { %7105 = vmatprep.subr.mxu1 %v6418_v33 }
 0xbfb   :  { %7106 = vmatpush3.msra.mxu1 %v6418_v33 }
 0xbfc   :  { %7107 = vmatprep.subr.mxu1 %v6417_v36 }
 0xbfd   :  { %7108 = vmatpush3.msra.mxu1 %v6417_v36 }
 0xbfe   :  { %7109 = vmatprep.subr.mxu1 %v6416_v38 }
 0xbff   :  { %7110 = vmatpush3.msra.mxu1 %v6416_v38  ;;  %v7102_v39 = vpop.f32.mrf.mxu0 }
 0xc00   :  { %7112 = vmatmul.mubr.msk.f32.vlgmr.msra.gmra.mxu1 %vm165_vm1, %v7765_v42  ;;  %7125 = vmatprep.subr.mxu1 %v7586_v50  ;;  %v2297_v48 = vadd.f32 %v7102_v39, %v6413_v34 }
 0xc01   :  { %7127 = vmatprep.mubr.msk.f32.mxu1 %vm7587_vm2, %v7586_v50  ;;  %v2291_v40 = vpop.f32.mrf.mxu0 }
 0xc02   :  { %v2292_v47 = vadd.f32 %v6413_v34, %v2291_v40  ;;  %v6442_v34 = vld [vmem:[%s8725_s13] ss:$0 sm:$0xff] }
 0xc07   :  { %v7124_v43 = vpop.f32.mrf.mxu0 }
 0xc08   :  { %v2473_v44 = vadd.f32 %v7124_v43, %v6429_v41 }
 0xc09   :  { %v2467_v45 = vpop.f32.mrf.mxu0 }
 0xc0a   :  { %v2468_v46 = vadd.f32 %v6429_v41, %v2467_v45 }
 0xc0c   :  { %7136 = vmatpush3.msra.mxu0 %v2468_v46  ;;  %v2939_v46 = vld [vmem:[%s8724_s15 + $0x18] sm:$0xff] }
 0xc0d   :  { %7145 = vmatprep.subr.mxu0 %v6438_v19 }
 0xcb8   :  { %v7091_v42 = vpop.f32.mrf.mxu1 }
 0xcb9   :  { %v8077_v52 = vadd.f32 %v7091_v42, %v1540_v49  ;;  %v2938_v49 = vld [vmem:[%s8724_s15 + $0x10] sm:$0xff]  ;;  %v2937_v42 = vld [vmem:[%s8724_s15 + $0x8] sm:$0xff] }
 0xcba   :  { %v2201_v53 = vpop.f32.mrf.mxu1 }
 0xcbb   :  { %v8079_v54 = vadd.f32 %v2201_v53, %v1535_v51  ;;  %v2936_v51 = vld [vmem:[%s8724_s15] sm:$0xff] }
 0xcc0   :  { %v7113_v55 = vpop.f32.mrf.mxu1 }
 0xcc1   :  { %v2385_v37 = vadd.f32 %v7113_v55, %v6421_v56 }
 0xcc2   :  { %v2379_v57 = vpop.f32.mrf.mxu1 }
 0xcc3   :  { %v2380_v58 = vadd.f32 %v6421_v56, %v2379_v57 }
 0xcc5   :  { %7126 = vmatpush3.xpose.msk.msra.mxu1 %vm473_vm3, %v2380_v58 }
 0xcc6   :  { %7130 = vmatprep.subr.mxu1 %v7586_v50 }
 0xcc8   :  { %7128 = vmatmul.mubr.msk.f32.vlgmr.msra.gmra.mxu1 %vm473_vm3, %v2292_v47 }
 0xcc9   :  { %7131 = vmatpush3.xpose.msk.msra.mxu1 %vm473_vm3, %v2385_v37  ;;  %7132 = vmatprep.mubr.msk.f32.mxu1 %vm7587_vm2, %v7586_v50 }
 0xcca   :  { %7140 = vmatprep.subr.mxu1 %v7586_v50 }
 0xccc   :  { %7133 = vmatmul.mubr.msk.f32.vlgmr.msra.gmra.mxu1 %vm473_vm3, %v2297_v48 }
 0xccd   :  { %7141 = vmatpush3.msra.mxu1 %v2473_v44  ;;  %7142 = vmatprep.mubr.msk.f32.mxu1 %vm7587_vm2, %v7586_v50 }
 0xcce   :  { %7150 = vmatprep.subr.mxu1 %v2939_v46 }
 0xd88   :  { %v2548_v59 = vpop.f32.mrf.mxu1 }
 0xd89   :  { %v2628_v60 = vsel %vm473_vm3, %v2548_v59, -inf }
 0xd8a   :  { %2629 = vmax.xlane.f32.xlu0 %v2628_v60  ;;  %v7129_v61 = vpop.f32.mrf.mxu1  ;;  %v6443_v60 = vld [vmem:[%s8726_s14] ss:$0 sm:$0xff] }
 0xd8c   :  { %v2624_v62 = vpop.f32.mrf.mxu1 }
 0xd8d   :  { %v2631_v63 = vsel %vm473_vm3, %v2624_v62, -inf }
 0xd8e   :  { %2632 = vmax.xlane.f32.xlu1 %v2631_v63  ;;  %v7134_v0 = vpop.f32.mrf.mxu1 }
 0xd8f   :  { %v3061_v0 = vld [vmem:[%s8727_s17 + $0x78] sm:$0xff] }
 0xe13   :  { %v2630_v1 = vpop.xlane.xlu0 %2629 }
 0xe14   :  { %v2634_v2 = vsub.f32 %v2548_v59, %v2630_v1  ;;  %v3060_v1 = vld [vmem:[%s8727_s17 + $0x70] sm:$0xff] }
 0xe16   :  { %v2636_v3 = vmul.f32 1.442695, %v2634_v2  ;;  %v3059_v2 = vld [vmem:[%s8727_s17 + $0x68] sm:$0xff] }
 0xe17   :  { %v2633_v4 = vpop.xlane.xlu1 %2632 }
 0xe18   :  { %7522 = vpow2.f32 %v2636_v3  ;;  %v2635_v5 = vsub.f32 %v2624_v62, %v2633_v4  ;;  %v3058_v3 = vld [vmem:[%s8727_s17 + $0x60] sm:$0xff]  ;;  %v3057_v4 = vld [vmem:[%s8727_s17 + $0x58] sm:$0xff] }
 0xe1a   :  { %v2638_v6 = vmul.f32 1.442695, %v2635_v5  ;;  %v3056_v5 = vld [vmem:[%s8727_s17 + $0x50] sm:$0xff] }
 0xe1c   :  { %7524 = vpow2.f32 %v2638_v6  ;;  %v3055_v6 = vld [vmem:[%s8727_s17 + $0x48] sm:$0xff] }
 0xe25   :  { %v7523_v7 = vpop.eup %7522 }
 0xe26   :  { %v2640_v10 = vsel %vm473_vm3, %v7523_v7, 0.0 }
 0xe27   :  { %2641 = vadd.xlane.f32.xlu0 %v2640_v10  ;;  %v3053_v10 = vld [vmem:[%s8727_s17 + $0x38] sm:$0xff] }
 0xe29   :  { %v7525_v11 = vpop.eup %7524 }
 0xe2a   :  { %v2643_v12 = vsel %vm473_vm3, %v7525_v11, 0.0 }
 0xe2b   :  { %2644 = vadd.xlane.f32.xlu1 %v2643_v12  ;;  %v3051_v12 = vld [vmem:[%s8727_s17 + $0x28] sm:$0xff] }
 0xeb0   :  { %v2642_v13 = vpop.xlane.xlu0 %2641 }
 0xeb1   :  { %7526 = vrcp.f32 %v2642_v13  ;;  %v3050_v13 = vld [vmem:[%s8727_s17 + $0x20] sm:$0xff] }
 0xeb4   :  { %v2645_v14 = vpop.xlane.xlu1 %2644 }
 0xeb5   :  { %7528 = vrcp.f32 %v2645_v14  ;;  %v3049_v14 = vld [vmem:[%s8727_s17 + $0x18] sm:$0xff] }
 0xebe   :  { %v7527_v15 = vpop.eup %7526 }
 0xebf   :  { %v2648_v16 = vmul.f32 %v7527_v15, %v7523_v7  ;;  %v3054_v7 = vld [vmem:[%s8727_s17 + $0x40] sm:$0xff]  ;;  %v3048_v15 = vld [vmem:[%s8727_s17 + $0x10] sm:$0xff] }
 0xec1   :  { %7138 = vmatmul.mubr.msk.f32.vlgmr.msra.gmra.mxu0 %vm473_vm3, %v2648_v16  ;;  %v3047_v16 = vld [vmem:[%s8727_s17 + $0x8] sm:$0xff] }
 0xec2   :  { %v7529_v17 = vpop.eup %7528  ;;  %7146 = vmatpush3.msra.mxu0 %v6438_v19 }
 0xec3   :  { %v2649_v18 = vmul.f32 %v7529_v17, %v7525_v11  ;;  %7161 = vmatprep.subr.mxu0 %v3061_v0  ;;  %v3052_v11 = vld [vmem:[%s8727_s17 + $0x30] sm:$0xff]  ;;  %v3046_v17 = vld [vmem:[%s8727_s17] sm:$0xff] }
 0xec5   :  { %7143 = vmatmul.mubr.msk.f32.vlgmr.msra.gmra.mxu1 %vm473_vm3, %v2649_v18  ;;  %v6444_v18 = vld [vmem:[%s8728_s16] ss:$0 sm:$0xff] }
 0xec6   :  { %7151 = vmatpush3.msra.mxu1 %v2939_v46 }
 0xec7   :  { %7152 = vmatprep.subr.mxu1 %v2938_v49 }
 0xec8   :  { %7153 = vmatpush3.msra.mxu1 %v2938_v49 }
 0xec9   :  { %7154 = vmatprep.subr.mxu1 %v2937_v42 }
 0xeca   :  { %7155 = vmatpush3.msra.mxu1 %v2937_v42 }
 0xecb   :  { %7156 = vmatprep.subr.mxu1 %v2936_v51 }
 0xecc   :  { %7157 = vmatpush3.msra.mxu1 %v2936_v51 }
 0xf81   :  { %v2719_v20 = vpop.f32.mrf.mxu0 }
 0xf82   :  { %7147 = vmatprep.mubr.msk.f32.mxu0 %vm473_vm3, %v2719_v20 }
 0xf83   :  { %v7139_v21 = vpop.f32.mrf.mxu0 }
 0xf85   :  { %v2792_v22 = vpop.f32.mrf.mxu1 }
 0xf86   :  { %7148 = vmatmul.mubr.msk.f32.vlgmr.msra.gmra.mxu0 %vm473_vm3, %v2792_v22 }
 0xf87   :  { %v7144_v23 = vpop.f32.mrf.mxu1  ;;  %7162 = vmatpush3.msra.mxu0 %v3061_v0 }
 0xf88   :  { %7163 = vmatprep.subr.mxu0 %v3060_v1 }
 0xf89   :  { %7164 = vmatpush3.msra.mxu0 %v3060_v1 }
 0xf8a   :  { %7165 = vmatprep.subr.mxu0 %v3059_v2 }
 0xf8b   :  { %7166 = vmatpush3.msra.mxu0 %v3059_v2 }
 0xf8c   :  { %7167 = vmatprep.subr.mxu0 %v3058_v3 }
 0xf8d   :  { %7168 = vmatpush3.msra.mxu0 %v3058_v3 }
 0xf8e   :  { %7169 = vmatprep.subr.mxu0 %v3057_v4 }
 0xf8f   :  { %7170 = vmatpush3.msra.mxu0 %v3057_v4 }
 0xf90   :  { %7171 = vmatprep.subr.mxu0 %v3056_v5 }
 0xf91   :  { %7172 = vmatpush3.msra.mxu0 %v3056_v5 }
 0xf92   :  { %7173 = vmatprep.subr.mxu0 %v3055_v6 }
 0xf93   :  { %7174 = vmatpush3.msra.mxu0 %v3055_v6 }
 0xf94   :  { %7175 = vmatprep.subr.mxu0 %v3054_v7 }
 0xf95   :  { %7176 = vmatpush3.msra.mxu0 %v3054_v7  ;;  %v6450_v7 = vld [vmem:[%s8756_s1 + $0x1] ss:$0 sm:$0xff] }
 0xf96   :  { %7177 = vmatprep.subr.mxu0 %v3053_v10 }
 0xf97   :  { %7178 = vmatpush3.msra.mxu0 %v3053_v10 }
 0xf98   :  { %7179 = vmatprep.subr.mxu0 %v3052_v11 }
 0xf99   :  { %7180 = vmatpush3.msra.mxu0 %v3052_v11 }
 0xf9a   :  { %7181 = vmatprep.subr.mxu0 %v3051_v12 }
 0xf9b   :  { %7182 = vmatpush3.msra.mxu0 %v3051_v12 }
 0xf9c   :  { %7183 = vmatprep.subr.mxu0 %v3050_v13 }
 0xf9d   :  { %7184 = vmatpush3.msra.mxu0 %v3050_v13 }
 0xf9e   :  { %7185 = vmatprep.subr.mxu0 %v3049_v14 }
 0xf9f   :  { %7186 = vmatpush3.msra.mxu0 %v3049_v14  ;;  %v6451_v14 = vld [vmem:[%s8757_s25 + $0x1] ss:$0 sm:$0xff] }
 0xfa0   :  { %7187 = vmatprep.subr.mxu0 %v3048_v15 }
 0xfa1   :  { %7188 = vmatpush3.msra.mxu0 %v3048_v15 }
 0xfa2   :  { %7189 = vmatprep.subr.mxu0 %v3047_v16 }
 0xfa3   :  { %7190 = vmatpush3.msra.mxu0 %v3047_v16 }
 0xfa4   :  { %7191 = vmatprep.subr.mxu0 %v3046_v17 }
 0xfa5   :  { %7192 = vmatpush3.msra.mxu0 %v3046_v17 }
 0xfa6   :  { %7234 = vmatprep.subr.mxu0 %v7586_v50 }
0x1046   :  { %v7149_v24 = vpop.f32.mrf.mxu0 }
0x1047   :  { %v2880_v25 = vadd.f32 %v7149_v24, %v8077_v52 }
0x1048   :  { %v2870_v27 = vpop.f32.mrf.mxu0 }
0x1049   :  { %v2882_v28 = vadd.f32 %v2880_v25, %v7730_v9  ;;  %v2879_v29 = vadd.f32 %v2870_v27, %v8079_v54 }
0x104b   :  { %v8114_v30 = vadd.f32 %v6441_v26, %v2882_v28  ;;  %v2881_v31 = vadd.f32 %v2879_v29, %v7728_v8 }
0x104d   :  { %v8117_v32 = vadd.f32 %v6441_v26, %v2881_v31  ;;  %v2897_v33 = vsel %vm165_vm1, %v8114_v30, 0.0 }
0x104e   :  { %2898 = vadd.xlane.f32.xlu1 %v2897_v33 }
0x104f   :  { %v2894_v35 = vsel %vm165_vm1, %v8117_v32, 0.0 }
0x1050   :  { %2895 = vadd.xlane.f32.xlu0 %v2894_v35 }
0x10d7   :  { %v2899_v36 = vpop.xlane.xlu1 %2898 }
0x10d8   :  { %v2901_v38 = vmul.f32 0.03125, %v2899_v36 }
0x10d9   :  { %v2896_v39 = vpop.xlane.xlu0 %2895 }
0x10da   :  { %v2903_v9 = vsub.f32 %v8114_v30, %v2901_v38  ;;  %v2900_v40 = vmul.f32 0.03125, %v2896_v39 }
0x10dc   :  { %v2902_v41 = vsub.f32 %v8117_v32, %v2900_v40  ;;  %v2905_v43 = vmul.f32 %v2903_v9, %v2903_v9 }
0x10de   :  { %v2909_v8 = vsel %vm165_vm1, %v2905_v43, 0.0  ;;  %v2904_v44 = vmul.f32 %v2902_v41, %v2902_v41 }
0x10df   :  { %2910 = vadd.xlane.f32.xlu1 %v2909_v8 }
0x10e0   :  { %v2906_v45 = vsel %vm165_vm1, %v2904_v44, 0.0 }
0x10e1   :  { %2907 = vadd.xlane.f32.xlu0 %v2906_v45  ;;  %v6447_v45 = vld [vmem:[%s8729_s18] ss:$0 sm:$0xff] }
0x1168   :  { %v2911_v52 = vpop.xlane.xlu1 %2910 }
0x1169   :  { %v2913_v53 = vmul.f32 0.03125, %v2911_v52 }
0x116a   :  { %v2908_v54 = vpop.xlane.xlu0 %2907 }
0x116b   :  { %v2915_v55 = vadd.f32 1e-05, %v2913_v53  ;;  %v2912_v56 = vmul.f32 0.03125, %v2908_v54 }
0x116d   :  { %7530 = vrsqrt.f32 %v2915_v55  ;;  %v2914_v57 = vadd.f32 1e-05, %v2912_v56 }
0x116f   :  { %7532 = vrsqrt.f32 %v2914_v57 }
0x117a   :  { %v7531_v58 = vpop.eup %7530 }
0x117b   :  { %v2919_v47 = vmul.f32 %v7531_v58, %v2903_v9 }
0x117c   :  { %v7533_v37 = vpop.eup %7532 }
0x117d   :  { %v2918_v48 = vmul.f32 %v7533_v37, %v2902_v41  ;;  %v2927_v59 = vmul.f32 %v6442_v34, %v2919_v47 }
0x117f   :  { %v2926_v61 = vmul.f32 %v6442_v34, %v2918_v48  ;;  %v2935_v63 = vadd.f32 %v6443_v60, %v2927_v59  ;;  %v6455_v59 = vld [vmem:[%s8754_s24 + $0x98] sm:$0xff] }
0x1180   :  { %7196 = vmatprep.subr.mxu1 %v6455_v59 }
0x1181   :  { %v2934_v62 = vadd.f32 %v6443_v60, %v2926_v61  ;;  %v6454_v60 = vld [vmem:[%s8754_s24 + $0x90] sm:$0xff]  ;;  %v6453_v61 = vld [vmem:[%s8754_s24 + $0x88] sm:$0xff] }
0x1183   :  { %7158 = vmatprep.mubr.msk.f32.mxu1 %vm165_vm1, %v2934_v62  ;;  %v6452_v62 = vld [vmem:[%s8754_s24 + $0x80] sm:$0xff] }
0x1184   :  { %7159 = vmatmul.mubr.msk.f32.vlgmr.msra.gmra.mxu1 %vm165_vm1, %v2935_v63  ;;  %v6463_v63 = vld [vmem:[%s8755_s28 + $0x98] sm:$0xff] }
0x1185   :  { %7197 = vmatpush3.msra.mxu1 %v6455_v59 }
0x1186   :  { %7198 = vmatprep.subr.mxu1 %v6454_v60 }
0x1187   :  { %7199 = vmatpush3.msra.mxu1 %v6454_v60 }
0x1188   :  { %7200 = vmatprep.subr.mxu1 %v6453_v61 }
0x1189   :  { %7201 = vmatpush3.msra.mxu1 %v6453_v61 }
0x118a   :  { %7202 = vmatprep.subr.mxu1 %v6452_v62 }
0x118b   :  { %7203 = vmatpush3.msra.mxu1 %v6452_v62 }
0x118c   :  { %7207 = vmatprep.subr.mxu1 %v6463_v63 }
0x1244   :  { %v7160_v19 = vpop.f32.mrf.mxu1 }
0x1245   :  { %v3025_v20 = vadd.f32 %v7160_v19, %v6444_v18  ;;  %v6461_v19 = vld [vmem:[%s8755_s28 + $0x88] sm:$0xff] }
0x1246   :  { %v3019_v21 = vpop.f32.mrf.mxu1 }
0x1247   :  { %v3031_v22 = vmul.f32 0.044715, %v3025_v20  ;;  %v3020_v23 = vadd.f32 %v6444_v18, %v3019_v21  ;;  %v3029_v41 = vmul.f32 0.5, %v3025_v20  ;;  %v6462_v18 = vld [vmem:[%s8755_s28 + $0x90] sm:$0xff]  ;;  %v6471_v21 = vld [vmem:[%s8758_s5 + $0x98] sm:$0xff] }
0x1249   :  { %v3033_v24 = vmul.f32 %v3031_v22, %v3025_v20  ;;  %v3030_v25 = vmul.f32 0.044715, %v3020_v23  ;;  %v3028_v9 = vmul.f32 0.5, %v3020_v23  ;;  %v6470_v22 = vld [vmem:[%s8758_s5 + $0x90] sm:$0xff] }
0x124b   :  { %v3035_v26 = vmul.f32 %v3033_v24, %v3025_v20  ;;  %v3032_v27 = vmul.f32 %v3030_v25, %v3020_v23  ;;  %v6468_v24 = vld [vmem:[%s8758_s5 + $0x80] sm:$0xff] }
0x124d   :  { %v3037_v28 = vadd.f32 %v3035_v26, %v3025_v20  ;;  %v3034_v29 = vmul.f32 %v3032_v27, %v3020_v23  ;;  %v6460_v20 = vld [vmem:[%s8755_s28 + $0x80] sm:$0xff] }
0x124e   :  { %v6465_v27 = vld [vmem:[%s8719_s8 + $0x4] ss:$0 sm:$0xff] }
0x124f   :  { %v3036_v31 = vadd.f32 %v3034_v29, %v3020_v23  ;;  %v3039_v33 = vmul.f32 0.7978846, %v3037_v28  ;;  %v6469_v23 = vld [vmem:[%s8758_s5 + $0x88] sm:$0xff]  ;;  %v6457_v29 = vld [vmem:[%s8720_s6 + $0x4] ss:$0 sm:$0xff] }
0x1251   :  { %v3038_v35 = vmul.f32 0.7978846, %v3036_v31  ;;  %7534 = vtanh.f32 %v3039_v33 }
0x1253   :  { %7536 = vtanh.f32 %v3038_v35 }
0x125e   :  { %v7535_v36 = vpop.eup %7534 }
0x125f   :  { %v3043_v39 = vadd.f32 1.0, %v7535_v36 }
0x1260   :  { %v7537_v38 = vpop.eup %7536 }
0x1261   :  { %v3042_v40 = vadd.f32 1.0, %v7537_v38  ;;  %v3045_v8 = vmul.f32 %v3043_v39, %v3029_v41  ;;  %v6473_v39 = vld [vmem:[%s8721_s10 + $0x4] ss:$0 sm:$0xff] }
0x1263   :  { %v3044_v43 = vmul.f32 %v3042_v40, %v3028_v9 }
0x1265   :  { %7193 = vmatprep.mubr.f32.mxu0 %v3044_v43 }
0x1266   :  { %7194 = vmatmul.mubr.f32.vlgmr.msra.gmra.mxu0 %v3045_v8 }
0x1267   :  { %7236 = vmatprep.mubr.msk.f32.mxu0 %vm7587_vm2, %v7586_v50 }
0x1326   :  { %v7195_v44 = vpop.f32.mrf.mxu0 }
0x1327   :  { %v3138_v46 = vadd.f32 %v7195_v44, %v8114_v30 }
0x1328   :  { %v3128_v49 = vpop.f32.mrf.mxu0 }
0x1329   :  { %v8205_v42 = vadd.f32 %v6447_v45, %v3138_v46  ;;  %v3137_v51 = vadd.f32 %v3128_v49, %v8117_v32 }
0x132b   :  { %v8208_v52 = vadd.f32 %v6447_v45, %v3137_v51  ;;  %v3155_v53 = vsel %vm165_vm1, %v8205_v42, 0.0 }
0x132c   :  { %3156 = vadd.xlane.f32.xlu1 %v3155_v53 }
0x132d   :  { %v3152_v54 = vsel %vm165_vm1, %v8208_v52, 0.0 }
0x132e   :  { %3153 = vadd.xlane.f32.xlu0 %v3152_v54 }
0x13b5   :  { %v3157_v55 = vpop.xlane.xlu1 %3156 }
0x13b6   :  { %v3159_v56 = vmul.f32 0.03125, %v3157_v55 }
0x13b7   :  { %v3154_v57 = vpop.xlane.xlu0 %3153 }
0x13b8   :  { %v3161_v30 = vsub.f32 %v8205_v42, %v3159_v56  ;;  %v3158_v58 = vmul.f32 0.03125, %v3154_v57 }
0x13ba   :  { %v3160_v34 = vsub.f32 %v8208_v52, %v3158_v58  ;;  %v3163_v47 = vmul.f32 %v3161_v30, %v3161_v30 }
0x13bc   :  { %v3167_v32 = vsel %vm165_vm1, %v3163_v47, 0.0  ;;  %v3162_v37 = vmul.f32 %v3160_v34, %v3160_v34 }
0x13bd   :  { %3168 = vadd.xlane.f32.xlu1 %v3167_v32 }
0x13be   :  { %v3164_v48 = vsel %vm165_vm1, %v3162_v37, 0.0  ;;  %v6494_v37 = vld [vmem:[%s8755_s28 + $0xb8] sm:$0xff] }
0x13bf   :  { %3165 = vadd.xlane.f32.xlu0 %v3164_v48  ;;  %v6486_v48 = vld [vmem:[%s8754_s24 + $0xb8] sm:$0xff] }
0x1446   :  { %v3169_v0 = vpop.xlane.xlu1 %3168 }
0x1447   :  { %v3171_v1 = vmul.f32 0.03125, %v3169_v0  ;;  %v6493_v0 = vld [vmem:[%s8755_s28 + $0xb0] sm:$0xff] }
0x1448   :  { %v3166_v2 = vpop.xlane.xlu0 %3165 }
0x1449   :  { %v3173_v3 = vadd.f32 1e-05, %v3171_v1  ;;  %v3170_v4 = vmul.f32 0.03125, %v3166_v2  ;;  %v6485_v2 = vld [vmem:[%s8754_s24 + $0xb0] sm:$0xff] }
0x144b   :  { %7538 = vrsqrt.f32 %v3173_v3  ;;  %v3172_v5 = vadd.f32 1e-05, %v3170_v4  ;;  %v6492_v3 = vld [vmem:[%s8755_s28 + $0xa8] sm:$0xff] }
0x144c   :  { %v6484_v4 = vld [vmem:[%s8754_s24 + $0xa8] sm:$0xff] }
0x144d   :  { %7540 = vrsqrt.f32 %v3172_v5  ;;  %v6491_v5 = vld [vmem:[%s8755_s28 + $0xa0] sm:$0xff] }
0x1458   :  { %v7539_v6 = vpop.eup %7538 }
0x1459   :  { %v3177_v10 = vmul.f32 %v7539_v6, %v3161_v30  ;;  %v6483_v6 = vld [vmem:[%s8754_s24 + $0xa0] sm:$0xff] }
0x145a   :  { %v7541_v11 = vpop.eup %7540 }
0x145b   :  { %v3176_v12 = vmul.f32 %v7541_v11, %v3160_v34  ;;  %v3185_v13 = vmul.f32 %v6450_v7, %v3177_v10  ;;  %v6501_v10 = vld [vmem:[%s8758_s5 + $0xb0] sm:$0xff]  ;;  %v6500_v11 = vld [vmem:[%s8758_s5 + $0xa8] sm:$0xff] }
0x145d   :  { %v3184_v15 = vmul.f32 %v6450_v7, %v3176_v12  ;;  %v8241_v17 = vadd.f32 %v6451_v14, %v3185_v13  ;;  %v6502_v7 = vld [vmem:[%s8758_s5 + $0xb8] sm:$0xff]  ;;  %v6499_v12 = vld [vmem:[%s8758_s5 + $0xa0] sm:$0xff] }
0x145f   :  { %v8239_v16 = vadd.f32 %v6451_v14, %v3184_v15 }
0x1461   :  { %7204 = vmatprep.mubr.msk.f32.mxu1 %vm165_vm1, %v8239_v16 }
0x1462   :  { %7205 = vmatmul.mubr.msk.f32.vlgmr.msra.gmra.mxu1 %vm165_vm1, %v8241_v17 }
0x1463   :  { %7208 = vmatpush3.msra.mxu1 %v6463_v63  ;;  %7215 = vmatprep.mubr.msk.f32.mxu1 %vm165_vm1, %v8239_v16 }
0x1464   :  { %7209 = vmatprep.subr.mxu1 %v6462_v18 }
0x1465   :  { %7210 = vmatpush3.msra.mxu1 %v6462_v18 }
0x1466   :  { %7211 = vmatprep.subr.mxu1 %v6461_v19 }
0x1467   :  { %7212 = vmatpush3.msra.mxu1 %v6461_v19 }
0x1468   :  { %7213 = vmatprep.subr.mxu1 %v6460_v20 }
0x1469   :  { %7214 = vmatpush3.msra.mxu1 %v6460_v20 }
0x146a   :  { %7216 = vmatmul.mubr.msk.f32.vlgmr.msra.gmra.mxu1 %vm165_vm1, %v8241_v17  ;;  %7218 = vmatprep.subr.mxu1 %v6471_v21 }
0x146b   :  { %7219 = vmatpush3.msra.mxu1 %v6471_v21  ;;  %7226 = vmatprep.mubr.msk.f32.mxu1 %vm165_vm1, %v8239_v16  ;;  %v6496_v21 = vld [vmem:[%s8719_s8 + $0x5] ss:$0 sm:$0xff] }
0x146c   :  { %7220 = vmatprep.subr.mxu1 %v6470_v22 }
0x146d   :  { %7221 = vmatpush3.msra.mxu1 %v6470_v22 }
0x146e   :  { %7222 = vmatprep.subr.mxu1 %v6469_v23 }
0x146f   :  { %7223 = vmatpush3.msra.mxu1 %v6469_v23  ;;  %v6488_v23 = vld [vmem:[%s8720_s6 + $0x5] ss:$0 sm:$0xff] }
0x1470   :  { %7224 = vmatprep.subr.mxu1 %v6468_v24 }
0x1471   :  { %7225 = vmatpush3.msra.mxu1 %v6468_v24 }
0x1472   :  { %7227 = vmatmul.mubr.msk.f32.vlgmr.msra.gmra.mxu1 %vm165_vm1, %v8241_v17  ;;  %7229 = vmatprep.subr.mxu1 %v7586_v50 }
0x1473   :  { %7231 = vmatprep.mubr.msk.f32.mxu1 %vm7587_vm2, %v7586_v50 }
0x1522   :  { %v7206_v25 = vpop.f32.mrf.mxu1 }
0x1523   :  { %v3285_v36 = vadd.f32 %v7206_v25, %v6457_v29 }
0x1524   :  { %v3279_v26 = vpop.f32.mrf.mxu1 }
0x1525   :  { %v3280_v38 = vadd.f32 %v6457_v29, %v3279_v26 }
0x152a   :  { %v7217_v28 = vpop.f32.mrf.mxu1 }
0x152b   :  { %v3373_v31 = vadd.f32 %v7217_v28, %v6465_v27  ;;  %v6504_v28 = vld [vmem:[%s8721_s10 + $0x5] ss:$0 sm:$0xff] }
0x152c   :  { %v3367_v33 = vpop.f32.mrf.mxu1 }
0x152d   :  { %v3368_v35 = vadd.f32 %v6465_v27, %v3367_v33  ;;  %7235 = vmatpush3.xpose.msk.msra.mxu0 %vm473_vm3, %v3373_v31 }
0x152e   :  { %7244 = vmatprep.subr.mxu0 %v7586_v50 }
0x152f   :  { %7230 = vmatpush3.xpose.msk.msra.mxu1 %vm473_vm3, %v3368_v35 }
0x1530   :  { %7237 = vmatmul.mubr.msk.f32.vlgmr.msra.gmra.mxu0 %vm473_vm3, %v3285_v36  ;;  %7239 = vmatprep.subr.mxu1 %v7586_v50 }
0x1531   :  { %7246 = vmatprep.mubr.msk.f32.mxu0 %vm7587_vm2, %v7586_v50 }
0x1532   :  { %v7228_v9 = vpop.f32.mrf.mxu1  ;;  %7232 = vmatmul.mubr.msk.f32.vlgmr.msra.gmra.mxu1 %vm473_vm3, %v3280_v38 }
0x1533   :  { %v3461_v40 = vadd.f32 %v7228_v9, %v6473_v39  ;;  %7241 = vmatprep.mubr.msk.f32.mxu1 %vm7587_vm2, %v7586_v50 }
0x1534   :  { %v3455_v41 = vpop.f32.mrf.mxu1 }
0x1535   :  { %v3456_v43 = vadd.f32 %v6473_v39, %v3455_v41  ;;  %7245 = vmatpush3.msra.mxu0 %v3461_v40 }
0x1536   :  { %7260 = vmatprep.subr.mxu0 %v6494_v37 }
0x1537   :  { %7240 = vmatpush3.msra.mxu1 %v3456_v43 }
0x1538   :  { %7249 = vmatprep.subr.mxu1 %v6486_v48 }
0x15f0   :  { %v3612_v8 = vpop.f32.mrf.mxu0 }
0x15f1   :  { %v3619_v44 = vsel %vm473_vm3, %v3612_v8, -inf }
0x15f2   :  { %3620 = vmax.xlane.f32.xlu0 %v3619_v44  ;;  %v3536_v45 = vpop.f32.mrf.mxu1  ;;  %v7238_v46 = vpop.f32.mrf.mxu0 }
0x15f3   :  { %v3616_v49 = vsel %vm473_vm3, %v3536_v45, -inf }
0x15f4   :  { %3617 = vmax.xlane.f32.xlu1 %v3616_v49  ;;  %v7233_v51 = vpop.f32.mrf.mxu1 }
0x167b   :  { %v3621_v53 = vpop.xlane.xlu0 %3620 }
0x167c   :  { %v3623_v54 = vsub.f32 %v3612_v8, %v3621_v53 }
0x167d   :  { %v3618_v55 = vpop.xlane.xlu1 %3617 }
0x167e   :  { %v3626_v56 = vmul.f32 1.442695, %v3623_v54  ;;  %v3622_v57 = vsub.f32 %v3536_v45, %v3618_v55 }
0x1680   :  { %7542 = vpow2.f32 %v3626_v56  ;;  %v3624_v30 = vmul.f32 1.442695, %v3622_v57  ;;  %v6482_v57 = vld [vmem:[%s8722_s11 + $0x20] sm:$0xff] }
0x1682   :  { %7544 = vpow2.f32 %v3624_v30 }
0x168d   :  { %v7543_v58 = vpop.eup %7542 }
0x168e   :  { %v3631_v34 = vsel %vm473_vm3, %v7543_v58, 0.0 }
0x168f   :  { %v7545_v47 = vpop.eup %7544  ;;  %3632 = vadd.xlane.f32.xlu0 %v3631_v34 }
0x1690   :  { %v3628_v32 = vsel %vm473_vm3, %v7545_v47, 0.0 }
0x1691   :  { %3629 = vadd.xlane.f32.xlu1 %v3628_v32 }
0x1718   :  { %v3633_v59 = vpop.xlane.xlu0 %3632 }
0x1719   :  { %7546 = vrcp.f32 %v3633_v59  ;;  %v6528_v59 = vld [vmem:[%s8755_s28 + $0xd0] sm:$0xff] }
0x171a   :  { %v3630_v60 = vpop.xlane.xlu1 %3629 }
0x171b   :  { %7548 = vrcp.f32 %v3630_v60  ;;  %v6527_v60 = vld [vmem:[%s8755_s28 + $0xc8] sm:$0xff] }
0x1726   :  { %v7547_v61 = vpop.eup %7546 }
0x1727   :  { %v3637_v62 = vmul.f32 %v7547_v61, %v7543_v58  ;;  %v6526_v61 = vld [vmem:[%s8755_s28 + $0xc0] sm:$0xff] }
0x1728   :  { %v7549_v63 = vpop.eup %7548 }
0x1729   :  { %7247 = vmatmul.mubr.msk.f32.vlgmr.msra.gmra.mxu0 %vm473_vm3, %v3637_v62  ;;  %v3636_v1 = vmul.f32 %v7549_v63, %v7545_v47  ;;  %v6513_v62 = vld [vmem:[%s8722_s11 + $0x28] sm:$0xff]  ;;  %v6521_v63 = vld [vmem:[%s8754_s24 + $0xd8] sm:$0xff] }
0x172a   :  { %7261 = vmatpush3.msra.mxu0 %v6494_v37  ;;  %7268 = vmatprep.mubr.msk.f32.mxu0 %vm165_vm1, %v8239_v16 }
0x172b   :  { %7262 = vmatprep.subr.mxu0 %v6493_v0  ;;  %7242 = vmatmul.mubr.msk.f32.vlgmr.msra.gmra.mxu1 %vm473_vm3, %v3636_v1 }
0x172c   :  { %7250 = vmatpush3.msra.mxu1 %v6486_v48  ;;  %7263 = vmatpush3.msra.mxu0 %v6493_v0  ;;  %v6529_v48 = vld [vmem:[%s8755_s28 + $0xd8] sm:$0xff] }
0x172d   :  { %7251 = vmatprep.subr.mxu1 %v6485_v2  ;;  %7257 = vmatprep.mubr.msk.f32.mxu1 %vm165_vm1, %v8239_v16 }
0x172e   :  { %7264 = vmatprep.subr.mxu0 %v6492_v3  ;;  %7252 = vmatpush3.msra.mxu1 %v6485_v2 }
0x172f   :  { %7265 = vmatpush3.msra.mxu0 %v6492_v3  ;;  %7253 = vmatprep.subr.mxu1 %v6484_v4  ;;  %v6520_v3 = vld [vmem:[%s8754_s24 + $0xd0] sm:$0xff] }
0x1730   :  { %7266 = vmatprep.subr.mxu0 %v6491_v5  ;;  %7254 = vmatpush3.msra.mxu1 %v6484_v4 }
0x1731   :  { %7267 = vmatpush3.msra.mxu0 %v6491_v5  ;;  %7255 = vmatprep.subr.mxu1 %v6483_v6  ;;  %v6519_v5 = vld [vmem:[%s8754_s24 + $0xc8] sm:$0xff] }
0x1732   :  { %7269 = vmatmul.mubr.msk.f32.vlgmr.msra.gmra.mxu0 %vm165_vm1, %v8241_v17  ;;  %7256 = vmatpush3.msra.mxu1 %v6483_v6  ;;  %v6518_v6 = vld [vmem:[%s8754_s24 + $0xc0] sm:$0xff] }
0x1733   :  { %7258 = vmatmul.mubr.msk.f32.vlgmr.msra.gmra.mxu1 %vm165_vm1, %v8241_v17  ;;  %7271 = vmatprep.subr.mxu1 %v6502_v7 }
0x1734   :  { %7272 = vmatpush3.msra.mxu1 %v6502_v7  ;;  %7279 = vmatprep.mubr.msk.f32.mxu1 %vm165_vm1, %v8239_v16 }
0x1735   :  { %7273 = vmatprep.subr.mxu1 %v6501_v10  ;;  %7282 = vmatprep.subr.mxu0 %v7586_v50 }
0x1736   :  { %7274 = vmatpush3.msra.mxu1 %v6501_v10  ;;  %7284 = vmatprep.mubr.msk.f32.mxu0 %vm7587_vm2, %v7586_v50  ;;  %v6537_v10 = vld [vmem:[%s8758_s5 + $0xd8] sm:$0xff] }
0x1737   :  { %7275 = vmatprep.subr.mxu1 %v6500_v11 }
0x1738   :  { %7276 = vmatpush3.msra.mxu1 %v6500_v11  ;;  %v6536_v11 = vld [vmem:[%s8758_s5 + $0xd0] sm:$0xff] }
0x1739   :  { %7277 = vmatprep.subr.mxu1 %v6499_v12 }
0x173a   :  { %7278 = vmatpush3.msra.mxu1 %v6499_v12 }
0x173b   :  { %7280 = vmatmul.mubr.msk.f32.vlgmr.msra.gmra.mxu1 %vm165_vm1, %v8241_v17  ;;  %7292 = vmatprep.subr.mxu1 %v7586_v50 }
0x173c   :  { %7294 = vmatprep.mubr.msk.f32.mxu1 %vm7587_vm2, %v7586_v50 }
0x17e9   :  { %v8358_v13 = vpop.f32.mrf.mxu0 }
0x17eb   :  { %v8360_v14 = vpop.f32.mrf.mxu1  ;;  %v7248_v15 = vpop.f32.mrf.mxu0 }
0x17ed   :  { %v7243_v18 = vpop.f32.mrf.mxu1 }
0x17ee   :  { %v6534_v18 = vld [vmem:[%s8758_s5 + $0xc0] sm:$0xff] }
0x17f2   :  { %v7270_v19 = vpop.f32.mrf.mxu0 }
0x17f3   :  { %v7259_v20 = vpop.f32.mrf.mxu1  ;;  %v3959_v27 = vadd.f32 %v7270_v19, %v6496_v21 }
0x17f4   :  { %v3953_v22 = vpop.f32.mrf.mxu0  ;;  %v3871_v31 = vadd.f32 %v7259_v20, %v6488_v23 }
0x17f5   :  { %v3954_v24 = vadd.f32 %v6496_v21, %v3953_v22  ;;  %v3865_v25 = vpop.f32.mrf.mxu1 }
0x17f6   :  { %v3866_v26 = vadd.f32 %v6488_v23, %v3865_v25  ;;  %v6523_v25 = vld [vmem:[%s8720_s6 + $0x6] ss:$0 sm:$0xff] }
0x17f7   :  { %7283 = vmatpush3.xpose.msk.msra.mxu0 %vm473_vm3, %v3954_v24 }
0x17f8   :  { %7287 = vmatprep.subr.mxu0 %v7586_v50 }
0x17fa   :  { %7285 = vmatmul.mubr.msk.f32.vlgmr.msra.gmra.mxu0 %vm473_vm3, %v3866_v26 }
0x17fb   :  { %7288 = vmatpush3.xpose.msk.msra.mxu0 %vm473_vm3, %v3959_v27  ;;  %v7281_v29 = vpop.f32.mrf.mxu1  ;;  %7289 = vmatprep.mubr.msk.f32.mxu0 %vm7587_vm2, %v7586_v50 }
0x17fc   :  { %v4047_v33 = vadd.f32 %v7281_v29, %v6504_v28  ;;  %7297 = vmatprep.subr.mxu0 %v7586_v50 }
0x17fd   :  { %v4041_v35 = vpop.f32.mrf.mxu1 }
0x17fe   :  { %v4042_v36 = vadd.f32 %v6504_v28, %v4041_v35  ;;  %7290 = vmatmul.mubr.msk.f32.vlgmr.msra.gmra.mxu0 %vm473_vm3, %v3871_v31  ;;  %v6539_v28 = vld [vmem:[%s8721_s10 + $0x6] ss:$0 sm:$0xff] }
0x17ff   :  { %7298 = vmatpush3.msra.mxu0 %v4047_v33  ;;  %7299 = vmatprep.mubr.msk.f32.mxu0 %vm7587_vm2, %v7586_v50 }
0x1800   :  { %7293 = vmatpush3.msra.mxu1 %v4042_v36  ;;  %7307 = vmatprep.subr.mxu0 %v6482_v57 }
0x1801   :  { %7302 = vmatprep.subr.mxu1 %v6513_v62 }
0x18ba   :  { %v4122_v38 = vpop.f32.mrf.mxu0 }
0x18bb   :  { %v4202_v39 = vsel %vm473_vm3, %v4122_v38, -inf }
0x18bc   :  { %4203 = vmax.xlane.f32.xlu0 %v4202_v39  ;;  %v7286_v9 = vpop.f32.mrf.mxu0 }
0x18be   :  { %v4198_v40 = vpop.f32.mrf.mxu0 }
0x18bf   :  { %v4205_v41 = vsel %vm473_vm3, %v4198_v40, -inf }
0x18c0   :  { %4206 = vmax.xlane.f32.xlu1 %v4205_v41  ;;  %v7291_v43 = vpop.f32.mrf.mxu0 }
0x1945   :  { %v4204_v8 = vpop.xlane.xlu0 %4203 }
0x1946   :  { %v4208_v44 = vsub.f32 %v4122_v38, %v4204_v8 }
0x1948   :  { %v4210_v45 = vmul.f32 1.442695, %v4208_v44 }
0x1949   :  { %v4207_v46 = vpop.xlane.xlu1 %4206 }
0x194a   :  { %7550 = vpow2.f32 %v4210_v45  ;;  %v4209_v49 = vsub.f32 %v4198_v40, %v4207_v46 }
0x194c   :  { %v4212_v51 = vmul.f32 1.442695, %v4209_v49 }
0x194e   :  { %7552 = vpow2.f32 %v4212_v51 }
0x1957   :  { %v7551_v53 = vpop.eup %7550 }
0x1958   :  { %v4214_v54 = vsel %vm473_vm3, %v7551_v53, 0.0 }
0x1959   :  { %4215 = vadd.xlane.f32.xlu0 %v4214_v54 }
0x195b   :  { %v7553_v55 = vpop.eup %7552 }
0x195c   :  { %v4217_v56 = vsel %vm473_vm3, %v7553_v55, 0.0 }
0x195d   :  { %4218 = vadd.xlane.f32.xlu1 %v4217_v56 }
0x19e2   :  { %v4216_v30 = vpop.xlane.xlu0 %4215 }
0x19e3   :  { %7554 = vrcp.f32 %v4216_v30 }
0x19e6   :  { %v4219_v58 = vpop.xlane.xlu1 %4218 }
0x19e7   :  { %7556 = vrcp.f32 %v4219_v58 }
0x19f0   :  { %v7555_v34 = vpop.eup %7554 }
0x19f1   :  { %v4222_v47 = vmul.f32 %v7555_v34, %v7551_v53 }
0x19f3   :  { %7295 = vmatmul.mubr.msk.f32.vlgmr.msra.gmra.mxu1 %vm473_vm3, %v4222_v47 }
0x19f4   :  { %v7557_v32 = vpop.eup %7556  ;;  %7303 = vmatpush3.msra.mxu1 %v6513_v62  ;;  %v6569_v62 = vld [vmem:[%s8758_s5 + $0xf0] sm:$0xff] }
0x19f5   :  { %v4223_v37 = vmul.f32 %v7557_v32, %v7553_v55  ;;  %7312 = vmatprep.subr.mxu1 %v6521_v63 }
0x19f7   :  { %7300 = vmatmul.mubr.msk.f32.vlgmr.msra.gmra.mxu0 %vm473_vm3, %v4223_v37 }
0x19f8   :  { %7309 = vmatprep.mubr.msk.f32.mxu0 %vm473_vm3, %v8360_v14  ;;  %7308 = vmatpush3.msra.mxu0 %v6482_v57  ;;  %v6535_v14 = vld [vmem:[%s8758_s5 + $0xc8] sm:$0xff]  ;;  %v6554_v57 = vld [vmem:[%s8754_s24 + $0xf8] sm:$0xff] }
0x19f9   :  { %7323 = vmatprep.subr.mxu0 %v6529_v48 }
0x19fb   :  { %7310 = vmatmul.mubr.msk.f32.vlgmr.msra.gmra.mxu0 %vm473_vm3, %v8358_v13  ;;  %v6531_v13 = vld [vmem:[%s8719_s8 + $0x6] ss:$0 sm:$0xff] }
0x19fc   :  { %7324 = vmatpush3.msra.mxu0 %v6529_v48  ;;  %7331 = vmatprep.mubr.msk.f32.mxu0 %vm165_vm1, %v8239_v16  ;;  %v6553_v48 = vld [vmem:[%s8754_s24 + $0xf0] sm:$0xff] }
0x19fd   :  { %7325 = vmatprep.subr.mxu0 %v6528_v59 }
0x19fe   :  { %7326 = vmatpush3.msra.mxu0 %v6528_v59  ;;  %v6552_v59 = vld [vmem:[%s8754_s24 + $0xe8] sm:$0xff] }
0x19ff   :  { %7327 = vmatprep.subr.mxu0 %v6527_v60 }
0x1a00   :  { %7328 = vmatpush3.msra.mxu0 %v6527_v60  ;;  %v6551_v60 = vld [vmem:[%s8754_s24 + $0xe0] sm:$0xff] }
0x1a01   :  { %7329 = vmatprep.subr.mxu0 %v6526_v61 }
0x1a02   :  { %7330 = vmatpush3.msra.mxu0 %v6526_v61  ;;  %v6570_v61 = vld [vmem:[%s8758_s5 + $0xf8] sm:$0xff] }
0x1a03   :  { %7332 = vmatmul.mubr.msk.f32.vlgmr.msra.gmra.mxu0 %vm165_vm1, %v8241_v17  ;;  %7345 = vmatprep.subr.mxu0 %v7586_v50 }
0x1a04   :  { %7347 = vmatprep.mubr.msk.f32.mxu0 %vm7587_vm2, %v7586_v50 }
0x1ab3   :  { %v4293_v0 = vpop.f32.mrf.mxu1 }
0x1ab4   :  { %7304 = vmatprep.mubr.msk.f32.mxu1 %vm473_vm3, %v4293_v0  ;;  %v6567_v0 = vld [vmem:[%s8758_s5 + $0xe0] sm:$0xff] }
0x1ab5   :  { %v7296_v1 = vpop.f32.mrf.mxu1 }
0x1ab6   :  { %v6548_v1 = vld [vmem:[%s8722_s11 + $0x30] sm:$0xff] }
0x1ab7   :  { %v4366_v2 = vpop.f32.mrf.mxu0 }
0x1ab8   :  { %7305 = vmatmul.mubr.msk.f32.vlgmr.msra.gmra.mxu1 %vm473_vm3, %v4366_v2  ;;  %v6562_v2 = vld [vmem:[%s8755_s28 + $0xf8] sm:$0xff] }
0x1ab9   :  { %7313 = vmatpush3.msra.mxu1 %v6521_v63  ;;  %v7301_v4 = vpop.f32.mrf.mxu0  ;;  %7320 = vmatprep.mubr.msk.f32.mxu1 %vm165_vm1, %v8239_v16  ;;  %v6568_v63 = vld [vmem:[%s8758_s5 + $0xe8] sm:$0xff] }
0x1aba   :  { %7314 = vmatprep.subr.mxu1 %v6520_v3 }
0x1abb   :  { %7315 = vmatpush3.msra.mxu1 %v6520_v3  ;;  %v8432_v7 = vpop.f32.mrf.mxu0 }
0x1abc   :  { %7316 = vmatprep.subr.mxu1 %v6519_v5 }
0x1abd   :  { %7317 = vmatpush3.msra.mxu1 %v6519_v5  ;;  %v8442_v12 = vpop.f32.mrf.mxu0 }
0x1abe   :  { %7318 = vmatprep.subr.mxu1 %v6518_v6 }
0x1abf   :  { %7319 = vmatpush3.msra.mxu1 %v6518_v6  ;;  %v6561_v6 = vld [vmem:[%s8755_s28 + $0xf0] sm:$0xff] }
0x1ac0   :  { %7321 = vmatmul.mubr.msk.f32.vlgmr.msra.gmra.mxu1 %vm165_vm1, %v8241_v17  ;;  %7334 = vmatprep.subr.mxu1 %v6537_v10 }
0x1ac1   :  { %7335 = vmatpush3.msra.mxu1 %v6537_v10  ;;  %7342 = vmatprep.mubr.msk.f32.mxu1 %vm165_vm1, %v8239_v16 }
0x1ac2   :  { %7336 = vmatprep.subr.mxu1 %v6536_v11 }
0x1ac3   :  { %v7333_v15 = vpop.f32.mrf.mxu0  ;;  %7337 = vmatpush3.msra.mxu1 %v6536_v11  ;;  %v6560_v11 = vld [vmem:[%s8755_s28 + $0xe8] sm:$0xff] }
0x1ac4   :  { %v4707_v19 = vadd.f32 %v7333_v15, %v6531_v13  ;;  %7338 = vmatprep.subr.mxu1 %v6535_v14  ;;  %v6572_v15 = vld [vmem:[%s8721_s10 + $0x7] ss:$0 sm:$0xff] }
0x1ac5   :  { %v4701_v20 = vpop.f32.mrf.mxu0  ;;  %7339 = vmatpush3.msra.mxu1 %v6535_v14 }
0x1ac6   :  { %v4702_v21 = vadd.f32 %v6531_v13, %v4701_v20  ;;  %7340 = vmatprep.subr.mxu1 %v6534_v18  ;;  %v6559_v13 = vld [vmem:[%s8755_s28 + $0xe0] sm:$0xff] }
0x1ac7   :  { %7341 = vmatpush3.msra.mxu1 %v6534_v18 }
0x1ac8   :  { %7343 = vmatmul.mubr.msk.f32.vlgmr.msra.gmra.mxu1 %vm165_vm1, %v8241_v17  ;;  %7346 = vmatpush3.xpose.msk.msra.mxu0 %vm473_vm3, %v4702_v21 }
0x1ac9   :  { %7350 = vmatprep.subr.mxu0 %v7586_v50  ;;  %7355 = vmatprep.subr.mxu1 %v7586_v50 }
0x1aca   :  { %7357 = vmatprep.mubr.msk.f32.mxu1 %vm7587_vm2, %v7586_v50 }
0x1b78   :  { %v8462_v22 = vpop.f32.mrf.mxu1 }
0x1b7a   :  { %v8464_v23 = vpop.f32.mrf.mxu1 }
0x1b80   :  { %v7322_v24 = vpop.f32.mrf.mxu1 }
0x1b81   :  { %v4619_v29 = vadd.f32 %v7322_v24, %v6523_v25  ;;  %v4531_v24 = vadd.f32 %v8432_v7, %v8462_v22 }
0x1b82   :  { %v4613_v26 = vpop.f32.mrf.mxu1 }
0x1b83   :  { %v4614_v27 = vadd.f32 %v6523_v25, %v4613_v26  ;;  %v4526_v25 = vadd.f32 %v8442_v12, %v8464_v23 }
0x1b85   :  { %7348 = vmatmul.mubr.msk.f32.vlgmr.msra.gmra.mxu0 %vm473_vm3, %v4614_v27 }
0x1b86   :  { %7351 = vmatpush3.xpose.msk.msra.mxu0 %vm473_vm3, %v4707_v19  ;;  %7352 = vmatprep.mubr.msk.f32.mxu0 %vm7587_vm2, %v7586_v50 }
0x1b87   :  { %7360 = vmatprep.subr.mxu0 %v7586_v50 }
0x1b88   :  { %v7344_v31 = vpop.f32.mrf.mxu1 }
0x1b89   :  { %v4795_v33 = vadd.f32 %v7344_v31, %v6539_v28  ;;  %7353 = vmatmul.mubr.msk.f32.vlgmr.msra.gmra.mxu0 %vm473_vm3, %v4619_v29  ;;  %v6564_v31 = vld [vmem:[%s8719_s8 + $0x7] ss:$0 sm:$0xff] }
0x1b8a   :  { %v4789_v35 = vpop.f32.mrf.mxu1  ;;  %7362 = vmatprep.mubr.msk.f32.mxu0 %vm7587_vm2, %v7586_v50 }
0x1b8b   :  { %v4790_v36 = vadd.f32 %v6539_v28, %v4789_v35  ;;  %7361 = vmatpush3.msra.mxu0 %v4795_v33 }
0x1b8c   :  { %7370 = vmatprep.subr.mxu0 %v6554_v57 }
0x1b8d   :  { %7356 = vmatpush3.msra.mxu1 %v4790_v36  ;;  %v6556_v36 = vld [vmem:[%s8720_s6 + $0x7] ss:$0 sm:$0xff] }
0x1b8e   :  { %7365 = vmatprep.subr.mxu1 %v6548_v1 }
0x1c45   :  { %v4870_v38 = vpop.f32.mrf.mxu0 }
0x1c46   :  { %v4950_v39 = vsel %vm473_vm3, %v4870_v38, -inf }
0x1c47   :  { %4951 = vmax.xlane.f32.xlu0 %v4950_v39  ;;  %v7349_v9 = vpop.f32.mrf.mxu0 }
0x1c49   :  { %v4946_v40 = vpop.f32.mrf.mxu0 }
0x1c4a   :  { %v4953_v41 = vsel %vm473_vm3, %v4946_v40, -inf }
0x1c4b   :  { %4954 = vmax.xlane.f32.xlu1 %v4953_v41  ;;  %v7354_v43 = vpop.f32.mrf.mxu0 }
0x1cd0   :  { %v4952_v8 = vpop.xlane.xlu0 %4951 }
0x1cd1   :  { %v4956_v44 = vsub.f32 %v4870_v38, %v4952_v8 }
0x1cd3   :  { %v4958_v45 = vmul.f32 1.442695, %v4956_v44 }
0x1cd4   :  { %v4955_v46 = vpop.xlane.xlu1 %4954 }
0x1cd5   :  { %7558 = vpow2.f32 %v4958_v45  ;;  %v4957_v49 = vsub.f32 %v4946_v40, %v4955_v46 }
0x1cd7   :  { %v4960_v51 = vmul.f32 1.442695, %v4957_v49 }
0x1cd9   :  { %7560 = vpow2.f32 %v4960_v51 }
0x1ce2   :  { %v7559_v53 = vpop.eup %7558 }
0x1ce3   :  { %v4962_v54 = vsel %vm473_vm3, %v7559_v53, 0.0 }
0x1ce4   :  { %4963 = vadd.xlane.f32.xlu0 %v4962_v54 }
0x1ce6   :  { %v7561_v55 = vpop.eup %7560 }
0x1ce7   :  { %v4965_v56 = vsel %vm473_vm3, %v7561_v55, 0.0 }
0x1ce8   :  { %4966 = vadd.xlane.f32.xlu1 %v4965_v56 }
0x1d6d   :  { %v4964_v30 = vpop.xlane.xlu0 %4963 }
0x1d6e   :  { %7562 = vrcp.f32 %v4964_v30 }
0x1d71   :  { %v4967_v58 = vpop.xlane.xlu1 %4966 }
0x1d72   :  { %7564 = vrcp.f32 %v4967_v58 }
0x1d7b   :  { %v7563_v34 = vpop.eup %7562 }
0x1d7c   :  { %v4970_v47 = vmul.f32 %v7563_v34, %v7559_v53 }
0x1d7e   :  { %7358 = vmatmul.mubr.msk.f32.vlgmr.msra.gmra.mxu1 %vm473_vm3, %v4970_v47 }
0x1d7f   :  { %v7565_v32 = vpop.eup %7564  ;;  %7366 = vmatpush3.msra.mxu1 %v6548_v1 }
0x1d80   :  { %v4971_v37 = vmul.f32 %v7565_v32, %v7561_v55  ;;  %7381 = vmatprep.subr.mxu1 %v6562_v2  ;;  %v6581_v32 = vld [vmem:[%s8722_s11 + $0x38] sm:$0xff] }
0x1d82   :  { %7363 = vmatmul.mubr.msk.f32.vlgmr.msra.gmra.mxu0 %vm473_vm3, %v4971_v37 }
0x1d83   :  { %7371 = vmatpush3.msra.mxu0 %v6554_v57  ;;  %7378 = vmatprep.mubr.msk.f32.mxu0 %vm165_vm1, %v8239_v16 }
0x1d84   :  { %7372 = vmatprep.subr.mxu0 %v6553_v48 }
0x1d85   :  { %7373 = vmatpush3.msra.mxu0 %v6553_v48 }
0x1d86   :  { %7374 = vmatprep.subr.mxu0 %v6552_v59 }
0x1d87   :  { %7375 = vmatpush3.msra.mxu0 %v6552_v59 }
0x1d88   :  { %7376 = vmatprep.subr.mxu0 %v6551_v60 }
0x1d89   :  { %7377 = vmatpush3.msra.mxu0 %v6551_v60 }
0x1d8a   :  { %7379 = vmatmul.mubr.msk.f32.vlgmr.msra.gmra.mxu0 %vm165_vm1, %v8241_v17  ;;  %7392 = vmatprep.subr.mxu0 %v6570_v61 }
0x1d8b   :  { %7393 = vmatpush3.msra.mxu0 %v6570_v61  ;;  %7400 = vmatprep.mubr.msk.f32.mxu0 %vm165_vm1, %v8239_v16 }
0x1d8c   :  { %7394 = vmatprep.subr.mxu0 %v6569_v62 }
0x1d8d   :  { %7395 = vmatpush3.msra.mxu0 %v6569_v62 }
0x1d8e   :  { %7396 = vmatprep.subr.mxu0 %v6568_v63 }
0x1d8f   :  { %7397 = vmatpush3.msra.mxu0 %v6568_v63  ;;  %v6585_v63 = vld [vmem:[%s8723_s12 + $0x1] ss:$0 sm:$0xff] }
0x1d90   :  { %7398 = vmatprep.subr.mxu0 %v6567_v0 }
0x1d91   :  { %7399 = vmatpush3.msra.mxu0 %v6567_v0 }
0x1d92   :  { %7401 = vmatmul.mubr.msk.f32.vlgmr.msra.gmra.mxu0 %vm165_vm1, %v8241_v17  ;;  %7413 = vmatprep.subr.mxu0 %v7586_v50 }
0x1d93   :  { %7415 = vmatprep.mubr.msk.f32.mxu0 %vm7587_vm2, %v7586_v50 }
0x1e3e   :  { %v5041_v3 = vpop.f32.mrf.mxu1 }
0x1e3f   :  { %7367 = vmatprep.mubr.msk.f32.mxu1 %vm473_vm3, %v5041_v3 }
0x1e40   :  { %v7359_v4 = vpop.f32.mrf.mxu1 }
0x1e42   :  { %v5114_v5 = vpop.f32.mrf.mxu0 }
0x1e43   :  { %7368 = vmatmul.mubr.msk.f32.vlgmr.msra.gmra.mxu1 %vm473_vm3, %v5114_v5 }
0x1e44   :  { %7382 = vmatpush3.msra.mxu1 %v6562_v2  ;;  %v7364_v10 = vpop.f32.mrf.mxu0  ;;  %7389 = vmatprep.mubr.msk.f32.mxu1 %vm165_vm1, %v8239_v16 }
0x1e45   :  { %7383 = vmatprep.subr.mxu1 %v6561_v6 }
0x1e46   :  { %7384 = vmatpush3.msra.mxu1 %v6561_v6 }
0x1e47   :  { %7385 = vmatprep.subr.mxu1 %v6560_v11 }
0x1e48   :  { %7386 = vmatpush3.msra.mxu1 %v6560_v11 }
0x1e49   :  { %7387 = vmatprep.subr.mxu1 %v6559_v13 }
0x1e4a   :  { %7388 = vmatpush3.msra.mxu1 %v6559_v13  ;;  %v7380_v16 = vpop.f32.mrf.mxu0 }
0x1e4b   :  { %7390 = vmatmul.mubr.msk.f32.vlgmr.msra.gmra.mxu1 %vm165_vm1, %v8241_v17  ;;  %7403 = vmatprep.subr.mxu1 %v7586_v50  ;;  %v5288_v22 = vadd.f32 %v7380_v16, %v6556_v36 }
0x1e4c   :  { %7405 = vmatprep.mubr.msk.f32.mxu1 %vm7587_vm2, %v7586_v50  ;;  %v5282_v14 = vpop.f32.mrf.mxu0 }
0x1e4d   :  { %v5283_v7 = vadd.f32 %v6556_v36, %v5282_v14  ;;  %v6588_v36 = vld [vmem:[%s8725_s13 + $0x1] ss:$0 sm:$0xff] }
0x1e52   :  { %v7402_v18 = vpop.f32.mrf.mxu0 }
0x1e53   :  { %v5464_v19 = vadd.f32 %v7402_v18, %v6572_v15 }
0x1e54   :  { %v5458_v20 = vpop.f32.mrf.mxu0 }
0x1e55   :  { %v5459_v21 = vadd.f32 %v6572_v15, %v5458_v20 }
0x1e57   :  { %7414 = vmatpush3.msra.mxu0 %v5459_v21  ;;  %v6593_v21 = vld [vmem:[%s8724_s15 + $0x38] sm:$0xff] }
0x1e58   :  { %7423 = vmatprep.subr.mxu0 %v6581_v32 }
0x1f03   :  { %v7369_v17 = vpop.f32.mrf.mxu1 }
0x1f04   :  { %v5202_v26 = vadd.f32 %v7369_v17, %v4531_v24  ;;  %v6592_v24 = vld [vmem:[%s8724_s15 + $0x30] sm:$0xff]  ;;  %v6591_v17 = vld [vmem:[%s8724_s15 + $0x28] sm:$0xff] }
0x1f05   :  { %v5192_v27 = vpop.f32.mrf.mxu1 }
0x1f06   :  { %v8552_v28 = vadd.f32 %v5192_v27, %v4526_v25  ;;  %v6590_v25 = vld [vmem:[%s8724_s15 + $0x20] sm:$0xff] }
0x1f0b   :  { %v7391_v29 = vpop.f32.mrf.mxu1 }
0x1f0c   :  { %v5376_v12 = vadd.f32 %v7391_v29, %v6564_v31 }
0x1f0d   :  { %v5370_v33 = vpop.f32.mrf.mxu1 }
0x1f0e   :  { %v5371_v35 = vadd.f32 %v6564_v31, %v5370_v33 }
0x1f10   :  { %7404 = vmatpush3.xpose.msk.msra.mxu1 %vm473_vm3, %v5371_v35 }
0x1f11   :  { %7408 = vmatprep.subr.mxu1 %v7586_v50 }
0x1f13   :  { %7406 = vmatmul.mubr.msk.f32.vlgmr.msra.gmra.mxu1 %vm473_vm3, %v5283_v7 }
0x1f14   :  { %7409 = vmatpush3.xpose.msk.msra.mxu1 %vm473_vm3, %v5376_v12  ;;  %7410 = vmatprep.mubr.msk.f32.mxu1 %vm7587_vm2, %v7586_v50 }
0x1f15   :  { %7418 = vmatprep.subr.mxu1 %v7586_v50 }
0x1f17   :  { %7411 = vmatmul.mubr.msk.f32.vlgmr.msra.gmra.mxu1 %vm473_vm3, %v5288_v22 }
0x1f18   :  { %7419 = vmatpush3.msra.mxu1 %v5464_v19  ;;  %7420 = vmatprep.mubr.msk.f32.mxu1 %vm7587_vm2, %v7586_v50 }
0x1f19   :  { %7428 = vmatprep.subr.mxu1 %v6593_v21 }
0x1fd3   :  { %v5539_v23 = vpop.f32.mrf.mxu1 }
0x1fd4   :  { %v5619_v38 = vsel %vm473_vm3, %v5539_v23, -inf }
0x1fd5   :  { %5620 = vmax.xlane.f32.xlu0 %v5619_v38  ;;  %v7407_v39 = vpop.f32.mrf.mxu1  ;;  %v6589_v38 = vld [vmem:[%s8726_s14 + $0x1] ss:$0 sm:$0xff] }
0x1fd7   :  { %v5615_v9 = vpop.f32.mrf.mxu1 }
0x1fd8   :  { %v5622_v40 = vsel %vm473_vm3, %v5615_v9, -inf }
0x1fd9   :  { %5623 = vmax.xlane.f32.xlu1 %v5622_v40  ;;  %v7412_v41 = vpop.f32.mrf.mxu1 }
0x1fda   :  { %v6613_v41 = vld [vmem:[%s8727_s17 + $0xf8] sm:$0xff] }
0x205e   :  { %v5621_v43 = vpop.xlane.xlu0 %5620 }
0x205f   :  { %v5625_v8 = vsub.f32 %v5539_v23, %v5621_v43  ;;  %v6612_v43 = vld [vmem:[%s8727_s17 + $0xf0] sm:$0xff] }
0x2061   :  { %v5627_v44 = vmul.f32 1.442695, %v5625_v8  ;;  %v6611_v8 = vld [vmem:[%s8727_s17 + $0xe8] sm:$0xff] }
0x2062   :  { %v5624_v45 = vpop.xlane.xlu1 %5623 }
0x2063   :  { %7566 = vpow2.f32 %v5627_v44  ;;  %v5626_v46 = vsub.f32 %v5615_v9, %v5624_v45  ;;  %v6610_v44 = vld [vmem:[%s8727_s17 + $0xe0] sm:$0xff]  ;;  %v6609_v45 = vld [vmem:[%s8727_s17 + $0xd8] sm:$0xff] }
0x2065   :  { %v5629_v49 = vmul.f32 1.442695, %v5626_v46  ;;  %v6608_v46 = vld [vmem:[%s8727_s17 + $0xd0] sm:$0xff] }
0x2067   :  { %7568 = vpow2.f32 %v5629_v49  ;;  %v6607_v49 = vld [vmem:[%s8727_s17 + $0xc8] sm:$0xff] }
0x2070   :  { %v7567_v51 = vpop.eup %7566 }
0x2071   :  { %v5631_v53 = vsel %vm473_vm3, %v7567_v51, 0.0 }
0x2072   :  { %5632 = vadd.xlane.f32.xlu0 %v5631_v53  ;;  %v6605_v53 = vld [vmem:[%s8727_s17 + $0xb8] sm:$0xff] }
0x2074   :  { %v7569_v54 = vpop.eup %7568 }
0x2075   :  { %v5634_v55 = vsel %vm473_vm3, %v7569_v54, 0.0 }
0x2076   :  { %5635 = vadd.xlane.f32.xlu1 %v5634_v55  ;;  %v6603_v55 = vld [vmem:[%s8727_s17 + $0xa8] sm:$0xff] }
0x20fb   :  { %v5633_v56 = vpop.xlane.xlu0 %5632 }
0x20fc   :  { %7570 = vrcp.f32 %v5633_v56  ;;  %v6602_v56 = vld [vmem:[%s8727_s17 + $0xa0] sm:$0xff] }
0x20ff   :  { %v5636_v57 = vpop.xlane.xlu1 %5635 }
0x2100   :  { %7572 = vrcp.f32 %v5636_v57  ;;  %v6601_v57 = vld [vmem:[%s8727_s17 + $0x98] sm:$0xff] }
0x2109   :  { %v7571_v30 = vpop.eup %7570 }
0x210a   :  { %v5639_v58 = vmul.f32 %v7571_v30, %v7567_v51  ;;  %v6606_v51 = vld [vmem:[%s8727_s17 + $0xc0] sm:$0xff]  ;;  %v6600_v30 = vld [vmem:[%s8727_s17 + $0x90] sm:$0xff] }
0x210c   :  { %7416 = vmatmul.mubr.msk.f32.vlgmr.msra.gmra.mxu0 %vm473_vm3, %v5639_v58  ;;  %v6599_v58 = vld [vmem:[%s8727_s17 + $0x88] sm:$0xff] }
0x210d   :  { %v7573_v34 = vpop.eup %7572  ;;  %7424 = vmatpush3.msra.mxu0 %v6581_v32 }
0x210e   :  { %v5640_v47 = vmul.f32 %v7573_v34, %v7569_v54  ;;  %7439 = vmatprep.subr.mxu0 %v6613_v41  ;;  %v6604_v54 = vld [vmem:[%s8727_s17 + $0xb0] sm:$0xff]  ;;  %v6598_v34 = vld [vmem:[%s8727_s17 + $0x80] sm:$0xff] }
0x2110   :  { %7421 = vmatmul.mubr.msk.f32.vlgmr.msra.gmra.mxu1 %vm473_vm3, %v5640_v47  ;;  %v6595_v47 = vld [vmem:[%s8728_s16 + $0x1] ss:$0 sm:$0xff] }
0x2111   :  { %7429 = vmatpush3.msra.mxu1 %v6593_v21 }
0x2112   :  { %7430 = vmatprep.subr.mxu1 %v6592_v24 }
0x2113   :  { %7431 = vmatpush3.msra.mxu1 %v6592_v24 }
0x2114   :  { %7432 = vmatprep.subr.mxu1 %v6591_v17 }
0x2115   :  { %7433 = vmatpush3.msra.mxu1 %v6591_v17 }
0x2116   :  { %7434 = vmatprep.subr.mxu1 %v6590_v25 }
0x2117   :  { %7435 = vmatpush3.msra.mxu1 %v6590_v25 }
0x2118   :  { %7474 = vmatprep.subr.mxu1 %v7586_v50 }
0x21cc   :  { %v5710_v37 = vpop.f32.mrf.mxu0 }
0x21cd   :  { %7425 = vmatprep.mubr.msk.f32.mxu0 %vm473_vm3, %v5710_v37 }
0x21ce   :  { %v7417_v48 = vpop.f32.mrf.mxu0 }
0x21d0   :  { %v5783_v59 = vpop.f32.mrf.mxu1 }
0x21d1   :  { %7426 = vmatmul.mubr.msk.f32.vlgmr.msra.gmra.mxu0 %vm473_vm3, %v5783_v59 }
0x21d2   :  { %v7422_v60 = vpop.f32.mrf.mxu1  ;;  %7440 = vmatpush3.msra.mxu0 %v6613_v41 }
0x21d3   :  { %7441 = vmatprep.subr.mxu0 %v6612_v43 }
0x21d4   :  { %7442 = vmatpush3.msra.mxu0 %v6612_v43 }
0x21d5   :  { %7443 = vmatprep.subr.mxu0 %v6611_v8 }
0x21d6   :  { %7444 = vmatpush3.msra.mxu0 %v6611_v8 }
0x21d7   :  { %7445 = vmatprep.subr.mxu0 %v6610_v44 }
0x21d8   :  { %7446 = vmatpush3.msra.mxu0 %v6610_v44 }
0x21d9   :  { %7447 = vmatprep.subr.mxu0 %v6609_v45 }
0x21da   :  { %7448 = vmatpush3.msra.mxu0 %v6609_v45 }
0x21db   :  { %7449 = vmatprep.subr.mxu0 %v6608_v46 }
0x21dc   :  { %7450 = vmatpush3.msra.mxu0 %v6608_v46 }
0x21dd   :  { %7451 = vmatprep.subr.mxu0 %v6607_v49 }
0x21de   :  { %7452 = vmatpush3.msra.mxu0 %v6607_v49 }
0x21df   :  { %7453 = vmatprep.subr.mxu0 %v6606_v51 }
0x21e0   :  { %7454 = vmatpush3.msra.mxu0 %v6606_v51 }
0x21e1   :  { %7455 = vmatprep.subr.mxu0 %v6605_v53 }
0x21e2   :  { %7456 = vmatpush3.msra.mxu0 %v6605_v53 }
0x21e3   :  { %7457 = vmatprep.subr.mxu0 %v6604_v54 }
0x21e4   :  { %7458 = vmatpush3.msra.mxu0 %v6604_v54 }
0x21e5   :  { %7459 = vmatprep.subr.mxu0 %v6603_v55 }
0x21e6   :  { %7460 = vmatpush3.msra.mxu0 %v6603_v55 }
0x21e7   :  { %7461 = vmatprep.subr.mxu0 %v6602_v56 }
0x21e8   :  { %7462 = vmatpush3.msra.mxu0 %v6602_v56 }
0x21e9   :  { %7463 = vmatprep.subr.mxu0 %v6601_v57 }
0x21ea   :  { %7464 = vmatpush3.msra.mxu0 %v6601_v57 }
0x21eb   :  { %7465 = vmatprep.subr.mxu0 %v6600_v30 }
0x21ec   :  { %7466 = vmatpush3.msra.mxu0 %v6600_v30 }
0x21ed   :  { %7467 = vmatprep.subr.mxu0 %v6599_v58 }
0x21ee   :  { %7468 = vmatpush3.msra.mxu0 %v6599_v58 }
0x21ef   :  { %7469 = vmatprep.subr.mxu0 %v6598_v34 }
0x21f0   :  { %7470 = vmatpush3.msra.mxu0 %v6598_v34 }
0x2291   :  { %v7427_v61 = vpop.f32.mrf.mxu0 }
0x2292   :  { %v5871_v62 = vadd.f32 %v7427_v61, %v5202_v26 }
0x2293   :  { %v5861_v0 = vpop.f32.mrf.mxu0 }
0x2294   :  { %v5873_v1 = vadd.f32 %v5871_v62, %v8205_v42  ;;  %v5870_v2 = vadd.f32 %v5861_v0, %v8552_v28 }
0x2296   :  { %v8586_v3 = vadd.f32 %v6585_v63, %v5873_v1  ;;  %v5872_v4 = vadd.f32 %v5870_v2, %v8208_v52 }
0x2298   :  { %v8589_v5 = vadd.f32 %v6585_v63, %v5872_v4  ;;  %v5891_v6 = vsel %vm165_vm1, %v8586_v3, 0.0 }
0x2299   :  { %5892 = vadd.xlane.f32.xlu1 %v5891_v6 }
0x229a   :  { %v5888_v10 = vsel %vm165_vm1, %v8589_v5, 0.0 }
0x229b   :  { %5889 = vadd.xlane.f32.xlu0 %v5888_v10 }
0x2322   :  { %v5893_v11 = vpop.xlane.xlu1 %5892 }
0x2323   :  { %v5895_v13 = vmul.f32 0.03125, %v5893_v11 }
0x2324   :  { %v5890_v16 = vpop.xlane.xlu0 %5889 }
0x2325   :  { %v5897_v42 = vsub.f32 %v8586_v3, %v5895_v13  ;;  %v5894_v14 = vmul.f32 0.03125, %v5890_v16 }
0x2327   :  { %v5896_v15 = vsub.f32 %v8589_v5, %v5894_v14  ;;  %v5899_v18 = vmul.f32 %v5897_v42, %v5897_v42 }
0x2329   :  { %v5903_v52 = vsel %vm165_vm1, %v5899_v18, 0.0  ;;  %v5898_v19 = vmul.f32 %v5896_v15, %v5896_v15 }
0x232a   :  { %5904 = vadd.xlane.f32.xlu1 %v5903_v52 }
0x232b   :  { %v5900_v20 = vsel %vm165_vm1, %v5898_v19, 0.0 }
0x232c   :  { %5901 = vadd.xlane.f32.xlu0 %v5900_v20  ;;  %v6615_v20 = vld [vmem:[%s8729_s18 + $0x1] ss:$0 sm:$0xff] }
0x23b3   :  { %v5905_v26 = vpop.xlane.xlu1 %5904 }
0x23b4   :  { %v5907_v27 = vmul.f32 0.03125, %v5905_v26 }
0x23b5   :  { %v5902_v28 = vpop.xlane.xlu0 %5901 }
0x23b6   :  { %v5909_v29 = vadd.f32 1e-05, %v5907_v27  ;;  %v5906_v31 = vmul.f32 0.03125, %v5902_v28  ;;  %v6146_v27 = vld [vmem:[%s8730_s19] sm:$0x3]  ;;  %v6223_v28 = vld [vmem:[%s8731_s20 + $0x18] sm:$0xff] }
0x23b8   :  { %7574 = vrsqrt.f32 %v5909_v29  ;;  %v5908_v33 = vadd.f32 1e-05, %v5906_v31  ;;  %v6220_v29 = vld [vmem:[%s8731_s20] sm:$0xff]  ;;  %v29_v31 = vstv %s8732_s21 }
0x23b9   :  { %30 = vst [vmem:[#allocation2] sm:$0x1] %v29_v31 }
0x23ba   :  { %7576 = vrsqrt.f32 %v5908_v33 }
0x23c5   :  { %v7575_v35 = vpop.eup %7574 }
0x23c6   :  { %v5913_v7 = vmul.f32 %v7575_v35, %v5897_v42 }
0x23c7   :  { %v7577_v12 = vpop.eup %7576 }
0x23c8   :  { %v5912_v22 = vmul.f32 %v7577_v12, %v5896_v15  ;;  %v5921_v23 = vmul.f32 %v6588_v36, %v5913_v7 }
0x23ca   :  { %v5920_v39 = vmul.f32 %v6588_v36, %v5912_v22  ;;  %v5929_v40 = vadd.f32 %v6589_v38, %v5921_v23  ;;  %v6617_v36 = vld [vmem:[#allocation2] ss:$0 sm:$0xff] }
0x23cc   :  { %v5928_v9 = vadd.f32 %v6589_v38, %v5920_v39 }
0x23ce   :  { %7436 = vmatprep.mubr.msk.f32.mxu1 %vm165_vm1, %v5928_v9 }
0x23cf   :  { %7437 = vmatmul.mubr.msk.f32.vlgmr.msra.gmra.mxu1 %vm165_vm1, %v5929_v40 }
0x23d0   :  { %7478 = vmatprep.mubr.msk.f32.mxu1 %vm7587_vm2, %v7586_v50 }
0x248f   :  { %v7438_v32 = vpop.f32.mrf.mxu1 }
0x2490   :  { %v6021_v37 = vadd.f32 %v7438_v32, %v6595_v47 }
0x2491   :  { %v6015_v48 = vpop.f32.mrf.mxu1 }
0x2492   :  { %v6027_v59 = vmul.f32 0.044715, %v6021_v37  ;;  %v6016_v60 = vadd.f32 %v6595_v47, %v6015_v48  ;;  %v6025_v15 = vmul.f32 0.5, %v6021_v37 }
0x2494   :  { %v6029_v61 = vmul.f32 %v6027_v59, %v6021_v37  ;;  %v6026_v62 = vmul.f32 0.044715, %v6016_v60  ;;  %v6024_v42 = vmul.f32 0.5, %v6016_v60 }
0x2496   :  { %v6031_v63 = vmul.f32 %v6029_v61, %v6021_v37  ;;  %v6028_v0 = vmul.f32 %v6026_v62, %v6016_v60 }
0x2498   :  { %v6033_v1 = vadd.f32 %v6031_v63, %v6021_v37  ;;  %v6030_v2 = vmul.f32 %v6028_v0, %v6016_v60 }
0x249a   :  { %v6032_v4 = vadd.f32 %v6030_v2, %v6016_v60  ;;  %v6035_v6 = vmul.f32 0.7978846, %v6033_v1 }
0x249c   :  { %v6034_v10 = vmul.f32 0.7978846, %v6032_v4  ;;  %7578 = vtanh.f32 %v6035_v6 }
0x249e   :  { %7580 = vtanh.f32 %v6034_v10 }
0x24a9   :  { %v7579_v11 = vpop.eup %7578 }
0x24aa   :  { %v6039_v16 = vadd.f32 1.0, %v7579_v11 }
0x24ab   :  { %v7581_v13 = vpop.eup %7580 }
0x24ac   :  { %v6038_v14 = vadd.f32 1.0, %v7581_v13  ;;  %v6041_v52 = vmul.f32 %v6039_v16, %v6025_v15 }
0x24ae   :  { %v6040_v18 = vmul.f32 %v6038_v14, %v6024_v42 }
0x24b0   :  { %7471 = vmatprep.mubr.f32.mxu0 %v6040_v18 }
0x24b1   :  { %7472 = vmatmul.mubr.f32.vlgmr.msra.gmra.mxu0 %v6041_v52 }
0x2571   :  { %v7473_v19 = vpop.f32.mrf.mxu0 }
0x2572   :  { %v6135_v21 = vadd.f32 %v7473_v19, %v8586_v3  ;;  %v6222_v3 = vld [vmem:[%s8731_s20 + $0x10] sm:$0xff] }
0x2573   :  { %v6125_v24 = vpop.f32.mrf.mxu0 }
0x2574   :  { %v6145_v17 = vadd.f32 %v6615_v20, %v6135_v21  ;;  %v6134_v25 = vadd.f32 %v6125_v24, %v8589_v5  ;;  %v6221_v5 = vld [vmem:[%s8731_s20 + $0x8] sm:$0xff] }
0x2576   :  { %v6144_v26 = vadd.f32 %v6615_v20, %v6134_v25  ;;  %7475 = vmatpush3.msra.mxu1 %v6145_v17 }
0x2577   :  { %7476 = vmatprep.subr.mxu1 %v7586_v50 }
0x2578   :  { %7477 = vmatpush3.msra.mxu1 %v6144_v26 }
0x2579   :  { %7479 = vmatmul.mubr.msk.f32.vlgmr.msra.gmra.mxu1 %vm81_vm0, %v6146_v27  ;;  %7481 = vmatprep.subr.mxu1 %v7586_v50 }
0x257a   :  { %7482 = vmatpush3.msra.mxu1 %v6223_v28  ;;  %7489 = vmatprep.mubr.msk.f32.mxu1 %vm7587_vm2, %v7586_v50 }
0x257b   :  { %7483 = vmatprep.subr.mxu1 %v7586_v50 }
0x257c   :  { %7484 = vmatpush3.msra.mxu1 %v6222_v3 }
0x257d   :  { %7485 = vmatprep.subr.mxu1 %v7586_v50 }
0x257e   :  { %7486 = vmatpush3.msra.mxu1 %v6221_v5 }
0x257f   :  { %7487 = vmatprep.subr.mxu1 %v7586_v50 }
0x2580   :  { %7488 = vmatpush3.msra.mxu1 %v6220_v29 }
0x2639   :  { %v6216_v33 = vpop.f32.mrf.mxu1 }
0x263a   :  { %7490 = vmatmul.mubr.msk.f32.vlgmr.msra.gmra.mxu1 %vm165_vm1, %v6216_v33 }
0x263b   :  { %v7480_v35 = vpop.f32.mrf.mxu1 }
0x26fa   :  { %v6300_v7 = vpop.f32.mrf.mxu1 }
0x26fb   :  { %v6301_v12 = vadd.f32 %v6617_v36, %v6300_v7 }
0x26fc   :  { %v7491_v22 = vpop.f32.mrf.mxu1 }
0x26fd   :  { %6305 = vst.msk [vmem:[%s8733_s22] sm:$0x3] %vm6304_vm4, %v6301_v12  ;;  %v6306_v50 = vsub.f32 0.0, %v6301_v12 }
0x26ff   :  { %v6307_v23 = vmul.f32 1.442695, %v6306_v50 }
0x2701   :  { %7582 = vpow2.f32 %v6307_v23 }
0x270e   :  { %v7583_v38 = vpop.eup %7582 }
0x270f   :  { %v6309_v39 = vadd.f32 1.0, %v7583_v38 }
0x2711   :  { %7584 = vrcp.f32 %v6309_v39 }
0x271e   :  { %v7585_v9 = vpop.eup %7584 }
0x271f   :  { %6312 = vst.msk [vmem:[%s8734_s23] sm:$0x3] %vm6304_vm4, %v7585_v9 }

</bundles_post_ra>
